<compile_context>
chip_gen: v5e
topology: v5e:2x2
jax: 0.10.0
libtpu: 0.0.40
codegen_flags: <defaults>
</compile_context>

<pallas_src>
import re
import numpy as np
import jax
import jax.numpy as jnp
from jax.experimental import pallas as pl
from jax.experimental.pallas import tpu as pltpu


def critic_kernel(xin_ref, wse_ref, bse_ref, pivec_ref, bqe_ref,
                  wh_ref, bh_ref, wout_ref, bout_ref, q_ref):
    """One row-tile of the fused Critic forward.

    xin_ref : (T, F+1) f32 -- [cated features | tau] merged row stream
    q_ref   : (8, T)   f32 -- lane-dense transposed output; row 0 = q1, row 1 = q2
    """
    f32 = jnp.float32
    mm = wse_ref.dtype     # MXU operand dtype (bf16 default, f32 for the exactness check)
    ew = bse_ref.dtype     # elementwise epilogue dtype (bf16 on v6e/v7x, else f32)

    x = xin_ref[...]                               # (T, F+1) f32
    nf = x.shape[1] - 1
    cated = x[:, :nf].astype(mm)                   # (T, F) matmul operand
    tau = x[:, nf:]                                # (T, 1) f32 -- quantiles kept in f32

    # state embedding: Linear(F, E) + ReLU  (rows pre-repeated n_support times)
    se = jnp.dot(cated, wse_ref[...], preferred_element_type=f32)
    se = jnp.maximum(se.astype(ew) + bse_ref[...], 0)             # (T, E)

    # quantile embedding, rank-1 form (reference applies no cos):
    #   relu((tau * pi_mtx) @ wqe + bqe) == relu(tau * (pi_mtx @ wqe) + bqe)
    qe = jnp.maximum(tau * pivec_ref[...] + bqe_ref[...], 0.0)    # (T, E) f32 VPU

    mul = se * qe.astype(ew)                                      # (T, E)

    # fused q1||q2 hidden layer: Linear(E, 2*node) + ReLU
    h = jnp.dot(mul.astype(mm), wh_ref[...], preferred_element_type=f32)
    h = jnp.maximum(h.astype(ew) + bh_ref[...], 0)                # (T, 2*node)

    # fused block-diagonal output head -> (T, 8) (cols 0/1 = q1/q2, rest zero padding),
    # transposed to a lane-dense (8, T) block so the writeback uses full-width stores.
    q = jnp.dot(h.astype(mm), wout_ref[...], preferred_element_type=f32) + bout_ref[...]
    q_ref[...] = q.T.astype(q_ref.dtype)


def _round_up(x, m):
    return ((x + m - 1) // m) * m


def _tpu_generation():
    """Best-effort TPU generation (5, 6, 7, ...) from device_kind; None if unknown."""
    try:
        dev = jax.devices()[0]
        if dev.platform != "tpu":
            return None
        m = re.search(r"(\d+)", dev.device_kind)
        return int(m.group(1)) if m else None
    except Exception:
        return None


def _select_tile_rows(n_rows, gen, requested=None):
    """Row-tile size: multiple of 128, generation-aware cap, >=2 grid steps on v7x."""
    if requested is not None:
        return max(128, (int(requested) // 128) * 128)
    n128 = _round_up(max(n_rows, 1), 128)
    if gen is not None and gen >= 7:
        cap = 1024          # 64 MiB VMEM per TensorCore on v7x -> keep row tiles modest
    elif gen == 6:
        cap = 2048          # 128 MiB VMEM on v6e (explicit vmem_limit raised below)
    else:
        cap = 1024          # v5e / older / unknown
    tile = min(cap, n128)
    # v7x megacore: ensure the "parallel" grid axis has at least 2 steps so both
    # TensorCores get work (a single-step grid leaves one TC idle).
    if gen is not None and gen >= 7 and n128 >= 256:
        tile = min(tile, max(128, (n128 // 2) // 128 * 128))
    return tile


def _vmem_limit_bytes(tile_rows, gen):
    # ~11 KB/row covers the streamed I/O double buffers plus f32 matmul accumulators and
    # bf16/f32 intermediates (se/qe/mul/h); ~2 MB covers the resident weights/biases.
    est = (2 << 20) + tile_rows * 11_000
    cap = (48 << 20) if (gen is not None and gen >= 7) else (100 << 20)
    return int(min(cap, max(32 << 20, int(est * 1.4))))


def critic_forward(params, xs, action, quantile, *, tile_rows=None,
                   matmul_dtype=jnp.bfloat16, elementwise_dtype=None):
    f32 = jnp.float32
    gen = _tpu_generation()

    # bf16 elementwise epilogues only where the VPU has a packed bf16 path (v6e/v7x) and
    # only on the bf16 deployment path; v5e/unknown and the f32 exactness path stay f32.
    if elementwise_dtype is None:
        if jnp.dtype(matmul_dtype) == jnp.dtype(jnp.bfloat16) and gen is not None and gen >= 6:
            elementwise_dtype = jnp.bfloat16
        else:
            elementwise_dtype = f32
    ew = elementwise_dtype

    # ---- glue (layout only) ----
    cated = jnp.concatenate(list(xs) + [action], axis=-1).astype(f32)   # (B, F)
    B, F = cated.shape
    S = quantile.shape[1]
    E = params["wse"].shape[1]
    node = params["w1a"].shape[1]
    N = B * S

    # repeat_interleave realized by repeating the *input* rows; tau folded into the same
    # row stream as a trailing f32 feature column (drops the lane-sparse tau input).
    cated_rep = jnp.repeat(cated, S, axis=0)                            # (N, F)
    tau_flat = quantile.reshape(N, 1).astype(f32)                       # (N, 1)
    xin = jnp.concatenate([cated_rep, tau_flat], axis=-1)               # (N, F+1) f32

    # rank-1 quantile-embedding precompute: pivec = pi_mtx @ wqe   (exact; no cos in ref)
    pivec = (params["pi"].astype(f32) @ params["wqe"].astype(f32)).astype(f32)   # (1, E)

    # fused head weights: hidden (E, 2*node); block-diagonal output padded to 8 columns
    wh = jnp.concatenate([params["w1a"], params["w2a"]], axis=1)        # (E, 2*node)
    bh = jnp.concatenate([params["b1a"], params["b2a"]], axis=1)        # (1, 2*node)
    wout = jnp.zeros((2 * node, 8), f32)
    wout = wout.at[:node, 0:1].set(params["w1b"])
    wout = wout.at[node:, 1:2].set(params["w2b"])
    bout = jnp.zeros((1, 8), f32)
    bout = bout.at[:, 0:1].set(params["b1b"])
    bout = bout.at[:, 1:2].set(params["b2b"])

    wse = params["wse"].astype(matmul_dtype)        # MXU operands
    wh = wh.astype(matmul_dtype)
    wout = wout.astype(matmul_dtype)
    bse = params["bse"].astype(ew)                  # elementwise-epilogue dtype
    bh = bh.astype(ew)
    bqe = params["bqe"].astype(f32)                 # quantile path stays f32
    bout = bout.astype(f32)

    # ---- tiling: big row tiles (multiple of 128), generation-aware ----
    tile = _select_tile_rows(N, gen, tile_rows)
    n_pad = _round_up(N, tile)
    if n_pad != N:
        xin = jnp.pad(xin, ((0, n_pad - N), (0, 0)))

    grid = (n_pad // tile,)
    vmem_limit = _vmem_limit_bytes(tile, gen)

    def call_kernel(single_buffer_weights):
        # Constant-index weight/bias blocks never change across the grid -> single buffer.
        wmode = pl.Buffered(1) if single_buffer_weights else None

        def full_spec(r, c):
            if wmode is None:
                return pl.BlockSpec((r, c), lambda i: (0, 0))
            return pl.BlockSpec((r, c), lambda i: (0, 0), pipeline_mode=wmode)

        return pl.pallas_call(
            critic_kernel,
            out_shape=jax.ShapeDtypeStruct((8, n_pad), f32),
            grid_spec=pltpu.PrefetchScalarGridSpec(
                num_scalar_prefetch=0,
                grid=grid,
                in_specs=[
                    pl.BlockSpec((tile, F + 1), lambda i: (i, 0)),       # merged rows+tau
                    full_spec(F, E), full_spec(1, E),                    # state-emb W, b
                    full_spec(1, E), full_spec(1, E),                    # pivec, quantile b
                    full_spec(E, 2 * node), full_spec(1, 2 * node),      # fused hidden W, b
                    full_spec(2 * node, 8), full_spec(1, 8),             # fused output W, b
                ],
                out_specs=pl.BlockSpec((8, tile), lambda i: (0, i)),     # lane-dense (8, T)
            ),
            compiler_params=pltpu.CompilerParams(
                dimension_semantics=("parallel",),
                vmem_limit_bytes=vmem_limit),
        )(xin, wse, bse, pivec, bqe, wh, bh, wout, bout)

    try:
        q8 = call_kernel(True)
    except Exception:
        # Fallback if pl.Buffered(1) is not supported by this Pallas/Mosaic build.
        q8 = call_kernel(False)

    # padded rows/columns hold garbage (zero-padded tau/cated) -- keep this slice.
    q1 = q8[0, :N].reshape(B, S)
    q2 = q8[1, :N].reshape(B, S)
    return q1, q2


def make_params(key, flatten_size, embedding_size, node):
    """Deterministic parameter init (PyTorch-Linear-style uniform bounds)."""
    def linear(k, fan_in, fan_out):
        kw, kb = jax.random.split(k)
        bound = 1.0 / np.sqrt(fan_in)
        w = jax.random.uniform(kw, (fan_in, fan_out), jnp.float32, -bound, bound)
        b = jax.random.uniform(kb, (1, fan_out), jnp.float32, -bound, bound)
        return w, b

    keys = jax.random.split(key, 6)
    wse, bse = linear(keys[0], flatten_size, embedding_size)
    wqe, bqe = linear(keys[1], 128, embedding_size)
    w1a, b1a = linear(keys[2], embedding_size, node)
    w1b, b1b = linear(keys[3], node, 1)
    w2a, b2a = linear(keys[4], embedding_size, node)
    w2b, b2b = linear(keys[5], node, 1)
    pi = (np.pi * np.arange(0, 128, dtype=np.float32))[None, :]   # pi_mtx buffer (1,128)
    return dict(pi=jnp.asarray(pi),
                wse=wse, bse=bse, wqe=wqe, bqe=bqe,
                w1a=w1a, b1a=b1a, w1b=w1b, b1b=b1b,
                w2a=w2a, b2a=b2a, w2b=w2b, b2b=b2b)


def critic_reference(params, xs, action, quantile):
    """Pure-JAX f32 mirror of the PyTorch forward for validation."""
    cated = jnp.concatenate(list(xs) + [action], axis=-1)
    B = cated.shape[0]
    S = quantile.shape[1]
    se = jnp.maximum(cated @ params["wse"] + params["bse"], 0.0)
    se = jnp.repeat(se, S, axis=0)                                  # repeat_interleave rows
    costau = quantile.reshape(-1, 1) * params["pi"]                 # NOTE: no cos, as in ref
    qe = jnp.maximum(costau @ params["wqe"] + params["bqe"], 0.0)
    mul = se * qe
    h1 = jnp.maximum(mul @ params["w1a"] + params["b1a"], 0.0)
    q1 = (h1 @ params["w1b"] + params["b1b"]).reshape(B, S)
    h2 = jnp.maximum(mul @ params["w2a"] + params["b2a"], 0.0)
    q2 = (h2 @ params["w2b"] + params["b2b"]).reshape(B, S)
    return q1, q2


if __name__ == "__main__":
    # small shapes: batch=2, vector state dim=12, action dim=4, n_support=8
    B, STATE_DIM, ACT_DIM, N_SUPPORT, NODE = 2, 12, 4, 8, 256
    FLATTEN = STATE_DIM + ACT_DIM
    EMBED = max(FLATTEN, NODE)

    root = jax.random.PRNGKey(0)
    k_params, k_x, k_a, k_q = jax.random.split(root, 4)

    params = make_params(k_params, FLATTEN, EMBED, NODE)
    x = jax.random.normal(k_x, (B, STATE_DIM), jnp.float32)
    action = jax.random.normal(k_a, (B, ACT_DIM), jnp.float32)
    quantile = jax.random.uniform(k_q, (B, N_SUPPORT), jnp.float32)

    r1, r2 = critic_reference(params, [x], action, quantile)

    # 1) exactness of the structural optimizations (merged tau stream, rank-1 quantile
    #    embedding, fused heads, lane-dense transposed output) with f32 matmuls/epilogues.
    q1_f32, q2_f32 = critic_forward(params, [x], action, quantile,
                                    matmul_dtype=jnp.float32)
    jax.block_until_ready((q1_f32, q2_f32))
    np.testing.assert_allclose(np.asarray(q1_f32), np.asarray(r1), rtol=2e-3, atol=2e-3)
    np.testing.assert_allclose(np.asarray(q2_f32), np.asarray(r2), rtol=2e-3, atol=2e-3)

    # 2) default deployment path (bf16 MXU operands; bf16 epilogues on v6e/v7x).
    #    Tolerance sized to expected bf16 rounding (~1-2% relative, outputs have std ~5
    #    at these shapes), much tighter than an "any O(1) output" bound.
    q1, q2 = critic_forward(params, [x], action, quantile)
    jax.block_until_ready((q1, q2))
    np.testing.assert_allclose(np.asarray(q1), np.asarray(r1), rtol=5e-2, atol=1.0)
    np.testing.assert_allclose(np.asarray(q2), np.asarray(r2), rtol=5e-2, atol=1.0)

    print("KERNEL_OK")
</pallas_src>

<mosaic_0001>
module attributes {stable_mosaic.version = 11 : i64} {
  func.func @critic_kernel(%arg0: i32, %arg1: memref<128x17xf32, #tpu.memory_space<vmem>>, %arg2: memref<16x256xf32, #tpu.memory_space<vmem>>, %arg3: memref<1x256xf32, #tpu.memory_space<vmem>>, %arg4: memref<1x256xf32, #tpu.memory_space<vmem>>, %arg5: memref<1x256xf32, #tpu.memory_space<vmem>>, %arg6: memref<256x512xf32, #tpu.memory_space<vmem>>, %arg7: memref<1x512xf32, #tpu.memory_space<vmem>>, %arg8: memref<512x8xf32, #tpu.memory_space<vmem>>, %arg9: memref<1x8xf32, #tpu.memory_space<vmem>>, %arg10: memref<8x128xf32, #tpu.memory_space<vmem>>) attributes {dimension_semantics = [#tpu.dimension_semantics<parallel>], iteration_bounds = array<i64: 1>, scalar_prefetch = 0 : i64, scratch_operands = 0 : i64, tpu.core_type = #tpu.core_type<tc>, window_params = [{transform_indices = @transform_0, window_bounds = array<i64: 128, 17>}, {pipeline_mode = #tpu.pipeline_mode<synchronous>, transform_indices = @transform_1, window_bounds = array<i64: 16, 256>}, {pipeline_mode = #tpu.pipeline_mode<synchronous>, transform_indices = @transform_2, window_bounds = array<i64: 1, 256>}, {pipeline_mode = #tpu.pipeline_mode<synchronous>, transform_indices = @transform_3, window_bounds = array<i64: 1, 256>}, {pipeline_mode = #tpu.pipeline_mode<synchronous>, transform_indices = @transform_4, window_bounds = array<i64: 1, 256>}, {pipeline_mode = #tpu.pipeline_mode<synchronous>, transform_indices = @transform_5, window_bounds = array<i64: 256, 512>}, {pipeline_mode = #tpu.pipeline_mode<synchronous>, transform_indices = @transform_6, window_bounds = array<i64: 1, 512>}, {pipeline_mode = #tpu.pipeline_mode<synchronous>, transform_indices = @transform_7, window_bounds = array<i64: 512, 8>}, {pipeline_mode = #tpu.pipeline_mode<synchronous>, transform_indices = @transform_8, window_bounds = array<i64: 1, 8>}, {transform_indices = @transform_9, window_bounds = array<i64: 8, 128>}]} {
    %c0 = arith.constant 0 : index
    %c0_0 = arith.constant 0 : index
    %0 = vector.load %arg1[%c0, %c0_0] : memref<128x17xf32, #tpu.memory_space<vmem>>, vector<128x17xf32>
    %1 = vector.extract_strided_slice %0 {offsets = [0, 0], sizes = [128, 16], strides = [1, 1]} : vector<128x17xf32> to vector<128x16xf32>
    %2 = vector.extract_strided_slice %0 {offsets = [0, 16], sizes = [128, 1], strides = [1, 1]} : vector<128x17xf32> to vector<128x1xf32>
    %c0_1 = arith.constant 0 : index
    %c0_2 = arith.constant 0 : index
    %3 = vector.load %arg2[%c0_1, %c0_2] : memref<16x256xf32, #tpu.memory_space<vmem>>, vector<16x256xf32>
    %cst = arith.constant dense<0.000000e+00> : vector<128x256xf32>
    %4 = tpu.matmul %1, %3, %cst {dimension_numbers = #tpu.dot_dimension_numbers<[1], [0], [0], [1], [0, 0, 1, 1], [], []>} : vector<128x16xf32>, vector<16x256xf32>, vector<128x256xf32> -> vector<128x256xf32>
    %c0_3 = arith.constant 0 : index
    %c0_4 = arith.constant 0 : index
    %5 = vector.load %arg3[%c0_3, %c0_4] : memref<1x256xf32, #tpu.memory_space<vmem>>, vector<1x256xf32>
    %6 = vector.broadcast %5 : vector<1x256xf32> to vector<128x256xf32>
    %7 = arith.addf %4, %6 : vector<128x256xf32>
    %cst_5 = arith.constant 0.000000e+00 : f32
    %8 = vector.broadcast %cst_5 : f32 to vector<128x256xf32>
    %9 = arith.maximumf %7, %8 : vector<128x256xf32>
    %c0_6 = arith.constant 0 : index
    %c0_7 = arith.constant 0 : index
    %10 = vector.load %arg4[%c0_6, %c0_7] : memref<1x256xf32, #tpu.memory_space<vmem>>, vector<1x256xf32>
    %11 = vector.broadcast %2 : vector<128x1xf32> to vector<128x256xf32>
    %12 = vector.broadcast %10 : vector<1x256xf32> to vector<128x256xf32>
    %13 = arith.mulf %11, %12 : vector<128x256xf32>
    %c0_8 = arith.constant 0 : index
    %c0_9 = arith.constant 0 : index
    %14 = vector.load %arg5[%c0_8, %c0_9] : memref<1x256xf32, #tpu.memory_space<vmem>>, vector<1x256xf32>
    %15 = vector.broadcast %14 : vector<1x256xf32> to vector<128x256xf32>
    %16 = arith.addf %13, %15 : vector<128x256xf32>
    %cst_10 = arith.constant 0.000000e+00 : f32
    %17 = vector.broadcast %cst_10 : f32 to vector<128x256xf32>
    %18 = arith.maximumf %16, %17 : vector<128x256xf32>
    %19 = arith.mulf %9, %18 : vector<128x256xf32>
    %c0_11 = arith.constant 0 : index
    %c0_12 = arith.constant 0 : index
    %20 = vector.load %arg6[%c0_11, %c0_12] : memref<256x512xf32, #tpu.memory_space<vmem>>, vector<256x512xf32>
    %cst_13 = arith.constant dense<0.000000e+00> : vector<128x512xf32>
    %21 = tpu.matmul %19, %20, %cst_13 {dimension_numbers = #tpu.dot_dimension_numbers<[1], [0], [0], [1], [0, 0, 1, 1], [], []>} : vector<128x256xf32>, vector<256x512xf32>, vector<128x512xf32> -> vector<128x512xf32>
    %c0_14 = arith.constant 0 : index
    %c0_15 = arith.constant 0 : index
    %22 = vector.load %arg7[%c0_14, %c0_15] : memref<1x512xf32, #tpu.memory_space<vmem>>, vector<1x512xf32>
    %23 = vector.broadcast %22 : vector<1x512xf32> to vector<128x512xf32>
    %24 = arith.addf %21, %23 : vector<128x512xf32>
    %cst_16 = arith.constant 0.000000e+00 : f32
    %25 = vector.broadcast %cst_16 : f32 to vector<128x512xf32>
    %26 = arith.maximumf %24, %25 : vector<128x512xf32>
    %c0_17 = arith.constant 0 : index
    %c0_18 = arith.constant 0 : index
    %27 = vector.load %arg8[%c0_17, %c0_18] : memref<512x8xf32, #tpu.memory_space<vmem>>, vector<512x8xf32>
    %cst_19 = arith.constant dense<0.000000e+00> : vector<128x8xf32>
    %28 = tpu.matmul %26, %27, %cst_19 {dimension_numbers = #tpu.dot_dimension_numbers<[1], [0], [0], [1], [0, 0, 1, 1], [], []>} : vector<128x512xf32>, vector<512x8xf32>, vector<128x8xf32> -> vector<128x8xf32>
    %c0_20 = arith.constant 0 : index
    %c0_21 = arith.constant 0 : index
    %29 = vector.load %arg9[%c0_20, %c0_21] : memref<1x8xf32, #tpu.memory_space<vmem>>, vector<1x8xf32>
    %30 = vector.broadcast %29 : vector<1x8xf32> to vector<128x8xf32>
    %31 = arith.addf %28, %30 : vector<128x8xf32>
    %32 = tpu.transpose %31, [1, 0] : vector<128x8xf32> -> vector<8x128xf32>
    %c0_22 = arith.constant 0 : index
    %c0_23 = arith.constant 0 : index
    %33 = vector.load %arg10[%c0_22, %c0_23] : memref<8x128xf32, #tpu.memory_space<vmem>>, vector<8x128xf32>
    tpu.vector_store %arg10[%c0_22, %c0_23], %32 {strides = array<i32>} : memref<8x128xf32, #tpu.memory_space<vmem>>, vector<8x128xf32>,
    return
  }
  func.func @transform_0(%arg0: i32) -> (i32, i32) {
    %c0_i32 = arith.constant 0 : i32
    %c0_i32_0 = arith.constant 0 : i32
    return %arg0, %c0_i32 : i32, i32
  }
  func.func @transform_1(%arg0: i32) -> (i32, i32) {
    %c0_i32 = arith.constant 0 : i32
    %c0_i32_0 = arith.constant 0 : i32
    %c0_i32_1 = arith.constant 0 : i32
    return %c0_i32, %c0_i32_0 : i32, i32
  }
  func.func @transform_2(%arg0: i32) -> (i32, i32) {
    %c0_i32 = arith.constant 0 : i32
    %c0_i32_0 = arith.constant 0 : i32
    %c0_i32_1 = arith.constant 0 : i32
    return %c0_i32, %c0_i32_0 : i32, i32
  }
  func.func @transform_3(%arg0: i32) -> (i32, i32) {
    %c0_i32 = arith.constant 0 : i32
    %c0_i32_0 = arith.constant 0 : i32
    %c0_i32_1 = arith.constant 0 : i32
    return %c0_i32, %c0_i32_0 : i32, i32
  }
  func.func @transform_4(%arg0: i32) -> (i32, i32) {
    %c0_i32 = arith.constant 0 : i32
    %c0_i32_0 = arith.constant 0 : i32
    %c0_i32_1 = arith.constant 0 : i32
    return %c0_i32, %c0_i32_0 : i32, i32
  }
  func.func @transform_5(%arg0: i32) -> (i32, i32) {
    %c0_i32 = arith.constant 0 : i32
    %c0_i32_0 = arith.constant 0 : i32
    %c0_i32_1 = arith.constant 0 : i32
    return %c0_i32, %c0_i32_0 : i32, i32
  }
  func.func @transform_6(%arg0: i32) -> (i32, i32) {
    %c0_i32 = arith.constant 0 : i32
    %c0_i32_0 = arith.constant 0 : i32
    %c0_i32_1 = arith.constant 0 : i32
    return %c0_i32, %c0_i32_0 : i32, i32
  }
  func.func @transform_7(%arg0: i32) -> (i32, i32) {
    %c0_i32 = arith.constant 0 : i32
    %c0_i32_0 = arith.constant 0 : i32
    %c0_i32_1 = arith.constant 0 : i32
    return %c0_i32, %c0_i32_0 : i32, i32
  }
  func.func @transform_8(%arg0: i32) -> (i32, i32) {
    %c0_i32 = arith.constant 0 : i32
    %c0_i32_0 = arith.constant 0 : i32
    %c0_i32_1 = arith.constant 0 : i32
    return %c0_i32, %c0_i32_0 : i32, i32
  }
  func.func @transform_9(%arg0: i32) -> (i32, i32) {
    %c0_i32 = arith.constant 0 : i32
    %c0_i32_0 = arith.constant 0 : i32
    return %c0_i32, %arg0 : i32, i32
  }
}

module attributes {stable_mosaic.version = 11 : i64} {
  func.func @critic_kernel(%arg0: i32, %arg1: memref<128x17xf32, #tpu.memory_space<vmem>>, %arg2: memref<16x256xf32, #tpu.memory_space<vmem>>, %arg3: memref<1x256xf32, #tpu.memory_space<vmem>>, %arg4: memref<1x256xf32, #tpu.memory_space<vmem>>, %arg5: memref<1x256xf32, #tpu.memory_space<vmem>>, %arg6: memref<256x512xf32, #tpu.memory_space<vmem>>, %arg7: memref<1x512xf32, #tpu.memory_space<vmem>>, %arg8: memref<512x8xf32, #tpu.memory_space<vmem>>, %arg9: memref<1x8xf32, #tpu.memory_space<vmem>>, %arg10: memref<8x128xf32, #tpu.memory_space<vmem>>) attributes {dimension_semantics = [#tpu.dimension_semantics<parallel>], iteration_bounds = array<i64: 1>, scalar_prefetch = 0 : i64, scratch_operands = 0 : i64, tpu.core_type = #tpu.core_type<tc>, window_params = [{transform_indices = @transform_0, window_bounds = array<i64: 128, 17>}, {pipeline_mode = #tpu.pipeline_mode<synchronous>, transform_indices = @transform_1, window_bounds = array<i64: 16, 256>}, {pipeline_mode = #tpu.pipeline_mode<synchronous>, transform_indices = @transform_2, window_bounds = array<i64: 1, 256>}, {pipeline_mode = #tpu.pipeline_mode<synchronous>, transform_indices = @transform_3, window_bounds = array<i64: 1, 256>}, {pipeline_mode = #tpu.pipeline_mode<synchronous>, transform_indices = @transform_4, window_bounds = array<i64: 1, 256>}, {pipeline_mode = #tpu.pipeline_mode<synchronous>, transform_indices = @transform_5, window_bounds = array<i64: 256, 512>}, {pipeline_mode = #tpu.pipeline_mode<synchronous>, transform_indices = @transform_6, window_bounds = array<i64: 1, 512>}, {pipeline_mode = #tpu.pipeline_mode<synchronous>, transform_indices = @transform_7, window_bounds = array<i64: 512, 8>}, {pipeline_mode = #tpu.pipeline_mode<synchronous>, transform_indices = @transform_8, window_bounds = array<i64: 1, 8>}, {transform_indices = @transform_9, window_bounds = array<i64: 8, 128>}]} {
    %c0 = arith.constant 0 : index
    %c0_0 = arith.constant 0 : index
    %0 = vector.load %arg1[%c0, %c0_0] : memref<128x17xf32, #tpu.memory_space<vmem>>, vector<128x17xf32>
    %1 = vector.extract_strided_slice %0 {offsets = [0, 0], sizes = [128, 16], strides = [1, 1]} : vector<128x17xf32> to vector<128x16xf32>
    %2 = vector.extract_strided_slice %0 {offsets = [0, 16], sizes = [128, 1], strides = [1, 1]} : vector<128x17xf32> to vector<128x1xf32>
    %c0_1 = arith.constant 0 : index
    %c0_2 = arith.constant 0 : index
    %3 = vector.load %arg2[%c0_1, %c0_2] : memref<16x256xf32, #tpu.memory_space<vmem>>, vector<16x256xf32>
    %cst = arith.constant dense<0.000000e+00> : vector<128x256xf32>
    %4 = tpu.matmul %1, %3, %cst {dimension_numbers = #tpu.dot_dimension_numbers<[1], [0], [0], [1], [0, 0, 1, 1], [], []>} : vector<128x16xf32>, vector<16x256xf32>, vector<128x256xf32> -> vector<128x256xf32>
    %c0_3 = arith.constant 0 : index
    %c0_4 = arith.constant 0 : index
    %5 = vector.load %arg3[%c0_3, %c0_4] : memref<1x256xf32, #tpu.memory_space<vmem>>, vector<1x256xf32>
    %6 = vector.broadcast %5 : vector<1x256xf32> to vector<128x256xf32>
    %7 = arith.addf %4, %6 : vector<128x256xf32>
    %cst_5 = arith.constant 0.000000e+00 : f32
    %8 = vector.broadcast %cst_5 : f32 to vector<128x256xf32>
    %9 = arith.maximumf %7, %8 : vector<128x256xf32>
    %c0_6 = arith.constant 0 : index
    %c0_7 = arith.constant 0 : index
    %10 = vector.load %arg4[%c0_6, %c0_7] : memref<1x256xf32, #tpu.memory_space<vmem>>, vector<1x256xf32>
    %11 = vector.broadcast %2 : vector<128x1xf32> to vector<128x256xf32>
    %12 = vector.broadcast %10 : vector<1x256xf32> to vector<128x256xf32>
    %13 = arith.mulf %11, %12 : vector<128x256xf32>
    %c0_8 = arith.constant 0 : index
    %c0_9 = arith.constant 0 : index
    %14 = vector.load %arg5[%c0_8, %c0_9] : memref<1x256xf32, #tpu.memory_space<vmem>>, vector<1x256xf32>
    %15 = vector.broadcast %14 : vector<1x256xf32> to vector<128x256xf32>
    %16 = arith.addf %13, %15 : vector<128x256xf32>
    %cst_10 = arith.constant 0.000000e+00 : f32
    %17 = vector.broadcast %cst_10 : f32 to vector<128x256xf32>
    %18 = arith.maximumf %16, %17 : vector<128x256xf32>
    %19 = arith.mulf %9, %18 : vector<128x256xf32>
    %c0_11 = arith.constant 0 : index
    %c0_12 = arith.constant 0 : index
    %20 = vector.load %arg6[%c0_11, %c0_12] : memref<256x512xf32, #tpu.memory_space<vmem>>, vector<256x512xf32>
    %cst_13 = arith.constant dense<0.000000e+00> : vector<128x512xf32>
    %21 = tpu.matmul %19, %20, %cst_13 {dimension_numbers = #tpu.dot_dimension_numbers<[1], [0], [0], [1], [0, 0, 1, 1], [], []>} : vector<128x256xf32>, vector<256x512xf32>, vector<128x512xf32> -> vector<128x512xf32>
    %c0_14 = arith.constant 0 : index
    %c0_15 = arith.constant 0 : index
    %22 = vector.load %arg7[%c0_14, %c0_15] : memref<1x512xf32, #tpu.memory_space<vmem>>, vector<1x512xf32>
    %23 = vector.broadcast %22 : vector<1x512xf32> to vector<128x512xf32>
    %24 = arith.addf %21, %23 : vector<128x512xf32>
    %cst_16 = arith.constant 0.000000e+00 : f32
    %25 = vector.broadcast %cst_16 : f32 to vector<128x512xf32>
    %26 = arith.maximumf %24, %25 : vector<128x512xf32>
    %c0_17 = arith.constant 0 : index
    %c0_18 = arith.constant 0 : index
    %27 = vector.load %arg8[%c0_17, %c0_18] : memref<512x8xf32, #tpu.memory_space<vmem>>, vector<512x8xf32>
    %cst_19 = arith.constant dense<0.000000e+00> : vector<128x8xf32>
    %28 = tpu.matmul %26, %27, %cst_19 {dimension_numbers = #tpu.dot_dimension_numbers<[1], [0], [0], [1], [0, 0, 1, 1], [], []>} : vector<128x512xf32>, vector<512x8xf32>, vector<128x8xf32> -> vector<128x8xf32>
    %c0_20 = arith.constant 0 : index
    %c0_21 = arith.constant 0 : index
    %29 = vector.load %arg9[%c0_20, %c0_21] : memref<1x8xf32, #tpu.memory_space<vmem>>, vector<1x8xf32>
    %30 = vector.broadcast %29 : vector<1x8xf32> to vector<128x8xf32>
    %31 = arith.addf %28, %30 : vector<128x8xf32>
    %32 = tpu.transpose %31, [1, 0] : vector<128x8xf32> -> vector<8x128xf32>
    %c0_22 = arith.constant 0 : index
    %c0_23 = arith.constant 0 : index
    %33 = vector.load %arg10[%c0_22, %c0_23] : memref<8x128xf32, #tpu.memory_space<vmem>>, vector<8x128xf32>
    tpu.vector_store %arg10[%c0_22, %c0_23], %32 {strides = array<i32>} : memref<8x128xf32, #tpu.memory_space<vmem>>, vector<8x128xf32>,
    return
  }
  func.func @transform_0(%arg0: i32) -> (i32, i32) {
    %c0_i32 = arith.constant 0 : i32
    %c0_i32_0 = arith.constant 0 : i32
    return %arg0, %c0_i32 : i32, i32
  }
  func.func @transform_1(%arg0: i32) -> (i32, i32) {
    %c0_i32 = arith.constant 0 : i32
    %c0_i32_0 = arith.constant 0 : i32
    %c0_i32_1 = arith.constant 0 : i32
    return %c0_i32, %c0_i32_0 : i32, i32
  }
  func.func @transform_2(%arg0: i32) -> (i32, i32) {
    %c0_i32 = arith.constant 0 : i32
    %c0_i32_0 = arith.constant 0 : i32
    %c0_i32_1 = arith.constant 0 : i32
    return %c0_i32, %c0_i32_0 : i32, i32
  }
  func.func @transform_3(%arg0: i32) -> (i32, i32) {
    %c0_i32 = arith.constant 0 : i32
    %c0_i32_0 = arith.constant 0 : i32
    %c0_i32_1 = arith.constant 0 : i32
    return %c0_i32, %c0_i32_0 : i32, i32
  }
  func.func @transform_4(%arg0: i32) -> (i32, i32) {
    %c0_i32 = arith.constant 0 : i32
    %c0_i32_0 = arith.constant 0 : i32
    %c0_i32_1 = arith.constant 0 : i32
    return %c0_i32, %c0_i32_0 : i32, i32
  }
  func.func @transform_5(%arg0: i32) -> (i32, i32) {
    %c0_i32 = arith.constant 0 : i32
    %c0_i32_0 = arith.constant 0 : i32
    %c0_i32_1 = arith.constant 0 : i32
    return %c0_i32, %c0_i32_0 : i32, i32
  }
  func.func @transform_6(%arg0: i32) -> (i32, i32) {
    %c0_i32 = arith.constant 0 : i32
    %c0_i32_0 = arith.constant 0 : i32
    %c0_i32_1 = arith.constant 0 : i32
    return %c0_i32, %c0_i32_0 : i32, i32
  }
  func.func @transform_7(%arg0: i32) -> (i32, i32) {
    %c0_i32 = arith.constant 0 : i32
    %c0_i32_0 = arith.constant 0 : i32
    %c0_i32_1 = arith.constant 0 : i32
    return %c0_i32, %c0_i32_0 : i32, i32
  }
  func.func @transform_8(%arg0: i32) -> (i32, i32) {
    %c0_i32 = arith.constant 0 : i32
    %c0_i32_0 = arith.constant 0 : i32
    %c0_i32_1 = arith.constant 0 : i32
    return %c0_i32, %c0_i32_0 : i32, i32
  }
  func.func @transform_9(%arg0: i32) -> (i32, i32) {
    %c0_i32 = arith.constant 0 : i32
    %c0_i32_0 = arith.constant 0 : i32
    return %c0_i32, %arg0 : i32, i32
  }
}

</mosaic_0001>

<bundles_post_ra>
// kernel: tpu_custom_call.1
= control target key start
LH: loop header
LB: loop body
LE: loop exit
PB: predicated region body
PF: predicated region fallthrough
CT: control target
= control target key end

     0   :  { %14 = vsyncpa [#allocation3], 0  ;;  %s2748_s0 = inlined_call_operand.vmem [shape: f32[128,17], index: 0, kind: input, shape index: {}]   ;;  %s2749_s1 = inlined_call_operand.vmem [shape: f32[16,256], index: 1, kind: input, shape index: {}]   ;;  %s2750_s2 = inlined_call_operand.vmem [shape: f32[1,256], index: 2, kind: input, shape index: {}]   ;;  %s2751_s3 = inlined_call_operand.vmem [shape: f32[1,256], index: 3, kind: input, shape index: {}]   ;;  %s2752_s4 = inlined_call_operand.vmem [shape: f32[1,256], index: 4, kind: input, shape index: {}]   ;;  %s2753_s5 = inlined_call_operand.hbm [shape: f32[256,512], index: 5, kind: input, shape index: {}]   ;;  %s2754_s6 = inlined_call_operand.vmem [shape: f32[1,512], index: 6, kind: input, shape index: {}]   ;;  %s2755_s7 = inlined_call_operand.vmem [shape: f32[512,8], index: 7, kind: input, shape index: {}]   ;;  %s2756_s8 = inlined_call_operand.vmem [shape: f32[1,8], index: 8, kind: input, shape index: {}]   ;;  %s2757_s9 = inlined_call_operand.hbm [shape: f32[8,128], index: 9, kind: output, shape index: {}]  }
   0x1   :  { %15 = vsyncpa [#allocation4], 0  ;;  %s30_s11 = sshll.u32 %s2753_s5, 4  ;;  %s1703_s12 = smov [#allocation2]   ;;  %s31_s11 = int_to_ptr.hbm [resolvable:$true] %s30_s11 }
   0x2   :  { %s32_s13 = sshll.u32 %s1703_s12, 4  ;;  %s1704_s14 = smov 512   ;;  %s33_s13 = int_to_ptr.vmem [resolvable:$true] %s32_s13 }
   0x3   :  { %s1705_s15 = smov 32  }
   0x4   :  { %38 = dma.hbm_to_vmem [thread:$0]  %s31_s11, 16384, %s33_s13, [#allocation3], %s1704_s14, %s1704_s14, %s1705_s15  }
   0x5   :  { %1699 = dma.done.wait [#allocation3], 16384  }
   0x6   :  { %1700 = vsyncadd [#allocation3], 4294950912  ;;  %v1706_v0 = vmov 16   ;;  %v67_v1 = vld [vmem:[%s2749_s1 + $0x10] sm:$0xff]  ;;  %v68_v2 = vld [vmem:[%s2749_s1 + $0x18] sm:$0xff]  ;;  %vm75_vm0 = vcmask 130048  }
   0x7   :  { %1648 = vset.pattern.permute.xlu1 %v1706_v0  ;;  %1647 = vset.pattern.permute.xlu0 %v1706_v0  ;;  %v51_v3 = vld [vmem:[%s2748_s0 + $0x10] sm:$0xff]  ;;  %v49_v4 = vld [vmem:[%s2748_s0] sm:$0xff]  ;;  %v66_v6 = vld [vmem:[%s2749_s1 + $0x8] sm:$0xff]  ;;  %s1580_s11 = sshll.u32 %s2757_s9, 4  ;;  %s1581_s11 = int_to_ptr.hbm [resolvable:$true] %s1580_s11 }
   0x8   :  { %1649 = vset.pattern.permute.xlu2 %v1706_v0  ;;  %138 = vmatpush.msra.mxu0 %v67_v1  ;;  %v65_v5 = vld [vmem:[%s2749_s1] sm:$0xff]  ;;  %v58_v7 = vld [vmem:[%s2748_s0 + $0x48] sm:$0xff]  ;;  %v52_v10 = vld [vmem:[%s2748_s0 + $0x18] sm:$0xff] }
   0x9   :  { %1622 = vmatpush.msra.mxu2 %v67_v1  ;;  %203 = vmatpush.msra.mxu1 %v68_v2  ;;  %v1785_v8 = vld [vmem:[%s2748_s0 + $0x40] sm:$0xff]  ;;  %v50_v11 = vld [vmem:[%s2748_s0 + $0x8] sm:$0xff]  ;;  %v59_v12 = vld [vmem:[%s2748_s0 + $0x50] sm:$0xff] }
   0xa   :  { %1624 = vmatpush.msra.mxu3 %v68_v2  ;;  %296 = vperm.xlu1 %1648, %v51_v3   ;;  %v53_v9 = vld [vmem:[%s2748_s0 + $0x20] sm:$0xff]  ;;  %v54_v13 = vld [vmem:[%s2748_s0 + $0x28] sm:$0xff]  ;;  %v1814_v14 = vld [vmem:[%s2748_s0 + $0x38] sm:$0xff] }
   0xb   :  { %288 = vperm.xlu0 %1647, %v49_v4   ;;  %139 = vmatpush.msra.mxu0 %v65_v5  ;;  %v1819_v15 = vld [vmem:[%s2748_s0 + $0x30] sm:$0xff]  ;;  %v60_v16 = vld [vmem:[%s2748_s0 + $0x58] sm:$0xff]  ;;  %v61_v17 = vld [vmem:[%s2748_s0 + $0x60] sm:$0xff] }
   0xc   :  { %1623 = vmatpush.msra.mxu2 %v65_v5  ;;  %204 = vmatpush.msra.mxu1 %v66_v6  ;;  %v62_v18 = vld [vmem:[%s2748_s0 + $0x68] sm:$0xff]  ;;  %v614_v19 = vld [vmem:[#allocation2 + $0x3e0] sm:$0xff]  ;;  %v63_v21 = vld [vmem:[%s2748_s0 + $0x70] sm:$0xff] }
   0xd   :  { %1625 = vmatpush.msra.mxu3 %v66_v6  ;;  %1590 = vmatmul.msk.f32.vlgmr.msra.gmra.mxu0 %vm75_vm0, %v49_v4  ;;  %v551_v20 = vld [vmem:[#allocation2 + $0x1e8] sm:$0xff]  ;;  %v610_v22 = vld [vmem:[#allocation2 + $0x3c0] sm:$0xff]  ;;  %v1851_v24 = vld [vmem:[%s2748_s0 + $0x78] sm:$0xff] }
   0xe   :  { %1599 = vmatmul.msk.f32.vlgmr.msra.gmra.mxu2 %vm75_vm0, %v58_v7  ;;  %1606 = vmatmul.msk.f32.vlgmr.msra.gmra.mxu1 %vm75_vm0, %v49_v4  ;;  %v550_v23 = vld [vmem:[#allocation2 + $0x1e0] sm:$0xff]  ;;  %v547_v25 = vld [vmem:[#allocation2 + $0x1c8] sm:$0xff] }
   0xf   :  { %1614 = vmatmul.msk.f32.vlgmr.msra.gmra.mxu3 %vm75_vm0, %v1785_v8  ;;  %304 = vperm.xlu2 %1649, %v53_v9   ;;  %v606_v26 = vld [vmem:[#allocation2 + $0x3a0] sm:$0xff]  ;;  %v615_v28 = vld [vmem:[#allocation2 + $0x3e8] sm:$0xff] }
  0x10   :  { %693 = vmatpush.msrb.mxu3 %v614_v19  ;;  %758 = vmatpush.msrb.mxu0 %v551_v20  ;;  %v546_v27 = vld [vmem:[#allocation2 + $0x1c0] sm:$0xff]  ;;  %v543_v29 = vld [vmem:[#allocation2 + $0x1a8] sm:$0xff] }
  0x11   :  { %628 = vmatpush.msrb.mxu2 %v550_v23  ;;  %823 = vmatpush.msrb.mxu1 %v615_v28  ;;  %v611_v30 = vld [vmem:[#allocation2 + $0x3c8] sm:$0xff]  ;;  %v602_v31 = vld [vmem:[#allocation2 + $0x380] sm:$0xff]  ;;  %v552_v23 = vld [vmem:[#allocation2 + $0x1f0] sm:$0xff] }
  0x12   :  { %300 = vperm.xlu1 %1648, %v52_v10   ;;  %694 = vmatpush.msrb.mxu3 %v610_v22  ;;  %v542_v32 = vld [vmem:[#allocation2 + $0x1a0] sm:$0xff]  ;;  %v539_v33 = vld [vmem:[#allocation2 + $0x188] sm:$0xff] }
  0x13   :  { %292 = vperm.xlu0 %1647, %v50_v11   ;;  %759 = vmatpush.msrb.mxu0 %v547_v25  ;;  %v607_v34 = vld [vmem:[#allocation2 + $0x3a8] sm:$0xff]  ;;  %v598_v35 = vld [vmem:[#allocation2 + $0x360] sm:$0xff] }
  0x14   :  { %695 = vmatpush.msrb.mxu3 %v606_v26  ;;  %629 = vmatpush.msrb.mxu2 %v546_v27  ;;  %v538_v36 = vld [vmem:[#allocation2 + $0x180] sm:$0xff]  ;;  %v535_v37 = vld [vmem:[#allocation2 + $0x168] sm:$0xff] }
  0x15   :  { %1591 = vmatmul.msk.f32.gmra.mxu0 %vm75_vm0, %v50_v11  ;;  %824 = vmatpush.msrb.mxu1 %v611_v30  ;;  %v603_v38 = vld [vmem:[#allocation2 + $0x388] sm:$0xff]  ;;  %v534_v39 = vld [vmem:[#allocation2 + $0x160] sm:$0xff] }
  0x16   :  { %1600 = vmatmul.msk.f32.gmra.mxu2 %vm75_vm0, %v59_v12  ;;  %1607 = vmatmul.msk.f32.gmra.mxu1 %vm75_vm0, %v50_v11  ;;  %v594_v40 = vld [vmem:[#allocation2 + $0x340] sm:$0xff]  ;;  %v531_v41 = vld [vmem:[#allocation2 + $0x148] sm:$0xff] }
  0x17   :  { %1615 = vmatmul.msk.f32.gmra.mxu3 %vm75_vm0, %v58_v7  ;;  %308 = vperm.xlu2 %1649, %v54_v13   ;;  %v599_v42 = vld [vmem:[#allocation2 + $0x368] sm:$0xff]  ;;  %v530_v43 = vld [vmem:[#allocation2 + $0x140] sm:$0xff] }
  0x18   :  { %760 = vmatpush.msrb.mxu0 %v543_v29  ;;  %696 = vmatpush.msrb.mxu3 %v602_v31  ;;  %v590_v44 = vld [vmem:[#allocation2 + $0x320] sm:$0xff]  ;;  %v527_v45 = vld [vmem:[#allocation2 + $0x128] sm:$0xff] }
  0x19   :  { %630 = vmatpush.msrb.mxu2 %v542_v32  ;;  %825 = vmatpush.msrb.mxu1 %v607_v34  ;;  %v595_v46 = vld [vmem:[#allocation2 + $0x348] sm:$0xff]  ;;  %v526_v47 = vld [vmem:[#allocation2 + $0x120] sm:$0xff] }
  0x1a   :  { %316 = vperm.xlu1 %1648, %v1814_v14   ;;  %761 = vmatpush.msrb.mxu0 %v539_v33  ;;  %v586_v48 = vld [vmem:[#allocation2 + $0x300] sm:$0xff]  ;;  %v523_v49 = vld [vmem:[#allocation2 + $0x108] sm:$0xff] }
  0x1b   :  { %312 = vperm.xlu0 %1647, %v1819_v15   ;;  %697 = vmatpush.msrb.mxu3 %v598_v35  ;;  %v591_v50 = vld [vmem:[#allocation2 + $0x328] sm:$0xff]  ;;  %v522_v51 = vld [vmem:[#allocation2 + $0x100] sm:$0xff] }
  0x1c   :  { %631 = vmatpush.msrb.mxu2 %v538_v36  ;;  %762 = vmatpush.msrb.mxu0 %v535_v37  ;;  %v582_v52 = vld [vmem:[#allocation2 + $0x2e0] sm:$0xff]  ;;  %v519_v53 = vld [vmem:[#allocation2 + $0xe8] sm:$0xff]  ;;  %v548_v36 = vld [vmem:[#allocation2 + $0x1d0] sm:$0xff] }
  0x1d   :  { %1592 = vmatmul.msk.f32.gmra.mxu0 %vm75_vm0, %v51_v3  ;;  %826 = vmatpush.msrb.mxu1 %v603_v38  ;;  %v518_v54 = vld [vmem:[#allocation2 + $0xe0] sm:$0xff]  ;;  %v587_v59 = vld [vmem:[#allocation2 + $0x308] sm:$0xff] }
  0x1e   :  { %1601 = vmatmul.msk.f32.gmra.mxu2 %vm75_vm0, %v60_v16  ;;  %1608 = vmatmul.msk.f32.gmra.mxu1 %vm75_vm0, %v51_v3  ;;  %v578_v55 = vld [vmem:[#allocation2 + $0x2c0] sm:$0xff]  ;;  %v515_v62 = vld [vmem:[#allocation2 + $0xc8] sm:$0xff] }
  0x1f   :  { %1616 = vmatmul.msk.f32.gmra.mxu3 %vm75_vm0, %v59_v12  ;;  %320 = vperm.xlu2 %1649, %v1785_v8   ;;  %v514_v56 = vld [vmem:[#allocation2 + $0xc0] sm:$0xff]  ;;  %v583_v63 = vld [vmem:[#allocation2 + $0x2e8] sm:$0xff] }
  0x20   :  { %632 = vmatpush.msrb.mxu2 %v534_v39  ;;  %698 = vmatpush.msrb.mxu3 %v594_v40  ;;  %v574_v57 = vld [vmem:[#allocation2 + $0x2a0] sm:$0xff]  ;;  %v511_v2 = vld [vmem:[#allocation2 + $0xa8] sm:$0xff]  ;;  %v612_v39 = vld [vmem:[#allocation2 + $0x3d0] sm:$0xff] }
  0x21   :  { %763 = vmatpush.msrb.mxu0 %v531_v41  ;;  %827 = vmatpush.msrb.mxu1 %v599_v42  ;;  %v510_v58 = vld [vmem:[#allocation2 + $0xa0] sm:$0xff]  ;;  %v579_v3 = vld [vmem:[#allocation2 + $0x2c8] sm:$0xff]  ;;  %v553_v41 = vld [vmem:[#allocation2 + $0x1f8] sm:$0xff] }
  0x22   :  { %328 = vperm.xlu1 %1648, %v59_v12   ;;  %633 = vmatpush.msrb.mxu2 %v530_v43  ;;  %v570_v60 = vld [vmem:[#allocation2 + $0x280] sm:$0xff]  ;;  %v575_v4 = vld [vmem:[#allocation2 + $0x2a8] sm:$0xff] }
  0x23   :  { %324 = vperm.xlu0 %1647, %v58_v7   ;;  %699 = vmatpush.msrb.mxu3 %v590_v44  ;;  %v506_v61 = vld [vmem:[#allocation2 + $0x80] sm:$0xff]  ;;  %v507_v5 = vld [vmem:[#allocation2 + $0x88] sm:$0xff] }
  0x24   :  { %764 = vmatpush.msrb.mxu0 %v527_v45  ;;  %828 = vmatpush.msrb.mxu1 %v595_v46  ;;  %v502_v0 = vld [vmem:[#allocation2 + $0x60] sm:$0xff]  ;;  %v571_v6 = vld [vmem:[#allocation2 + $0x288] sm:$0xff] }
  0x25   :  { %1593 = vmatmul.msk.f32.gmra.mxu0 %vm75_vm0, %v52_v10  ;;  %634 = vmatpush.msrb.mxu2 %v526_v47  ;;  %v566_v1 = vld [vmem:[#allocation2 + $0x260] sm:$0xff]  ;;  %v567_v11 = vld [vmem:[#allocation2 + $0x268] sm:$0xff] }
  0x26   :  { %1602 = vmatmul.msk.f32.gmra.mxu2 %vm75_vm0, %v61_v17  ;;  %1609 = vmatmul.msk.f32.gmra.mxu1 %vm75_vm0, %v52_v10  ;;  %v498_v7 = vld [vmem:[#allocation2 + $0x40] sm:$0xff]  ;;  %v503_v10 = vld [vmem:[#allocation2 + $0x68] sm:$0xff] }
  0x27   :  { %1617 = vmatmul.msk.f32.gmra.mxu3 %vm75_vm0, %v60_v16  ;;  %332 = vperm.xlu2 %1649, %v60_v16   ;;  %v499_v12 = vld [vmem:[#allocation2 + $0x48] sm:$0xff]  ;;  %v554_v19 = vld [vmem:[#allocation2 + $0x200] sm:$0xff] }
  0x28   :  { %700 = vmatpush.msrb.mxu3 %v586_v48  ;;  %765 = vmatpush.msrb.mxu0 %v523_v49  ;;  %v495_v16 = vld [vmem:[#allocation2 + $0x28] sm:$0xff]  ;;  %v286_v25 = vld [vmem:[%s2751_s3] sm:$0x3]  ;;  %v544_v49 = vld [vmem:[#allocation2 + $0x1b0] sm:$0xff] }
  0x29   :  { %829 = vmatpush.msrb.mxu1 %v591_v50  ;;  %635 = vmatpush.msrb.mxu2 %v522_v51  ;;  %v491_v20 = vld [vmem:[#allocation2 + $0x8] sm:$0xff]  ;;  %v388_v27 = vld [vmem:[%s2752_s4] sm:$0x3]  ;;  %v1883_v28 = vperm.slane %v286_v25, 0  ;;  %v1885_v29 = vperm.slane %v286_v25, 1  ;;  %v617_v50 = vld [vmem:[#allocation2 + $0x3f8] sm:$0xff] }
  0x2a   :  { %340 = vperm.xlu1 %1648, %v62_v18   ;;  %701 = vmatpush.msrb.mxu3 %v582_v52  ;;  %v1887_v32 = vperm.slane %v388_v27, 0  ;;  %v1889_v33 = vperm.slane %v388_v27, 1  ;;  %v69_v46 = vld [vmem:[%s2750_s2] sm:$0x3] }
  0x2b   :  { %336 = vperm.xlu0 %1647, %v61_v17   ;;  %766 = vmatpush.msrb.mxu0 %v519_v53  ;;  %v1910_v53 = vperm.slane %v69_v46, 0 }
  0x2c   :  { %636 = vmatpush.msrb.mxu2 %v518_v54  ;;  %702 = vmatpush.msrb.mxu3 %v578_v55  ;;  %v1912_v54 = vperm.slane %v69_v46, 1 }
  0x2d   :  { %1594 = vmatmul.msk.f32.gmra.mxu0 %vm75_vm0, %v53_v9  ;;  %830 = vmatpush.msrb.mxu1 %v587_v59 }
  0x2e   :  { %1603 = vmatmul.msk.f32.gmra.mxu2 %vm75_vm0, %v62_v18  ;;  %1610 = vmatmul.msk.f32.gmra.mxu1 %vm75_vm0, %v53_v9 }
  0x2f   :  { %1618 = vmatmul.msk.f32.gmra.mxu3 %vm75_vm0, %v61_v17  ;;  %344 = vperm.xlu2 %1649, %v63_v21   ;;  %v559_v17 = vld [vmem:[#allocation2 + $0x228] sm:$0xff] }
  0x30   :  { %637 = vmatpush.msrb.mxu2 %v514_v56  ;;  %703 = vmatpush.msrb.mxu3 %v574_v57  ;;  %v608_v57 = vld [vmem:[#allocation2 + $0x3b0] sm:$0xff] }
  0x31   :  { %767 = vmatpush.msrb.mxu0 %v515_v62  ;;  %831 = vmatpush.msrb.mxu1 %v583_v63 }
  0x32   :  { %638 = vmatpush.msrb.mxu2 %v510_v58  ;;  %704 = vmatpush.msrb.mxu3 %v570_v60  ;;  %v549_v58 = vld [vmem:[#allocation2 + $0x1d8] sm:$0xff] }
  0x33   :  { %348 = vperm.xlu0 %1647, %v1851_v24   ;;  %768 = vmatpush.msrb.mxu0 %v511_v2 }
  0x34   :  { %639 = vmatpush.msrb.mxu2 %v506_v61  ;;  %705 = vmatpush.msrb.mxu3 %v566_v1 }
  0x35   :  { %1595 = vmatmul.msk.f32.gmra.mxu0 %vm75_vm0, %v54_v13  ;;  %832 = vmatpush.msrb.mxu1 %v579_v3 }
  0x36   :  { %1604 = vmatmul.msk.f32.gmra.mxu2 %vm75_vm0, %v63_v21  ;;  %1611 = vmatmul.msk.f32.gmra.mxu1 %vm75_vm0, %v54_v13  ;;  %v563_v13 = vld [vmem:[#allocation2 + $0x248] sm:$0xff] }
  0x37   :  { %1619 = vmatmul.msk.f32.gmra.mxu3 %vm75_vm0, %v62_v18  ;;  %640 = vmatpush.msrb.mxu2 %v502_v0  ;;  %v490_v18 = vld [vmem:[#allocation2] sm:$0xff] }
  0x38   :  { %833 = vmatpush.msrb.mxu1 %v575_v4  ;;  %769 = vmatpush.msrb.mxu0 %v507_v5 }
  0x39   :  { %641 = vmatpush.msrb.mxu2 %v498_v7 }
  0x3a   :  { %834 = vmatpush.msrb.mxu1 %v571_v6  ;;  %770 = vmatpush.msrb.mxu0 %v503_v10 }
  0x3c   :  { %835 = vmatpush.msrb.mxu1 %v567_v11  ;;  %771 = vmatpush.msrb.mxu0 %v499_v12 }
  0x3d   :  { %1596 = vmatmul.msk.f32.gmra.mxu0 %vm75_vm0, %v1819_v15 }
  0x3e   :  { %1605 = vmatmul.msk.f32.gmra.mxu2 %vm75_vm0, %v1851_v24  ;;  %1612 = vmatmul.msk.f32.gmra.mxu1 %vm75_vm0, %v1819_v15  ;;  %v558_v15 = vld [vmem:[#allocation2 + $0x220] sm:$0xff] }
  0x3f   :  { %1620 = vmatmul.msk.f32.gmra.mxu3 %vm75_vm0, %v63_v21  ;;  %836 = vmatpush.msrb.mxu1 %v563_v13  ;;  %v555_v21 = vld [vmem:[#allocation2 + $0x208] sm:$0xff]  ;;  %v540_v13 = vld [vmem:[#allocation2 + $0x190] sm:$0xff] }
  0x40   :  { %772 = vmatpush.msrb.mxu0 %v495_v16 }
  0x41   :  { %837 = vmatpush.msrb.mxu1 %v559_v17 }
  0x42   :  { %773 = vmatpush.msrb.mxu0 %v491_v20 }
  0x43   :  { %838 = vmatpush.msrb.mxu1 %v555_v21 }
  0x44   :  { %1018 = vmatpush.msra.mxu0 %v553_v41 }
  0x45   :  { %1597 = vmatmul.msk.f32.gmra.mxu0 %vm75_vm0, %v1814_v14  ;;  %1083 = vmatpush.msra.mxu1 %v617_v50 }
  0x46   :  { %1613 = vmatmul.msk.f32.gmra.mxu1 %vm75_vm0, %v1814_v14  ;;  %v494_v14 = vld [vmem:[#allocation2 + $0x20] sm:$0xff]  ;;  %1019 = vmatpush.msra.mxu0 %v549_v58  ;;  %v536_v58 = vld [vmem:[#allocation2 + $0x170] sm:$0xff] }
  0x47   :  { %1621 = vmatmul.msk.f32.gmra.mxu3 %vm75_vm0, %v1851_v24  ;;  %642 = vmatpush.msrb.mxu2 %v494_v14  ;;  %v616_v24 = vld [vmem:[#allocation2 + $0x3f0] sm:$0xff]  ;;  %v613_v14 = vld [vmem:[#allocation2 + $0x3d8] sm:$0xff] }
  0x48   :  { %1084 = vmatpush.msra.mxu1 %v613_v14 }
  0x49   :  { %643 = vmatpush.msrb.mxu2 %v490_v18 }
  0x4b   :  { %888 = vmatpush.msra.mxu2 %v552_v23  ;;  %v604_v23 = vld [vmem:[#allocation2 + $0x390] sm:$0xff] }
  0x4d   :  { %1598 = vmatmul.msk.f32.gmra.mxu0 %vm75_vm0, %v1785_v8  ;;  %v562_v8 = vld [vmem:[#allocation2 + $0x240] sm:$0xff]  ;;  %889 = vmatpush.msra.mxu2 %v548_v36 }
  0x4e   :  { %706 = vmatpush.msrb.mxu3 %v562_v8 }
  0x4f   :  { %890 = vmatpush.msra.mxu2 %v544_v49 }
  0x50   :  { %707 = vmatpush.msrb.mxu3 %v558_v15 }
  0x51   :  { %891 = vmatpush.msra.mxu2 %v540_v13 }
  0x52   :  { %708 = vmatpush.msrb.mxu3 %v554_v19 }
  0x53   :  { %892 = vmatpush.msra.mxu2 %v536_v58 }
  0x54   :  { %953 = vmatpush.msra.mxu3 %v616_v24  ;;  %v545_v24 = vld [vmem:[#allocation2 + $0x1b8] sm:$0xff] }
  0x55   :  { %1020 = vmatpush.msra.mxu0 %v545_v24 }
  0x56   :  { %954 = vmatpush.msra.mxu3 %v612_v39 }
  0x58   :  { %955 = vmatpush.msra.mxu3 %v608_v57 }
  0x5a   :  { %956 = vmatpush.msra.mxu3 %v604_v23 }
  0x69   :  { %v1873_v9 = vpop.permute.xlu2 %304 }
  0x71   :  { %v1875_v22 = vpop.permute.xlu2 %308 }
  0x79   :  { %v321_v26 = vpop.permute.xlu2 %320 }
  0x7a   :  { %v372_v34 = vmul.f32 %v1883_v28, %v321_v26  ;;  %v373_v35 = vmul.f32 %v1885_v29, %v321_v26 }
  0x7c   :  { %v297_v30 = vpop.permute.xlu1 %296  ;;  %v1894_v37 = vadd.f32 %v1887_v32, %v372_v34  ;;  %v1897_v38 = vadd.f32 %v1889_v33, %v373_v35 }
  0x7d   :  { %v289_v31 = vpop.permute.xlu0 %288  ;;  %v360_v15 = vmul.f32 %v1883_v28, %v297_v30  ;;  %v361_v16 = vmul.f32 %v1885_v29, %v297_v30 }
  0x7e   :  { %v356_v42 = vmul.f32 %v1883_v28, %v289_v31  ;;  %v357_v43 = vmul.f32 %v1885_v29, %v289_v31  ;;  %v443_v31 = vmax.f32 %v1897_v38, 0.0 }
  0x7f   :  { %v1952_v34 = vadd.f32 %v1887_v32, %v360_v15  ;;  %v1955_v35 = vadd.f32 %v1889_v33, %v361_v16 }
  0x80   :  { %v394_v51 = vadd.f32 %v1887_v32, %v356_v42  ;;  %v395_v52 = vadd.f32 %v1889_v33, %v357_v43 }
  0x81   :  { %v333_v40 = vpop.permute.xlu2 %332  ;;  %v430_v14 = vmax.f32 %v1952_v34, 0.0  ;;  %v431_v15 = vmax.f32 %v1955_v35, 0.0 }
  0x82   :  { %v378_v47 = vmul.f32 %v1883_v28, %v333_v40  ;;  %v379_v48 = vmul.f32 %v1885_v29, %v333_v40  ;;  %v426_v63 = vmax.f32 %v394_v51, 0.0  ;;  %v427_v0 = vmax.f32 %v395_v52, 0.0 }
  0x84   :  { %v1901_v44 = vpop.permute.xlu1 %300  ;;  %v1915_v55 = vadd.f32 %v1887_v32, %v378_v47  ;;  %v1918_v56 = vadd.f32 %v1889_v33, %v379_v48 }
  0x85   :  { %v293_v45 = vpop.permute.xlu0 %292 }
  0x86   :  { %v358_v1 = vmul.f32 %v1883_v28, %v293_v45  ;;  %v359_v4 = vmul.f32 %v1885_v29, %v293_v45 }
  0x88   :  { %v396_v18 = vadd.f32 %v1887_v32, %v358_v1  ;;  %v397_v19 = vadd.f32 %v1889_v33, %v359_v4  ;;  %v541_v4 = vld [vmem:[#allocation2 + $0x198] sm:$0xff] }
  0x89   :  { %v345_v59 = vpop.permute.xlu2 %344  ;;  %1021 = vmatpush.msra.mxu0 %v541_v4 }
  0x8a   :  { %v141_v60 = vpop.f32.mrf.mxu0  ;;  %v384_v61 = vmul.f32 %v1883_v28, %v345_v59  ;;  %v385_v62 = vmul.f32 %v1885_v29, %v345_v59  ;;  %v428_v40 = vmax.f32 %v396_v18, 0.0  ;;  %v429_v41 = vmax.f32 %v397_v19, 0.0  ;;  %v609_v59 = vld [vmem:[#allocation2 + $0x3b8] sm:$0xff] }
  0x8b   :  { %v142_v2 = vadd.f32 %v141_v60, %v1910_v53  ;;  %v206_v3 = vpop.f32.mrf.mxu1  ;;  %1085 = vmatpush.msra.mxu1 %v609_v59  ;;  %v362_v19 = vmul.f32 %v1883_v28, %v1901_v44 }
  0x8c   :  { %v207_v5 = vadd.f32 %v206_v3, %v1912_v54  ;;  %v1926_v6 = vpop.permute.xlu1 %316  ;;  %v1931_v8 = vadd.f32 %v1887_v32, %v384_v61  ;;  %v1934_v10 = vadd.f32 %v1889_v33, %v385_v62  ;;  %v600_v3 = vld [vmem:[#allocation2 + $0x370] sm:$0xff] }
  0x8d   :  { %v1928_v7 = vpop.permute.xlu0 %312  ;;  %v254_v11 = vmax.f32 %v142_v2, 0.0  ;;  %957 = vmatpush.msra.mxu3 %v600_v3  ;;  %v448_v3 = vmax.f32 %v1915_v55, 0.0 }
  0x8e   :  { %v255_v12 = vmax.f32 %v207_v5, 0.0 }
  0x8f   :  { %v1938_v17 = vmul.f32 %v426_v63, %v254_v11 }
  0x90   :  { %v1942_v20 = vmul.f32 %v427_v0, %v255_v12 }
  0x91   :  { %v168_v21 = vpop.f32.mrf.mxu2  ;;  %644 = vmatmul.f32.vlgmr.msrb.gmra.mxu2 %v1938_v17  ;;  %774 = vmatmul.f32.vlgmr.msrb.gmra.mxu0 %v1938_v17 }
  0x92   :  { %v230_v25 = vpop.f32.mrf.mxu3  ;;  %v169_v26 = vadd.f32 %v168_v21, %v1910_v53  ;;  %709 = vmatmul.f32.vlgmr.msrb.gmra.mxu3 %v1942_v20  ;;  %839 = vmatmul.f32.vlgmr.msrb.gmra.mxu1 %v1942_v20  ;;  %v144_v30 = vpop.f32.mrf.mxu0 }
  0x93   :  { %v231_v27 = vadd.f32 %v230_v25, %v1912_v54  ;;  %v145_v36 = vadd.f32 %v144_v30, %v1910_v53  ;;  %v209_v39 = vpop.f32.mrf.mxu1 }
  0x94   :  { %v210_v43 = vadd.f32 %v209_v39, %v1912_v54  ;;  %v329_v45 = vpop.permute.xlu1 %328  ;;  %v272_v50 = vmax.f32 %v169_v26, 0.0  ;;  %v363_v26 = vmul.f32 %v1885_v29, %v1901_v44 }
  0x95   :  { %v271_v42 = vmax.f32 %v231_v27, 0.0  ;;  %v325_v46 = vpop.permute.xlu0 %324  ;;  %v256_v47 = vmax.f32 %v145_v36, 0.0  ;;  %v376_v38 = vmul.f32 %v1883_v28, %v329_v45  ;;  %v377_v48 = vmul.f32 %v1885_v29, %v329_v45 }
  0x96   :  { %v374_v49 = vmul.f32 %v1883_v28, %v325_v46  ;;  %v257_v51 = vmax.f32 %v210_v43, 0.0  ;;  %v375_v52 = vmul.f32 %v1885_v29, %v325_v46  ;;  %v532_v46 = vld [vmem:[#allocation2 + $0x150] sm:$0xff]  ;;  %v401_v4 = vadd.f32 %v1889_v33, %v363_v26 }
  0x97   :  { %v1963_v57 = vmul.f32 %v443_v31, %v271_v42  ;;  %v1965_v60 = vmul.f32 %v428_v40, %v256_v47  ;;  %v414_v61 = vadd.f32 %v1887_v32, %v376_v38  ;;  %v1969_v62 = vadd.f32 %v1889_v33, %v377_v48  ;;  %v605_v47 = vld [vmem:[#allocation2 + $0x398] sm:$0xff]  ;;  %893 = vmatpush.msra.mxu2 %v532_v46 }
  0x98   :  { %v412_v63 = vadd.f32 %v1887_v32, %v374_v49  ;;  %v1972_v0 = vmul.f32 %v429_v41, %v257_v51  ;;  %v413_v1 = vadd.f32 %v1889_v33, %v375_v52  ;;  %1086 = vmatpush.msra.mxu1 %v605_v47  ;;  %v592_v47 = vld [vmem:[#allocation2 + $0x330] sm:$0xff] }
  0x99   :  { %v171_v2 = vpop.f32.mrf.mxu2  ;;  %v446_v5 = vmax.f32 %v414_v61, 0.0  ;;  %647 = vmatmul.f32.gmra.mxu2 %v1965_v60  ;;  %777 = vmatmul.f32.gmra.mxu0 %v1965_v60  ;;  %v596_v61 = vld [vmem:[#allocation2 + $0x350] sm:$0xff] }
  0x9a   :  { %v444_v11 = vmax.f32 %v412_v63, 0.0  ;;  %v172_v12 = vadd.f32 %v171_v2, %v1910_v53  ;;  %v233_v13 = vpop.f32.mrf.mxu3  ;;  %712 = vmatmul.f32.gmra.mxu3 %v1972_v0  ;;  %842 = vmatmul.f32.gmra.mxu1 %v1972_v0  ;;  %v147_v18 = vpop.f32.mrf.mxu0  ;;  %v445_v27 = vmax.f32 %v413_v1, 0.0  ;;  %v537_v63 = vld [vmem:[#allocation2 + $0x178] sm:$0xff] }
  0x9b   :  { %v234_v16 = vadd.f32 %v233_v13, %v1912_v54  ;;  %v148_v24 = vadd.f32 %v147_v18, %v1910_v53  ;;  %v212_v25 = vpop.f32.mrf.mxu1  ;;  %v365_v13 = vmul.f32 %v1885_v29, %v1873_v9  ;;  %958 = vmatpush.msra.mxu3 %v596_v61  ;;  %1022 = vmatpush.msra.mxu0 %v537_v63  ;;  %v447_v18 = vmax.f32 %v1969_v62, 0.0 }
  0x9c   :  { %v1985_v21 = vmul.f32 %v444_v11, %v272_v50  ;;  %v274_v23 = vmax.f32 %v172_v12, 0.0  ;;  %v213_v31 = vadd.f32 %v212_v25, %v1912_v54  ;;  %v341_v34 = vpop.permute.xlu1 %340  ;;  %v400_v50 = vadd.f32 %v1887_v32, %v362_v19 }
  0x9d   :  { %v273_v30 = vmax.f32 %v234_v16, 0.0  ;;  %v337_v35 = vpop.permute.xlu0 %336  ;;  %v258_v39 = vmax.f32 %v148_v24, 0.0  ;;  %v382_v40 = vmul.f32 %v1883_v28, %v341_v34  ;;  %v383_v41 = vmul.f32 %v1885_v29, %v341_v34  ;;  %959 = vmatpush.msra.mxu3 %v592_v47  ;;  %v520_v47 = vld [vmem:[#allocation2 + $0xf0] sm:$0xff] }
  0x9e   :  { %v1991_v36 = vmul.f32 %v446_v5, %v274_v23  ;;  %v259_v43 = vmax.f32 %v213_v31, 0.0  ;;  %v380_v45 = vmul.f32 %v1883_v28, %v337_v35  ;;  %v381_v44 = vmul.f32 %v1885_v29, %v337_v35 }
  0x9f   :  { %v1995_v42 = vmul.f32 %v445_v27, %v273_v30  ;;  %v1999_v38 = vmul.f32 %v430_v14, %v258_v39  ;;  %v2002_v48 = vadd.f32 %v1887_v32, %v382_v40  ;;  %v2005_v49 = vadd.f32 %v1889_v33, %v383_v41  ;;  %v528_v39 = vld [vmem:[#allocation2 + $0x130] sm:$0xff]  ;;  %v601_v40 = vld [vmem:[#allocation2 + $0x378] sm:$0xff] }
  0xa0   :  { %v2008_v51 = vmul.f32 %v431_v15, %v259_v43  ;;  %v2011_v52 = vadd.f32 %v1887_v32, %v380_v45  ;;  %v2014_v58 = vadd.f32 %v1889_v33, %v381_v44  ;;  %v364_v5 = vmul.f32 %v1883_v28, %v1873_v9  ;;  %894 = vmatpush.msra.mxu2 %v528_v39 }
  0xa1   :  { %v174_v59 = vpop.f32.mrf.mxu2  ;;  %650 = vmatmul.f32.gmra.mxu2 %v1999_v38  ;;  %780 = vmatmul.f32.gmra.mxu0 %v1999_v38  ;;  %v432_v16 = vmax.f32 %v400_v50, 0.0  ;;  %v433_v30 = vmax.f32 %v401_v4, 0.0  ;;  %v403_v45 = vadd.f32 %v1889_v33, %v365_v13  ;;  %v533_v50 = vld [vmem:[#allocation2 + $0x158] sm:$0xff]  ;;  %v449_v63 = vmax.f32 %v1918_v56, 0.0 }
  0xa2   :  { %v175_v1 = vadd.f32 %v174_v59, %v1910_v53  ;;  %v236_v2 = vpop.f32.mrf.mxu3  ;;  %715 = vmatmul.f32.gmra.mxu3 %v2008_v51  ;;  %845 = vmatmul.f32.gmra.mxu1 %v2008_v51  ;;  %v150_v12 = vpop.f32.mrf.mxu0  ;;  %v402_v31 = vadd.f32 %v1887_v32, %v364_v5  ;;  %v450_v4 = vmax.f32 %v2011_v52, 0.0 }
  0xa3   :  { %v237_v11 = vadd.f32 %v236_v2, %v1912_v54  ;;  %v151_v14 = vadd.f32 %v150_v12, %v1910_v53  ;;  %v215_v15 = vpop.f32.mrf.mxu1  ;;  %1087 = vmatpush.msra.mxu1 %v601_v40  ;;  %1023 = vmatpush.msra.mxu0 %v533_v50  ;;  %v435_v13 = vmax.f32 %v403_v45, 0.0  ;;  %v593_v50 = vld [vmem:[#allocation2 + $0x338] sm:$0xff] }
  0xa4   :  { %v276_v55 = vmax.f32 %v175_v1, 0.0  ;;  %v216_v23 = vadd.f32 %v215_v15, %v1912_v54 }
  0xa5   :  { %v275_v19 = vmax.f32 %v237_v11, 0.0  ;;  %v349_v24 = vpop.permute.xlu0 %348  ;;  %v260_v26 = vmax.f32 %v151_v14, 0.0  ;;  %v366_v14 = vmul.f32 %v1883_v28, %v1875_v22 }
  0xa6   :  { %v2031_v25 = vmul.f32 %v448_v3, %v276_v55  ;;  %v386_v27 = vmul.f32 %v1883_v28, %v349_v24  ;;  %v387_v9 = vmul.f32 %v1885_v29, %v349_v24  ;;  %v261_v35 = vmax.f32 %v216_v23, 0.0  ;;  %v524_v23 = vld [vmem:[#allocation2 + $0x110] sm:$0xff]  ;;  %v597_v24 = vld [vmem:[#allocation2 + $0x358] sm:$0xff] }
  0xa7   :  { %v2036_v34 = vmul.f32 %v447_v18, %v275_v19  ;;  %v2038_v62 = vmul.f32 %v432_v16, %v260_v26  ;;  %v434_v3 = vmax.f32 %v402_v31, 0.0  ;;  %v367_v18 = vmul.f32 %v1885_v29, %v1875_v22  ;;  %895 = vmatpush.msra.mxu2 %v524_v23  ;;  %1088 = vmatpush.msra.mxu1 %v597_v24 }
  0xa8   :  { %v2041_v41 = vadd.f32 %v1887_v32, %v386_v27  ;;  %v2044_v43 = vadd.f32 %v1889_v33, %v387_v9  ;;  %v2047_v44 = vmul.f32 %v433_v30, %v261_v35  ;;  %v588_v27 = vld [vmem:[#allocation2 + $0x310] sm:$0xff]  ;;  %v529_v9 = vld [vmem:[#allocation2 + $0x138] sm:$0xff]  ;;  %v404_v35 = vadd.f32 %v1887_v32, %v366_v14 }
  0xa9   :  { %v177_v46 = vpop.f32.mrf.mxu2  ;;  %653 = vmatmul.f32.gmra.mxu2 %v2038_v62  ;;  %783 = vmatmul.f32.gmra.mxu0 %v2038_v62  ;;  %v405_v40 = vadd.f32 %v1889_v33, %v367_v18 }
  0xaa   :  { %v178_v59 = vadd.f32 %v177_v46, %v1910_v53  ;;  %v239_v61 = vpop.f32.mrf.mxu3  ;;  %718 = vmatmul.f32.gmra.mxu3 %v2047_v44  ;;  %848 = vmatmul.f32.gmra.mxu1 %v2047_v44  ;;  %v153_v2 = vpop.f32.mrf.mxu0 }
  0xab   :  { %v240_v1 = vadd.f32 %v239_v61, %v1912_v54  ;;  %v154_v11 = vadd.f32 %v153_v2, %v1910_v53  ;;  %v218_v12 = vpop.f32.mrf.mxu1  ;;  %960 = vmatpush.msra.mxu3 %v588_v27  ;;  %1024 = vmatpush.msra.mxu0 %v529_v9  ;;  %v452_v61 = vmax.f32 %v2002_v48, 0.0  ;;  %v437_v14 = vmax.f32 %v405_v40, 0.0  ;;  %v580_v40 = vld [vmem:[#allocation2 + $0x2d0] sm:$0xff] }
  0xac   :  { %v278_v5 = vmax.f32 %v178_v59, 0.0  ;;  %v219_v56 = vadd.f32 %v218_v12, %v1912_v54  ;;  %v584_v59 = vld [vmem:[#allocation2 + $0x2f0] sm:$0xff]  ;;  %896 = vmatpush.msra.mxu2 %v520_v47  ;;  %1089 = vmatpush.msra.mxu1 %v593_v50  ;;  %v368_v12 = vmul.f32 %v1883_v28, %v1928_v7 }
  0xad   :  { %v277_v55 = vmax.f32 %v240_v1, 0.0  ;;  %v262_v16 = vmax.f32 %v154_v11, 0.0  ;;  %961 = vmatpush.msra.mxu3 %v584_v59  ;;  %v521_v59 = vld [vmem:[#allocation2 + $0xf8] sm:$0xff] }
  0xae   :  { %v2061_v15 = vmul.f32 %v450_v4, %v278_v5  ;;  %v263_v19 = vmax.f32 %v219_v56, 0.0  ;;  %v451_v4 = vmax.f32 %v2014_v58, 0.0  ;;  %v369_v56 = vmul.f32 %v1885_v29, %v1928_v7 }
  0xaf   :  { %v2065_v52 = vmul.f32 %v449_v63, %v277_v55  ;;  %v2067_v26 = vmul.f32 %v434_v3, %v262_v16  ;;  %v525_v3 = vld [vmem:[#allocation2 + $0x118] sm:$0xff]  ;;  %v406_v24 = vadd.f32 %v1887_v32, %v368_v12  ;;  %962 = vmatpush.msra.mxu3 %v580_v40 }
  0xb0   :  { %v2069_v30 = vmul.f32 %v435_v13, %v263_v19  ;;  %1025 = vmatpush.msra.mxu0 %v525_v3  ;;  %v436_v13 = vmax.f32 %v404_v35, 0.0  ;;  %v407_v7 = vadd.f32 %v1889_v33, %v369_v56 }
  0xb1   :  { %v180_v31 = vpop.f32.mrf.mxu2  ;;  %656 = vmatmul.f32.gmra.mxu2 %v2067_v26  ;;  %786 = vmatmul.f32.gmra.mxu0 %v2067_v26  ;;  %v438_v3 = vmax.f32 %v406_v24, 0.0  ;;  %v512_v24 = vld [vmem:[#allocation2 + $0xb0] sm:$0xff] }
  0xb2   :  { %v181_v22 = vadd.f32 %v180_v31, %v1910_v53  ;;  %v242_v39 = vpop.f32.mrf.mxu3  ;;  %721 = vmatmul.f32.gmra.mxu3 %v2069_v30  ;;  %851 = vmatmul.f32.gmra.mxu1 %v2069_v30  ;;  %v156_v46 = vpop.f32.mrf.mxu0 }
  0xb3   :  { %v243_v45 = vadd.f32 %v242_v39, %v1912_v54  ;;  %v157_v1 = vadd.f32 %v156_v46, %v1910_v53  ;;  %v221_v2 = vpop.f32.mrf.mxu1  ;;  %v589_v39 = vld [vmem:[#allocation2 + $0x318] sm:$0xff]  ;;  %1026 = vmatpush.msra.mxu0 %v521_v59 }
  0xb4   :  { %v280_v63 = vmax.f32 %v181_v22, 0.0  ;;  %v222_v11 = vadd.f32 %v221_v2, %v1912_v54  ;;  %v516_v22 = vld [vmem:[#allocation2 + $0xd0] sm:$0xff]  ;;  %1090 = vmatpush.msra.mxu1 %v589_v39  ;;  %v370_v2 = vmul.f32 %v1883_v28, %v1926_v6 }
  0xb5   :  { %v279_v5 = vmax.f32 %v243_v45, 0.0  ;;  %v264_v48 = vmax.f32 %v157_v1, 0.0  ;;  %v454_v45 = vmax.f32 %v1931_v8, 0.0  ;;  %897 = vmatpush.msra.mxu2 %v516_v22  ;;  %v517_v22 = vld [vmem:[#allocation2 + $0xd8] sm:$0xff] }
  0xb6   :  { %v2085_v55 = vmul.f32 %v452_v61, %v280_v63  ;;  %v265_v18 = vmax.f32 %v222_v11, 0.0  ;;  %v453_v61 = vmax.f32 %v2005_v49, 0.0  ;;  %v439_v11 = vmax.f32 %v407_v7, 0.0  ;;  %1027 = vmatpush.msra.mxu0 %v517_v22  ;;  %v492_v22 = vld [vmem:[#allocation2 + $0x10] sm:$0xff] }
  0xb7   :  { %v2089_v16 = vmul.f32 %v451_v4, %v279_v5  ;;  %v2091_v58 = vmul.f32 %v436_v13, %v264_v48  ;;  %v371_v5 = vmul.f32 %v1885_v29, %v1926_v6  ;;  %898 = vmatpush.msra.mxu2 %v512_v24  ;;  %v573_v24 = vld [vmem:[#allocation2 + $0x298] sm:$0xff] }
  0xb8   :  { %v2093_v19 = vmul.f32 %v437_v14, %v265_v18  ;;  %v408_v14 = vadd.f32 %v1887_v32, %v370_v2  ;;  %v456_v32 = vmax.f32 %v2041_v41, 0.0 }
  0xb9   :  { %v183_v23 = vpop.f32.mrf.mxu2  ;;  %659 = vmatmul.f32.gmra.mxu2 %v2091_v58  ;;  %789 = vmatmul.f32.gmra.mxu0 %v2091_v58  ;;  %v409_v29 = vadd.f32 %v1889_v33, %v371_v5  ;;  %v455_v33 = vmax.f32 %v1934_v10, 0.0  ;;  %v572_v5 = vld [vmem:[#allocation2 + $0x290] sm:$0xff] }
  0xba   :  { %v184_v27 = vadd.f32 %v183_v23, %v1910_v53  ;;  %v245_v9 = vpop.f32.mrf.mxu3  ;;  %724 = vmatmul.f32.gmra.mxu3 %v2093_v19  ;;  %854 = vmatmul.f32.gmra.mxu1 %v2093_v19  ;;  %v159_v35 = vpop.f32.mrf.mxu0 }
  0xbb   :  { %v246_v31 = vadd.f32 %v245_v9, %v1912_v54  ;;  %v160_v47 = vadd.f32 %v159_v35, %v1910_v53  ;;  %v224_v50 = vpop.f32.mrf.mxu1  ;;  %v576_v9 = vld [vmem:[#allocation2 + $0x2b0] sm:$0xff] }
  0xbc   :  { %v282_v46 = vmax.f32 %v184_v27, 0.0  ;;  %v225_v1 = vadd.f32 %v224_v50, %v1912_v54  ;;  %v585_v27 = vld [vmem:[#allocation2 + $0x2f8] sm:$0xff]  ;;  %963 = vmatpush.msra.mxu3 %v576_v9  ;;  %v441_v50 = vmax.f32 %v409_v29, 0.0 }
  0xbd   :  { %v281_v63 = vmax.f32 %v246_v31, 0.0  ;;  %v266_v8 = vmax.f32 %v160_v47, 0.0  ;;  %1091 = vmatpush.msra.mxu1 %v585_v27  ;;  %v564_v27 = vld [vmem:[#allocation2 + $0x250] sm:$0xff]  ;;  %v505_v9 = vld [vmem:[#allocation2 + $0x78] sm:$0xff] }
  0xbe   :  { %v2109_v4 = vmul.f32 %v454_v45, %v282_v46  ;;  %v267_v13 = vmax.f32 %v225_v1, 0.0  ;;  %v440_v45 = vmax.f32 %v408_v14, 0.0  ;;  %964 = vmatpush.msra.mxu3 %v572_v5  ;;  %v1275_v5 = vld [vmem:[%s2755_s7 + $0x1f8] sm:$0xff] }
  0xbf   :  { %v2113_v12 = vmul.f32 %v453_v61, %v281_v63  ;;  %v2115_v49 = vmul.f32 %v438_v3, %v266_v8  ;;  %v508_v3 = vld [vmem:[#allocation2 + $0x90] sm:$0xff]  ;;  %v581_v8 = vld [vmem:[#allocation2 + $0x2d8] sm:$0xff] }
  0xc0   :  { %v2117_v48 = vmul.f32 %v439_v11, %v267_v13  ;;  %899 = vmatpush.msra.mxu2 %v508_v3  ;;  %1092 = vmatpush.msra.mxu1 %v581_v8  ;;  %v513_v13 = vld [vmem:[#allocation2 + $0xb8] sm:$0xff]  ;;  %v1225_v8 = vld [vmem:[%s2755_s7 + $0x68] sm:$0xff] }
  0xc1   :  { %v186_v56 = vpop.f32.mrf.mxu2  ;;  %662 = vmatmul.f32.gmra.mxu2 %v2115_v49  ;;  %792 = vmatmul.f32.gmra.mxu0 %v2115_v49  ;;  %v2194_v3 = vld [vmem:[%s2755_s7 + $0x178] sm:$0xff] }
  0xc2   :  { %v187_v28 = vadd.f32 %v186_v56, %v1910_v53  ;;  %v248_v18 = vpop.f32.mrf.mxu3  ;;  %727 = vmatmul.f32.gmra.mxu3 %v2117_v48  ;;  %857 = vmatmul.f32.gmra.mxu1 %v2117_v48  ;;  %v162_v23 = vpop.f32.mrf.mxu0  ;;  %v457_v56 = vmax.f32 %v2044_v43, 0.0  ;;  %v577_v43 = vld [vmem:[#allocation2 + $0x2b8] sm:$0xff] }
  0xc3   :  { %v249_v6 = vadd.f32 %v248_v18, %v1912_v54  ;;  %v163_v31 = vadd.f32 %v162_v23, %v1910_v53  ;;  %v227_v35 = vpop.f32.mrf.mxu1  ;;  %1028 = vmatpush.msra.mxu0 %v513_v13  ;;  %1093 = vmatpush.msra.mxu1 %v577_v43  ;;  %v509_v23 = vld [vmem:[#allocation2 + $0x98] sm:$0xff]  ;;  %v2213_v13 = vld [vmem:[%s2755_s7 + $0x170] sm:$0xff] }
  0xc4   :  { %v284_v7 = vmax.f32 %v187_v28, 0.0  ;;  %v228_v40 = vadd.f32 %v227_v35, %v1912_v54  ;;  %v501_v35 = vld [vmem:[#allocation2 + $0x58] sm:$0xff] }
  0xc5   :  { %v283_v39 = vmax.f32 %v249_v6, 0.0  ;;  %v268_v47 = vmax.f32 %v163_v31, 0.0  ;;  %v568_v6 = vld [vmem:[#allocation2 + $0x270] sm:$0xff]  ;;  %1029 = vmatpush.msra.mxu0 %v509_v23  ;;  %1094 = vmatpush.msra.mxu1 %v573_v24  ;;  %v2244_v23 = vld [vmem:[%s2755_s7 + $0x168] sm:$0xff] }
  0xc6   :  { %v2131_v46 = vmul.f32 %v456_v32, %v284_v7  ;;  %v269_v59 = vmax.f32 %v228_v40, 0.0  ;;  %965 = vmatpush.msra.mxu3 %v568_v6  ;;  %v496_v32 = vld [vmem:[#allocation2 + $0x30] sm:$0xff]  ;;  %v569_v7 = vld [vmem:[#allocation2 + $0x278] sm:$0xff]  ;;  %v1240_v6 = vld [vmem:[%s2755_s7 + $0xe0] sm:$0xff] }
  0xc7   :  { %v2133_v41 = vmul.f32 %v455_v33, %v283_v39  ;;  %v2135_v61 = vmul.f32 %v440_v45, %v268_v47  ;;  %1030 = vmatpush.msra.mxu0 %v505_v9  ;;  %v560_v31 = vld [vmem:[#allocation2 + $0x230] sm:$0xff]  ;;  %1095 = vmatpush.msra.mxu1 %v569_v7  ;;  %v565_v33 = vld [vmem:[#allocation2 + $0x258] sm:$0xff] }
  0xc8   :  { %v2137_v63 = vmul.f32 %v441_v50, %v269_v59  ;;  %966 = vmatpush.msra.mxu3 %v564_v27  ;;  %v556_v39 = vld [vmem:[#allocation2 + $0x210] sm:$0xff]  ;;  %v497_v40 = vld [vmem:[#allocation2 + $0x38] sm:$0xff] }
  0xc9   :  { %665 = vmatmul.f32.gmra.mxu2 %v2135_v61  ;;  %795 = vmatmul.f32.gmra.mxu0 %v2135_v61  ;;  %v561_v45 = vld [vmem:[#allocation2 + $0x238] sm:$0xff] }
  0xca   :  { %v251_v1 = vpop.f32.mrf.mxu3  ;;  %730 = vmatmul.f32.gmra.mxu3 %v2137_v63  ;;  %860 = vmatmul.f32.gmra.mxu1 %v2137_v63  ;;  %v165_v2 = vpop.f32.mrf.mxu0  ;;  %v493_v47 = vld [vmem:[#allocation2 + $0x18] sm:$0xff] }
  0xcb   :  { %v252_v10 = vadd.f32 %v251_v1, %v1912_v54  ;;  %v166_v11 = vadd.f32 %v165_v2, %v1910_v53  ;;  %v442_v54 = vmax.f32 %v1894_v37, 0.0  ;;  %v504_v53 = vld [vmem:[#allocation2 + $0x70] sm:$0xff]  ;;  %967 = vmatpush.msra.mxu3 %v560_v31  ;;  %1031 = vmatpush.msra.mxu0 %v501_v35  ;;  %v557_v50 = vld [vmem:[#allocation2 + $0x218] sm:$0xff]  ;;  %v2270_v35 = vld [vmem:[%s2755_s7 + $0x160] sm:$0xff] }
  0xcc   :  { %900 = vmatpush.msra.mxu2 %v504_v53  ;;  %v500_v37 = vld [vmem:[#allocation2 + $0x50] sm:$0xff]  ;;  %1096 = vmatpush.msra.mxu1 %v565_v33  ;;  %v1227_v59 = vld [vmem:[%s2755_s7 + $0x78] sm:$0xff]  ;;  %v2229_v53 = vld [vmem:[%s2754_s6] sm:$0xf] }
  0xcd   :  { %v285_v14 = vmax.f32 %v252_v10, 0.0  ;;  %v270_v28 = vmax.f32 %v166_v11, 0.0  ;;  %968 = vmatpush.msra.mxu3 %v556_v39  ;;  %1032 = vmatpush.msra.mxu0 %v497_v40  ;;  %v1243_v1 = vld [vmem:[%s2755_s7 + $0xf8] sm:$0xff]  ;;  %v1226_v10 = vld [vmem:[%s2755_s7 + $0x70] sm:$0xff]  ;;  %v1241_v11 = vld [vmem:[%s2755_s7 + $0xe8] sm:$0xff]  ;;  %v2234_v43 = vperm.slane %v2229_v53, 0 }
  0xce   :  { %901 = vmatpush.msra.mxu2 %v500_v37  ;;  %1097 = vmatpush.msra.mxu1 %v561_v45  ;;  %v1242_v2 = vld [vmem:[%s2755_s7 + $0xf0] sm:$0xff]  ;;  %v1239_v31 = vld [vmem:[%s2755_s7 + $0xd8] sm:$0xff] }
  0xcf   :  { %v2147_v18 = vmul.f32 %v457_v56, %v285_v14  ;;  %v2149_v29 = vmul.f32 %v442_v54, %v270_v28  ;;  %1033 = vmatpush.msra.mxu0 %v493_v47  ;;  %1345 = vmatpush.msrb.mxu3 %v1243_v1  ;;  %v1224_v56 = vld [vmem:[%s2755_s7 + $0x60] sm:$0xff]  ;;  %v1274_v14 = vld [vmem:[%s2755_s7 + $0x1f0] sm:$0xff]  ;;  %v1221_v1 = vld [vmem:[%s2755_s7 + $0x48] sm:$0xff] }
  0xd0   :  { %902 = vmatpush.msra.mxu2 %v496_v32  ;;  %1098 = vmatpush.msra.mxu1 %v557_v50  ;;  %v1238_v50 = vld [vmem:[%s2755_s7 + $0xd0] sm:$0xff] }
  0xd1   :  { %668 = vmatmul.f32.gmra.mxu2 %v2149_v29  ;;  %798 = vmatmul.f32.gmra.mxu0 %v2149_v29 }
  0xd2   :  { %733 = vmatmul.f32.gmra.mxu3 %v1963_v57  ;;  %863 = vmatmul.f32.gmra.mxu1 %v1963_v57 }
  0xd3   :  { %903 = vmatpush.msra.mxu2 %v492_v22  ;;  %1346 = vmatpush.msrb.mxu3 %v1242_v2  ;;  %v1222_v22 = vld [vmem:[%s2755_s7 + $0x50] sm:$0xff] }
  0xd4   :  { %1410 = vmatpush.msrb.mxu0 %v2194_v3  ;;  %1475 = vmatpush.msrb.mxu1 %v1275_v5 }
  0xd5   :  { %1280 = vmatpush.msrb.mxu2 %v1227_v59  ;;  %1347 = vmatpush.msrb.mxu3 %v1241_v11  ;;  %v2296_v59 = vld [vmem:[%s2755_s7 + $0x158] sm:$0xff] }
  0xd6   :  { %1411 = vmatpush.msrb.mxu0 %v2213_v13  ;;  %1476 = vmatpush.msrb.mxu1 %v1274_v14  ;;  %v2322_v14 = vld [vmem:[%s2755_s7 + $0x150] sm:$0xff] }
  0xd7   :  { %1281 = vmatpush.msrb.mxu2 %v1226_v10  ;;  %1348 = vmatpush.msrb.mxu3 %v1240_v6  ;;  %v1220_v6 = vld [vmem:[%s2755_s7 + $0x40] sm:$0xff] }
  0xd8   :  { %1412 = vmatpush.msrb.mxu0 %v2244_v23 }
  0xd9   :  { %671 = vmatmul.f32.gmra.mxu2 %v1985_v21  ;;  %801 = vmatmul.f32.gmra.mxu0 %v1985_v21 }
  0xda   :  { %736 = vmatmul.f32.gmra.mxu3 %v1995_v42  ;;  %866 = vmatmul.f32.gmra.mxu1 %v1995_v42 }
  0xdb   :  { %1282 = vmatpush.msrb.mxu2 %v1225_v8  ;;  %1349 = vmatpush.msrb.mxu3 %v1239_v31  ;;  %v1236_v31 = vld [vmem:[%s2755_s7 + $0xc0] sm:$0xff] }
  0xdc   :  { %1413 = vmatpush.msrb.mxu0 %v2270_v35 }
  0xdd   :  { %1283 = vmatpush.msrb.mxu2 %v1224_v56  ;;  %1350 = vmatpush.msrb.mxu3 %v1238_v50  ;;  %v1237_v56 = vld [vmem:[%s2755_s7 + $0xc8] sm:$0xff] }
  0xde   :  { %1414 = vmatpush.msrb.mxu0 %v2296_v59 }
  0xdf   :  { %1351 = vmatpush.msrb.mxu3 %v1237_v56 }
  0xe0   :  { %1415 = vmatpush.msrb.mxu0 %v2322_v14 }
  0xe1   :  { %674 = vmatmul.f32.gmra.mxu2 %v1991_v36  ;;  %804 = vmatmul.f32.gmra.mxu0 %v1991_v36 }
  0xe2   :  { %739 = vmatmul.f32.gmra.mxu3 %v2036_v34  ;;  %869 = vmatmul.f32.gmra.mxu1 %v2036_v34 }
  0xe3   :  { %1352 = vmatpush.msrb.mxu3 %v1236_v31  ;;  %v1217_v31 = vld [vmem:[%s2755_s7 + $0x28] sm:$0xff] }
  0xe9   :  { %677 = vmatmul.f32.gmra.mxu2 %v2031_v25  ;;  %807 = vmatmul.f32.gmra.mxu0 %v2031_v25 }
  0xea   :  { %742 = vmatmul.f32.gmra.mxu3 %v2065_v52  ;;  %872 = vmatmul.f32.gmra.mxu1 %v2065_v52 }
  0xf1   :  { %680 = vmatmul.f32.gmra.mxu2 %v2061_v15  ;;  %810 = vmatmul.f32.gmra.mxu0 %v2061_v15 }
  0xf2   :  { %745 = vmatmul.f32.gmra.mxu3 %v2089_v16  ;;  %875 = vmatmul.f32.gmra.mxu1 %v2089_v16 }
  0xf9   :  { %683 = vmatmul.f32.gmra.mxu2 %v2085_v55  ;;  %813 = vmatmul.f32.gmra.mxu0 %v2085_v55 }
  0xfa   :  { %748 = vmatmul.f32.gmra.mxu3 %v2113_v12  ;;  %878 = vmatmul.f32.gmra.mxu1 %v2113_v12 }
 0x101   :  { %686 = vmatmul.f32.gmra.mxu2 %v2109_v4  ;;  %816 = vmatmul.f32.gmra.mxu0 %v2109_v4 }
 0x102   :  { %751 = vmatmul.f32.gmra.mxu3 %v2133_v41  ;;  %881 = vmatmul.f32.gmra.mxu1 %v2133_v41 }
 0x109   :  { %689 = vmatmul.f32.gmra.mxu2 %v2131_v46  ;;  %819 = vmatmul.f32.gmra.mxu0 %v2131_v46 }
 0x10a   :  { %754 = vmatmul.f32.gmra.mxu3 %v2147_v18  ;;  %884 = vmatmul.f32.gmra.mxu1 %v2147_v18 }
 0x10e   :  { %v2222_v54 = vpop.f32.mrf.mxu0 }
 0x10f   :  { %v2224_v28 = vpop.f32.mrf.mxu1 }
 0x111   :  { %904 = vmatmul.f32.vlgmr.msra.gmra.mxu2 %v1938_v17  ;;  %1034 = vmatmul.f32.vlgmr.msra.gmra.mxu0 %v1938_v17  ;;  %v1223_v17 = vld [vmem:[%s2755_s7 + $0x58] sm:$0xff] }
 0x112   :  { %969 = vmatmul.f32.vlgmr.msra.gmra.mxu3 %v1942_v20  ;;  %1099 = vmatmul.f32.vlgmr.msra.gmra.mxu1 %v1942_v20  ;;  %v1273_v20 = vld [vmem:[%s2755_s7 + $0x1e8] sm:$0xff] }
 0x113   :  { %1284 = vmatpush.msrb.mxu2 %v1223_v17  ;;  %1477 = vmatpush.msrb.mxu1 %v1273_v20 }
 0x114   :  { %v645_v37 = vpop.f32.mrf.mxu2 }
 0x115   :  { %v646_v24 = vadd.f32 %v645_v37, %v2234_v43  ;;  %v710_v27 = vpop.f32.mrf.mxu3  ;;  %1285 = vmatpush.msrb.mxu2 %v1222_v22  ;;  %v2348_v22 = vld [vmem:[%s2755_s7 + $0x148] sm:$0xff] }
 0x116   :  { %v2254_v9 = vpop.f32.mrf.mxu0  ;;  %1416 = vmatpush.msrb.mxu0 %v2348_v22 }
 0x117   :  { %v2256_v32 = vadd.f32 %v710_v27, %v646_v24  ;;  %v2258_v7 = vpop.f32.mrf.mxu1  ;;  %1286 = vmatpush.msrb.mxu2 %v1221_v1 }
 0x119   :  { %907 = vmatmul.f32.gmra.mxu2 %v1965_v60  ;;  %1037 = vmatmul.f32.gmra.mxu0 %v1965_v60  ;;  %v1272_v60 = vld [vmem:[%s2755_s7 + $0x1e0] sm:$0xff] }
 0x11a   :  { %972 = vmatmul.f32.gmra.mxu3 %v1972_v0  ;;  %1102 = vmatmul.f32.gmra.mxu1 %v1972_v0 }
 0x11b   :  { %1478 = vmatpush.msrb.mxu1 %v1272_v60  ;;  %1287 = vmatpush.msrb.mxu2 %v1220_v6 }
 0x11c   :  { %v648_v33 = vpop.f32.mrf.mxu2 }
 0x11d   :  { %v649_v0 = vadd.f32 %v648_v33, %v2234_v43  ;;  %v713_v39 = vpop.f32.mrf.mxu3  ;;  %v1219_v33 = vld [vmem:[%s2755_s7 + $0x38] sm:$0xff] }
 0x11e   :  { %v2280_v40 = vpop.f32.mrf.mxu0  ;;  %1288 = vmatpush.msrb.mxu2 %v1219_v33 }
 0x11f   :  { %v2282_v45 = vadd.f32 %v713_v39, %v649_v0  ;;  %v2284_v47 = vpop.f32.mrf.mxu1 }
 0x121   :  { %910 = vmatmul.f32.gmra.mxu2 %v1999_v38  ;;  %1040 = vmatmul.f32.gmra.mxu0 %v1999_v38  ;;  %v1271_v38 = vld [vmem:[%s2755_s7 + $0x1d8] sm:$0xff] }
 0x122   :  { %975 = vmatmul.f32.gmra.mxu3 %v2008_v51  ;;  %1105 = vmatmul.f32.gmra.mxu1 %v2008_v51 }
 0x123   :  { %1479 = vmatpush.msrb.mxu1 %v1271_v38  ;;  %v2374_v38 = vld [vmem:[%s2755_s7 + $0x140] sm:$0xff] }
 0x124   :  { %v651_v10 = vpop.f32.mrf.mxu2  ;;  %1417 = vmatpush.msrb.mxu0 %v2374_v38 }
 0x125   :  { %v652_v51 = vadd.f32 %v651_v10, %v2234_v43  ;;  %v716_v2 = vpop.f32.mrf.mxu3  ;;  %v1235_v10 = vld [vmem:[%s2755_s7 + $0xb8] sm:$0xff] }
 0x126   :  { %v2306_v8 = vpop.f32.mrf.mxu0  ;;  %1353 = vmatpush.msrb.mxu3 %v1235_v10  ;;  %v1233_v10 = vld [vmem:[%s2755_s7 + $0xa8] sm:$0xff] }
 0x127   :  { %v2308_v5 = vadd.f32 %v716_v2, %v652_v51  ;;  %v2310_v11 = vpop.f32.mrf.mxu1  ;;  %v1218_v51 = vld [vmem:[%s2755_s7 + $0x30] sm:$0xff] }
 0x128   :  { %1289 = vmatpush.msrb.mxu2 %v1218_v51  ;;  %v2426_v51 = vld [vmem:[%s2755_s7 + $0x130] sm:$0xff] }
 0x129   :  { %913 = vmatmul.f32.gmra.mxu2 %v2038_v62  ;;  %1043 = vmatmul.f32.gmra.mxu0 %v2038_v62  ;;  %v1270_v62 = vld [vmem:[%s2755_s7 + $0x1d0] sm:$0xff] }
 0x12a   :  { %978 = vmatmul.f32.gmra.mxu3 %v2047_v44  ;;  %1108 = vmatmul.f32.gmra.mxu1 %v2047_v44 }
 0x12b   :  { %1480 = vmatpush.msrb.mxu1 %v1270_v62  ;;  %1290 = vmatpush.msrb.mxu2 %v1217_v31 }
 0x12c   :  { %v654_v17 = vpop.f32.mrf.mxu2 }
 0x12d   :  { %v655_v44 = vadd.f32 %v654_v17, %v2234_v43  ;;  %v719_v37 = vpop.f32.mrf.mxu3 }
 0x12e   :  { %v2332_v20 = vpop.f32.mrf.mxu0 }
 0x12f   :  { %v2334_v24 = vadd.f32 %v719_v37, %v655_v44  ;;  %v2336_v27 = vpop.f32.mrf.mxu1  ;;  %v1234_v44 = vld [vmem:[%s2755_s7 + $0xb0] sm:$0xff]  ;;  %v2400_v37 = vld [vmem:[%s2755_s7 + $0x138] sm:$0xff] }
 0x130   :  { %1354 = vmatpush.msrb.mxu3 %v1234_v44  ;;  %1418 = vmatpush.msrb.mxu0 %v2400_v37 }
 0x131   :  { %916 = vmatmul.f32.gmra.mxu2 %v2067_v26  ;;  %1046 = vmatmul.f32.gmra.mxu0 %v2067_v26  ;;  %v1269_v26 = vld [vmem:[%s2755_s7 + $0x1c8] sm:$0xff] }
 0x132   :  { %981 = vmatmul.f32.gmra.mxu3 %v2069_v30  ;;  %1111 = vmatmul.f32.gmra.mxu1 %v2069_v30 }
 0x133   :  { %1481 = vmatpush.msrb.mxu1 %v1269_v26  ;;  %1355 = vmatpush.msrb.mxu3 %v1233_v10 }
 0x134   :  { %v657_v60 = vpop.f32.mrf.mxu2  ;;  %1419 = vmatpush.msrb.mxu0 %v2426_v51 }
 0x135   :  { %v658_v30 = vadd.f32 %v657_v60, %v2234_v43  ;;  %v722_v0 = vpop.f32.mrf.mxu3 }
 0x136   :  { %v2358_v39 = vpop.f32.mrf.mxu0 }
 0x137   :  { %v2360_v50 = vadd.f32 %v722_v0, %v658_v30  ;;  %v2362_v1 = vpop.f32.mrf.mxu1 }
 0x139   :  { %919 = vmatmul.f32.gmra.mxu2 %v2091_v58  ;;  %1049 = vmatmul.f32.gmra.mxu0 %v2091_v58  ;;  %v1268_v58 = vld [vmem:[%s2755_s7 + $0x1c0] sm:$0xff] }
 0x13a   :  { %984 = vmatmul.f32.gmra.mxu3 %v2093_v19  ;;  %1114 = vmatmul.f32.gmra.mxu1 %v2093_v19 }
 0x13b   :  { %1482 = vmatpush.msrb.mxu1 %v1268_v58 }
 0x13c   :  { %v660_v2 = vpop.f32.mrf.mxu2 }
 0x13d   :  { %v661_v19 = vadd.f32 %v660_v2, %v2234_v43  ;;  %v725_v56 = vpop.f32.mrf.mxu3  ;;  %v1216_v2 = vld [vmem:[%s2755_s7 + $0x20] sm:$0xff] }
 0x13e   :  { %v2384_v6 = vpop.f32.mrf.mxu0  ;;  %1291 = vmatpush.msrb.mxu2 %v1216_v2 }
 0x13f   :  { %v2386_v17 = vadd.f32 %v725_v56, %v661_v19  ;;  %v2388_v62 = vpop.f32.mrf.mxu1 }
 0x141   :  { %922 = vmatmul.f32.gmra.mxu2 %v2115_v49  ;;  %1052 = vmatmul.f32.gmra.mxu0 %v2115_v49  ;;  %v1267_v49 = vld [vmem:[%s2755_s7 + $0x1b8] sm:$0xff] }
 0x142   :  { %987 = vmatmul.f32.gmra.mxu3 %v2117_v48  ;;  %1117 = vmatmul.f32.gmra.mxu1 %v2117_v48 }
 0x143   :  { %1483 = vmatpush.msrb.mxu1 %v1267_v49  ;;  %v2452_v49 = vld [vmem:[%s2755_s7 + $0x128] sm:$0xff] }
 0x144   :  { %v663_v33 = vpop.f32.mrf.mxu2  ;;  %1420 = vmatpush.msrb.mxu0 %v2452_v49 }
 0x145   :  { %v664_v48 = vadd.f32 %v663_v33, %v2234_v43  ;;  %v728_v60 = vpop.f32.mrf.mxu3  ;;  %v1232_v33 = vld [vmem:[%s2755_s7 + $0xa0] sm:$0xff] }
 0x146   :  { %v2410_v26 = vpop.f32.mrf.mxu0  ;;  %1356 = vmatpush.msrb.mxu3 %v1232_v33  ;;  %v1214_v33 = vld [vmem:[%s2755_s7 + $0x10] sm:$0xff] }
 0x147   :  { %v2412_v30 = vadd.f32 %v728_v60, %v664_v48  ;;  %v2414_v0 = vpop.f32.mrf.mxu1  ;;  %v1215_v48 = vld [vmem:[%s2755_s7 + $0x18] sm:$0xff] }
 0x148   :  { %1292 = vmatpush.msrb.mxu2 %v1215_v48 }
 0x149   :  { %925 = vmatmul.f32.gmra.mxu2 %v2135_v61  ;;  %1055 = vmatmul.f32.gmra.mxu0 %v2135_v61  ;;  %v1266_v61 = vld [vmem:[%s2755_s7 + $0x1b0] sm:$0xff] }
 0x14a   :  { %990 = vmatmul.f32.gmra.mxu3 %v2137_v63  ;;  %1120 = vmatmul.f32.gmra.mxu1 %v2137_v63 }
 0x14b   :  { %1484 = vmatpush.msrb.mxu1 %v1266_v61  ;;  %1293 = vmatpush.msrb.mxu2 %v1214_v33  ;;  %v2504_v33 = vld [vmem:[%s2755_s7 + $0x118] sm:$0xff] }
 0x14c   :  { %v666_v58 = vpop.f32.mrf.mxu2 }
 0x14d   :  { %v667_v63 = vadd.f32 %v666_v58, %v2234_v43  ;;  %v731_v19 = vpop.f32.mrf.mxu3 }
 0x14e   :  { %v2436_v56 = vpop.f32.mrf.mxu0 }
 0x14f   :  { %v2438_v44 = vadd.f32 %v731_v19, %v667_v63  ;;  %v2440_v31 = vpop.f32.mrf.mxu1  ;;  %v1231_v63 = vld [vmem:[%s2755_s7 + $0x98] sm:$0xff]  ;;  %v2478_v19 = vld [vmem:[%s2755_s7 + $0x120] sm:$0xff] }
 0x150   :  { %1357 = vmatpush.msrb.mxu3 %v1231_v63  ;;  %1421 = vmatpush.msrb.mxu0 %v2478_v19  ;;  %v1230_v63 = vld [vmem:[%s2755_s7 + $0x90] sm:$0xff] }
 0x151   :  { %928 = vmatmul.f32.gmra.mxu2 %v2149_v29  ;;  %1058 = vmatmul.f32.gmra.mxu0 %v2149_v29 }
 0x152   :  { %993 = vmatmul.f32.gmra.mxu3 %v1963_v57  ;;  %1123 = vmatmul.f32.gmra.mxu1 %v1963_v57  ;;  %v1265_v57 = vld [vmem:[%s2755_s7 + $0x1a8] sm:$0xff] }
 0x153   :  { %1485 = vmatpush.msrb.mxu1 %v1265_v57  ;;  %1358 = vmatpush.msrb.mxu3 %v1230_v63  ;;  %v1229_v63 = vld [vmem:[%s2755_s7 + $0x88] sm:$0xff] }
 0x154   :  { %v669_v60 = vpop.f32.mrf.mxu2  ;;  %1422 = vmatpush.msrb.mxu0 %v2504_v33 }
 0x155   :  { %v670_v29 = vadd.f32 %v669_v60, %v2234_v43  ;;  %v734_v10 = vpop.f32.mrf.mxu3  ;;  %1359 = vmatpush.msrb.mxu3 %v1229_v63  ;;  %v1228_v63 = vld [vmem:[%s2755_s7 + $0x80] sm:$0xff] }
 0x156   :  { %v2462_v2 = vpop.f32.mrf.mxu0 }
 0x157   :  { %v2464_v58 = vadd.f32 %v734_v10, %v670_v29  ;;  %v2466_v61 = vpop.f32.mrf.mxu1  ;;  %1360 = vmatpush.msrb.mxu3 %v1228_v63 }
 0x159   :  { %931 = vmatmul.f32.gmra.mxu2 %v1985_v21  ;;  %1061 = vmatmul.f32.gmra.mxu0 %v1985_v21  ;;  %v1264_v21 = vld [vmem:[%s2755_s7 + $0x1a0] sm:$0xff] }
 0x15a   :  { %996 = vmatmul.f32.gmra.mxu3 %v1995_v42  ;;  %1126 = vmatmul.f32.gmra.mxu1 %v1995_v42 }
 0x15b   :  { %1486 = vmatpush.msrb.mxu1 %v1264_v21 }
 0x15c   :  { %v672_v48 = vpop.f32.mrf.mxu2 }
 0x15d   :  { %v673_v42 = vadd.f32 %v672_v48, %v2234_v43  ;;  %v737_v60 = vpop.f32.mrf.mxu3  ;;  %v1213_v48 = vld [vmem:[%s2755_s7 + $0x8] sm:$0xff] }
 0x15e   :  { %v2488_v57 = vpop.f32.mrf.mxu0  ;;  %1294 = vmatpush.msrb.mxu2 %v1213_v48  ;;  %v2530_v48 = vld [vmem:[%s2755_s7 + $0x110] sm:$0xff] }
 0x15f   :  { %2758 = vst [vmem:[#allocation8_spill] sm:$0xff] %v2488_v57  ;;  %v2490_v29 = vadd.f32 %v737_v60, %v673_v42  ;;  %v2492_v10 = vpop.f32.mrf.mxu1  ;;  %1423 = vmatpush.msrb.mxu0 %v2530_v48 }
 0x160   :  { %2759 = vst [vmem:[#allocation9_spill] sm:$0xff] %v2492_v10 }
 0x161   :  { %934 = vmatmul.f32.gmra.mxu2 %v1991_v36  ;;  %1064 = vmatmul.f32.gmra.mxu0 %v1991_v36  ;;  %v1263_v36 = vld [vmem:[%s2755_s7 + $0x198] sm:$0xff] }
 0x162   :  { %999 = vmatmul.f32.gmra.mxu3 %v2036_v34  ;;  %1129 = vmatmul.f32.gmra.mxu1 %v2036_v34 }
 0x163   :  { %1487 = vmatpush.msrb.mxu1 %v1263_v36 }
 0x164   :  { %v675_v21 = vpop.f32.mrf.mxu2 }
 0x165   :  { %v676_v34 = vadd.f32 %v675_v21, %v2234_v43  ;;  %v740_v42 = vpop.f32.mrf.mxu3  ;;  %v1212_v21 = vld [vmem:[%s2755_s7] sm:$0xff] }
 0x166   :  { %v2514_v60 = vpop.f32.mrf.mxu0  ;;  %1295 = vmatpush.msrb.mxu2 %v1212_v21  ;;  %v2561_v21 = vld [vmem:[%s2755_s7 + $0x108] sm:$0xff] }
 0x167   :  { %2760 = vst [vmem:[#allocation10_spill] sm:$0xff] %v2514_v60  ;;  %v2516_v10 = vadd.f32 %v740_v42, %v676_v34  ;;  %v2518_v57 = vpop.f32.mrf.mxu1  ;;  %1424 = vmatpush.msrb.mxu0 %v2561_v21 }
 0x168   :  { %2761 = vst [vmem:[#allocation11_spill] sm:$0xff] %v2518_v57  ;;  %1626 = vmatpush.msra.mxu2 %v2194_v3  ;;  %v1261_v3 = vld [vmem:[%s2755_s7 + $0x188] sm:$0xff] }
 0x169   :  { %937 = vmatmul.f32.gmra.mxu2 %v2031_v25  ;;  %1067 = vmatmul.f32.gmra.mxu0 %v2031_v25  ;;  %v1262_v25 = vld [vmem:[%s2755_s7 + $0x190] sm:$0xff] }
 0x16a   :  { %1002 = vmatmul.f32.gmra.mxu3 %v2065_v52  ;;  %1132 = vmatmul.f32.gmra.mxu1 %v2065_v52 }
 0x16b   :  { %1488 = vmatpush.msrb.mxu1 %v1262_v25  ;;  %1627 = vmatpush.msra.mxu2 %v2213_v13 }
 0x16c   :  { %v678_v36 = vpop.f32.mrf.mxu2 }
 0x16d   :  { %v679_v52 = vadd.f32 %v678_v36, %v2234_v43  ;;  %v743_v34 = vpop.f32.mrf.mxu3  ;;  %1489 = vmatpush.msrb.mxu1 %v1261_v3  ;;  %1628 = vmatpush.msra.mxu2 %v2244_v23  ;;  %v1244_v23 = vld [vmem:[%s2755_s7 + $0x100] sm:$0xff] }
 0x16e   :  { %v2540_v42 = vpop.f32.mrf.mxu0  ;;  %1425 = vmatpush.msrb.mxu0 %v1244_v23 }
 0x16f   :  { %v2543_v57 = vadd.f32 %v743_v34, %v679_v52  ;;  %v2545_v60 = vpop.f32.mrf.mxu1  ;;  %1629 = vmatpush.msra.mxu2 %v2270_v35 }
 0x171   :  { %940 = vmatmul.f32.gmra.mxu2 %v2061_v15  ;;  %1070 = vmatmul.f32.gmra.mxu0 %v2061_v15  ;;  %v1260_v15 = vld [vmem:[%s2755_s7 + $0x180] sm:$0xff] }
 0x172   :  { %1005 = vmatmul.f32.gmra.mxu3 %v2089_v16  ;;  %1135 = vmatmul.f32.gmra.mxu1 %v2089_v16 }
 0x173   :  { %1490 = vmatpush.msrb.mxu1 %v1260_v15  ;;  %1630 = vmatpush.msra.mxu2 %v2296_v59 }
 0x174   :  { %v681_v13 = vpop.f32.mrf.mxu2 }
 0x175   :  { %v682_v16 = vadd.f32 %v681_v13, %v2234_v43  ;;  %v746_v36 = vpop.f32.mrf.mxu3  ;;  %1631 = vmatpush.msra.mxu2 %v2322_v14 }
 0x176   :  { %v2569_v25 = vpop.f32.mrf.mxu0 }
 0x177   :  { %v2572_v52 = vadd.f32 %v746_v36, %v682_v16  ;;  %v2574_v34 = vpop.f32.mrf.mxu1  ;;  %1632 = vmatpush.msra.mxu2 %v2348_v22 }
 0x179   :  { %943 = vmatmul.f32.gmra.mxu2 %v2085_v55  ;;  %1073 = vmatmul.f32.gmra.mxu0 %v2085_v55 }
 0x17a   :  { %1008 = vmatmul.f32.gmra.mxu3 %v2113_v12  ;;  %1138 = vmatmul.f32.gmra.mxu1 %v2113_v12  ;;  %v2600_v12 = vperm.slane %v2229_v53, 1 }
 0x17b   :  { %1633 = vmatpush.msra.mxu2 %v2374_v38 }
 0x17c   :  { %v684_v35 = vpop.f32.mrf.mxu2 }
 0x17d   :  { %v685_v63 = vadd.f32 %v684_v35, %v2234_v43  ;;  %v749_v3 = vpop.f32.mrf.mxu3  ;;  %1634 = vmatpush.msra.mxu2 %v2400_v37  ;;  %v2618_v37 = vperm.slane %v2229_v53, 3 }
 0x17e   :  { %v2587_v59 = vpop.f32.mrf.mxu0 }
 0x17f   :  { %v2589_v55 = vadd.f32 %v749_v3, %v685_v63  ;;  %v2591_v13 = vpop.f32.mrf.mxu1  ;;  %1635 = vmatpush.msra.mxu2 %v2426_v51 }
 0x181   :  { %946 = vmatmul.f32.gmra.mxu2 %v2109_v4  ;;  %1076 = vmatmul.f32.gmra.mxu0 %v2109_v4 }
 0x182   :  { %1011 = vmatmul.f32.gmra.mxu3 %v2133_v41  ;;  %1141 = vmatmul.f32.gmra.mxu1 %v2133_v41  ;;  %v776_v41 = vadd.f32 %v2222_v54, %v2600_v12 }
 0x183   :  { %1636 = vmatpush.msra.mxu2 %v2452_v49 }
 0x184   :  { %v687_v14 = vpop.f32.mrf.mxu2  ;;  %v841_v51 = vadd.f32 %v2224_v28, %v776_v41  ;;  %v779_v28 = vadd.f32 %v2254_v9, %v2600_v12  ;;  %v1152_v9 = vmax.f32 %v2282_v45, 0.0 }
 0x185   :  { %v688_v22 = vadd.f32 %v687_v14, %v2234_v43  ;;  %v752_v15 = vpop.f32.mrf.mxu3  ;;  %1637 = vmatpush.msra.mxu2 %v2478_v19 }
 0x186   :  { %v2604_v38 = vpop.f32.mrf.mxu0  ;;  %v1149_v14 = vmax.f32 %v841_v51, 0.0 }
 0x187   :  { %v2606_v16 = vadd.f32 %v752_v15, %v688_v22  ;;  %v2608_v4 = vpop.f32.mrf.mxu1  ;;  %1638 = vmatpush.msra.mxu2 %v2504_v33  ;;  %v844_v33 = vadd.f32 %v2258_v7, %v779_v28 }
 0x189   :  { %949 = vmatmul.f32.gmra.mxu2 %v2131_v46  ;;  %1079 = vmatmul.f32.gmra.mxu0 %v2131_v46  ;;  %v1148_v46 = vmax.f32 %v2256_v32, 0.0 }
 0x18a   :  { %1014 = vmatmul.f32.gmra.mxu3 %v2147_v18  ;;  %1144 = vmatmul.f32.gmra.mxu1 %v2147_v18 }
 0x18b   :  { %1639 = vmatpush.msra.mxu2 %v2530_v48 }
 0x18c   :  { %v690_v36 = vpop.f32.mrf.mxu2 }
 0x18d   :  { %v691_v49 = vadd.f32 %v690_v36, %v2234_v43  ;;  %v755_v35 = vpop.f32.mrf.mxu3  ;;  %v2632_v43 = vperm.slane %v2229_v53, 2  ;;  %1640 = vmatpush.msra.mxu2 %v2561_v21  ;;  %v782_v21 = vadd.f32 %v2280_v40, %v2600_v12 }
 0x18e   :  { %v1035_v54 = vpop.f32.mrf.mxu0 }
 0x18f   :  { %v2625_v63 = vadd.f32 %v755_v35, %v691_v49  ;;  %v1036_v18 = vadd.f32 %v1035_v54, %v2618_v37  ;;  %v1100_v3 = vpop.f32.mrf.mxu1  ;;  %1641 = vmatpush.msra.mxu2 %v1244_v23  ;;  %v1153_v49 = vmax.f32 %v844_v33, 0.0  ;;  %v847_v23 = vadd.f32 %v2284_v47, %v782_v21 }
 0x190   :  { %v785_v33 = vadd.f32 %v2306_v8, %v2600_v12 }
 0x191   :  { %v1101_v19 = vadd.f32 %v1100_v3, %v1036_v18  ;;  %1296 = vmatmul.f32.vlgmr.msrb.gmra.mxu2 %v1148_v46 }
 0x192   :  { %1361 = vmatmul.f32.vlgmr.msrb.gmra.mxu3 %v1149_v14  ;;  %v1156_v14 = vmax.f32 %v2308_v5, 0.0 }
 0x193   :  { %v1151_v32 = vmax.f32 %v1101_v19, 0.0 }
 0x194   :  { %v905_v22 = vpop.f32.mrf.mxu2 }
 0x195   :  { %v906_v15 = vadd.f32 %v905_v22, %v2632_v43  ;;  %v970_v48 = vpop.f32.mrf.mxu3  ;;  %1491 = vmatmul.f32.vlgmr.msrb.gmra.mxu1 %v1151_v32  ;;  %v1157_v32 = vmax.f32 %v847_v23, 0.0 }
 0x196   :  { %v1038_v41 = vpop.f32.mrf.mxu0 }
 0x197   :  { %v971_v51 = vadd.f32 %v970_v48, %v906_v15  ;;  %v1039_v36 = vadd.f32 %v1038_v41, %v2618_v37  ;;  %v1103_v53 = vpop.f32.mrf.mxu1  ;;  %v850_v48 = vadd.f32 %v2310_v11, %v785_v33 }
 0x199   :  { %v1150_v35 = vmax.f32 %v971_v51, 0.0  ;;  %v1104_v54 = vadd.f32 %v1103_v53, %v1039_v36  ;;  %1299 = vmatmul.f32.gmra.mxu2 %v1152_v9  ;;  %v1160_v36 = vmax.f32 %v2334_v24, 0.0  ;;  %v1161_v21 = vmax.f32 %v850_v48, 0.0 }
 0x19a   :  { %1364 = vmatmul.f32.gmra.mxu3 %v1153_v49 }
 0x19b   :  { %v1155_v7 = vmax.f32 %v1104_v54, 0.0  ;;  %1426 = vmatmul.f32.vlgmr.msrb.gmra.mxu0 %v1150_v35  ;;  %v788_v35 = vadd.f32 %v2332_v20, %v2600_v12 }
 0x19c   :  { %v908_v46 = vpop.f32.mrf.mxu2 }
 0x19d   :  { %v909_v18 = vadd.f32 %v908_v46, %v2632_v43  ;;  %v973_v45 = vpop.f32.mrf.mxu3  ;;  %1494 = vmatmul.f32.gmra.mxu1 %v1155_v7  ;;  %v853_v23 = vadd.f32 %v2336_v27, %v788_v35 }
 0x19e   :  { %v1041_v3 = vpop.f32.mrf.mxu0 }
 0x19f   :  { %v974_v28 = vadd.f32 %v973_v45, %v909_v18  ;;  %v1042_v19 = vadd.f32 %v1041_v3, %v2618_v37  ;;  %v1106_v40 = vpop.f32.mrf.mxu1  ;;  %v1164_v3 = vmax.f32 %v2360_v50, 0.0 }
 0x1a1   :  { %v1154_v22 = vmax.f32 %v974_v28, 0.0  ;;  %v1107_v15 = vadd.f32 %v1106_v40, %v1042_v19  ;;  %1302 = vmatmul.f32.gmra.mxu2 %v1156_v14  ;;  %v1165_v19 = vmax.f32 %v853_v23, 0.0  ;;  %v791_v40 = vadd.f32 %v2358_v39, %v2600_v12 }
 0x1a2   :  { %1367 = vmatmul.f32.gmra.mxu3 %v1157_v32 }
 0x1a3   :  { %v1159_v47 = vmax.f32 %v1107_v15, 0.0  ;;  %1429 = vmatmul.f32.gmra.mxu0 %v1154_v22  ;;  %v856_v22 = vadd.f32 %v2362_v1, %v791_v40 }
 0x1a4   :  { %v911_v41 = vpop.f32.mrf.mxu2 }
 0x1a5   :  { %v912_v9 = vadd.f32 %v911_v41, %v2632_v43  ;;  %v976_v5 = vpop.f32.mrf.mxu3  ;;  %1497 = vmatmul.f32.gmra.mxu1 %v1159_v47  ;;  %v1168_v41 = vmax.f32 %v2386_v17, 0.0 }
 0x1a6   :  { %v1044_v51 = vpop.f32.mrf.mxu0 }
 0x1a7   :  { %v977_v53 = vadd.f32 %v976_v5, %v912_v9  ;;  %v1045_v49 = vadd.f32 %v1044_v51, %v2618_v37  ;;  %v1109_v8 = vpop.f32.mrf.mxu1  ;;  %v1169_v51 = vmax.f32 %v856_v22, 0.0 }
 0x1a9   :  { %v1158_v54 = vmax.f32 %v977_v53, 0.0  ;;  %v1110_v7 = vadd.f32 %v1109_v8, %v1045_v49  ;;  %1305 = vmatmul.f32.gmra.mxu2 %v1160_v36  ;;  %v794_v36 = vadd.f32 %v2384_v6, %v2600_v12 }
 0x1aa   :  { %1370 = vmatmul.f32.gmra.mxu3 %v1161_v21 }
 0x1ab   :  { %v1163_v11 = vmax.f32 %v1110_v7, 0.0  ;;  %1432 = vmatmul.f32.gmra.mxu0 %v1158_v54  ;;  %v859_v8 = vadd.f32 %v2388_v62, %v794_v36  ;;  %v1172_v7 = vmax.f32 %v2412_v30, 0.0  ;;  %v803_v36 = vadd.f32 %v2462_v2, %v2600_v12 }
 0x1ac   :  { %v914_v46 = vpop.f32.mrf.mxu2 }
 0x1ad   :  { %v915_v18 = vadd.f32 %v914_v46, %v2632_v43  ;;  %v979_v24 = vpop.f32.mrf.mxu3  ;;  %1500 = vmatmul.f32.gmra.mxu1 %v1163_v11  ;;  %v1173_v46 = vmax.f32 %v859_v8, 0.0 }
 0x1ae   :  { %v1047_v45 = vpop.f32.mrf.mxu0 }
 0x1af   :  { %v980_v14 = vadd.f32 %v979_v24, %v915_v18  ;;  %v1048_v28 = vadd.f32 %v1047_v45, %v2618_v37  ;;  %v1112_v20 = vpop.f32.mrf.mxu1  ;;  %v797_v18 = vadd.f32 %v2410_v26, %v2600_v12 }
 0x1b1   :  { %v1162_v32 = vmax.f32 %v980_v14, 0.0  ;;  %v1113_v33 = vadd.f32 %v1112_v20, %v1048_v28  ;;  %1308 = vmatmul.f32.gmra.mxu2 %v1164_v3  ;;  %v862_v3 = vadd.f32 %v2414_v0, %v797_v18 }
 0x1b2   :  { %1373 = vmatmul.f32.gmra.mxu3 %v1165_v19  ;;  %v1176_v19 = vmax.f32 %v2438_v44, 0.0 }
 0x1b3   :  { %v1167_v27 = vmax.f32 %v1113_v33, 0.0  ;;  %1435 = vmatmul.f32.gmra.mxu0 %v1162_v32  ;;  %v1177_v33 = vmax.f32 %v862_v3, 0.0 }
 0x1b4   :  { %v917_v15 = vpop.f32.mrf.mxu2 }
 0x1b5   :  { %v918_v47 = vadd.f32 %v917_v15, %v2632_v43  ;;  %v982_v50 = vpop.f32.mrf.mxu3  ;;  %1503 = vmatmul.f32.gmra.mxu1 %v1167_v27  ;;  %v800_v27 = vadd.f32 %v2436_v56, %v2600_v12 }
 0x1b6   :  { %v1050_v48 = vpop.f32.mrf.mxu0 }
 0x1b7   :  { %v983_v9 = vadd.f32 %v982_v50, %v918_v47  ;;  %v1051_v5 = vadd.f32 %v1050_v48, %v2618_v37  ;;  %v1115_v39 = vpop.f32.mrf.mxu1  ;;  %v865_v47 = vadd.f32 %v2440_v31, %v800_v27 }
 0x1b9   :  { %v1166_v53 = vmax.f32 %v983_v9, 0.0  ;;  %v1116_v49 = vadd.f32 %v1115_v39, %v1051_v5  ;;  %1311 = vmatmul.f32.gmra.mxu2 %v1168_v41  ;;  %v1180_v9 = vmax.f32 %v2464_v58, 0.0 }
 0x1ba   :  { %1376 = vmatmul.f32.gmra.mxu3 %v1169_v51  ;;  %v1181_v51 = vmax.f32 %v865_v47, 0.0 }
 0x1bb   :  { %v1171_v1 = vmax.f32 %v1116_v49, 0.0  ;;  %1438 = vmatmul.f32.gmra.mxu0 %v1166_v53 }
 0x1bc   :  { %v920_v21 = vpop.f32.mrf.mxu2 }
 0x1bd   :  { %v921_v35 = vadd.f32 %v920_v21, %v2632_v43  ;;  %v985_v17 = vpop.f32.mrf.mxu3  ;;  %1506 = vmatmul.f32.gmra.mxu1 %v1171_v1  ;;  %v868_v1 = vadd.f32 %v2466_v61, %v803_v36 }
 0x1be   :  { %v1053_v54 = vpop.f32.mrf.mxu0 }
 0x1bf   :  { %v986_v11 = vadd.f32 %v985_v17, %v921_v35  ;;  %v1054_v23 = vadd.f32 %v1053_v54, %v2618_v37  ;;  %v1118_v6 = vpop.f32.mrf.mxu1  ;;  %v1184_v17 = vmax.f32 %v2490_v29, 0.0 }
 0x1c1   :  { %v1170_v24 = vmax.f32 %v986_v11, 0.0  ;;  %v1119_v45 = vadd.f32 %v1118_v6, %v1054_v23  ;;  %1314 = vmatmul.f32.gmra.mxu2 %v1172_v7  ;;  %v1185_v11 = vmax.f32 %v868_v1, 0.0  ;;  %v2762_v23 = vld [vmem:[#allocation8_spill] sm:$0xff] }
 0x1c2   :  { %1379 = vmatmul.f32.gmra.mxu3 %v1173_v46  ;;  %v806_v6 = vadd.f32 %v2762_v23, %v2600_v12 }
 0x1c3   :  { %v1175_v62 = vmax.f32 %v1119_v45, 0.0  ;;  %1441 = vmatmul.f32.gmra.mxu0 %v1170_v24  ;;  %v2763_v24 = vld [vmem:[#allocation9_spill] sm:$0xff] }
 0x1c4   :  { %v923_v14 = vpop.f32.mrf.mxu2  ;;  %v871_v45 = vadd.f32 %v2763_v24, %v806_v6 }
 0x1c5   :  { %v924_v28 = vadd.f32 %v923_v14, %v2632_v43  ;;  %v988_v30 = vpop.f32.mrf.mxu3  ;;  %1509 = vmatmul.f32.gmra.mxu1 %v1175_v62 }
 0x1c6   :  { %v1056_v20 = vpop.f32.mrf.mxu0 }
 0x1c7   :  { %v989_v40 = vadd.f32 %v988_v30, %v924_v28  ;;  %v1057_v32 = vadd.f32 %v1056_v20, %v2618_v37  ;;  %v1121_v26 = vpop.f32.mrf.mxu1  ;;  %v1188_v28 = vmax.f32 %v2516_v10, 0.0 }
 0x1c9   :  { %v1174_v22 = vmax.f32 %v989_v40, 0.0  ;;  %v1122_v15 = vadd.f32 %v1121_v26, %v1057_v32  ;;  %1317 = vmatmul.f32.gmra.mxu2 %v1176_v19  ;;  %v1189_v40 = vmax.f32 %v871_v45, 0.0  ;;  %v2764_v32 = vld [vmem:[#allocation10_spill] sm:$0xff] }
 0x1ca   :  { %1382 = vmatmul.f32.gmra.mxu3 %v1177_v33  ;;  %v809_v26 = vadd.f32 %v2764_v32, %v2600_v12 }
 0x1cb   :  { %v1179_v0 = vmax.f32 %v1122_v15, 0.0  ;;  %1444 = vmatmul.f32.gmra.mxu0 %v1174_v22  ;;  %v2765_v15 = vld [vmem:[#allocation11_spill] sm:$0xff] }
 0x1cc   :  { %v926_v50 = vpop.f32.mrf.mxu2 }
 0x1cd   :  { %v927_v48 = vadd.f32 %v926_v50, %v2632_v43  ;;  %v991_v44 = vpop.f32.mrf.mxu3  ;;  %1512 = vmatmul.f32.gmra.mxu1 %v1179_v0  ;;  %v874_v0 = vadd.f32 %v2765_v15, %v809_v26 }
 0x1ce   :  { %v1059_v41 = vpop.f32.mrf.mxu0 }
 0x1cf   :  { %v992_v5 = vadd.f32 %v991_v44, %v927_v48  ;;  %v1060_v39 = vadd.f32 %v1059_v41, %v2618_v37  ;;  %v1124_v56 = vpop.f32.mrf.mxu1  ;;  %v1192_v44 = vmax.f32 %v2543_v57, 0.0 }
 0x1d1   :  { %v1178_v53 = vmax.f32 %v992_v5, 0.0  ;;  %v1125_v49 = vadd.f32 %v1124_v56, %v1060_v39  ;;  %1320 = vmatmul.f32.gmra.mxu2 %v1180_v9  ;;  %v1193_v39 = vmax.f32 %v874_v0, 0.0  ;;  %v812_v56 = vadd.f32 %v2540_v42, %v2600_v12 }
 0x1d2   :  { %1385 = vmatmul.f32.gmra.mxu3 %v1181_v51 }
 0x1d3   :  { %v1183_v31 = vmax.f32 %v1125_v49, 0.0  ;;  %1447 = vmatmul.f32.gmra.mxu0 %v1178_v53  ;;  %v877_v49 = vadd.f32 %v2545_v60, %v812_v56 }
 0x1d4   :  { %v929_v8 = vpop.f32.mrf.mxu2 }
 0x1d5   :  { %v930_v21 = vadd.f32 %v929_v8, %v2632_v43  ;;  %v994_v58 = vpop.f32.mrf.mxu3  ;;  %1515 = vmatmul.f32.gmra.mxu1 %v1183_v31 }
 0x1d6   :  { %v1062_v35 = vpop.f32.mrf.mxu0 }
 0x1d7   :  { %v995_v54 = vadd.f32 %v994_v58, %v930_v21  ;;  %v1063_v7 = vadd.f32 %v1062_v35, %v2618_v37  ;;  %v1127_v2 = vpop.f32.mrf.mxu1  ;;  %v1196_v21 = vmax.f32 %v2572_v52, 0.0 }
 0x1d9   :  { %v1182_v46 = vmax.f32 %v995_v54, 0.0  ;;  %v1128_v18 = vadd.f32 %v1127_v2, %v1063_v7  ;;  %1323 = vmatmul.f32.gmra.mxu2 %v1184_v17  ;;  %v1197_v17 = vmax.f32 %v877_v49, 0.0  ;;  %v815_v54 = vadd.f32 %v2569_v25, %v2600_v12 }
 0x1da   :  { %1388 = vmatmul.f32.gmra.mxu3 %v1185_v11 }
 0x1db   :  { %v1187_v61 = vmax.f32 %v1128_v18, 0.0  ;;  %1450 = vmatmul.f32.gmra.mxu0 %v1182_v46  ;;  %v880_v11 = vadd.f32 %v2574_v34, %v815_v54  ;;  %v1200_v18 = vmax.f32 %v2589_v55, 0.0 }
 0x1dc   :  { %v932_v62 = vpop.f32.mrf.mxu2 }
 0x1dd   :  { %v933_v3 = vadd.f32 %v932_v62, %v2632_v43  ;;  %v997_v29 = vpop.f32.mrf.mxu3  ;;  %1518 = vmatmul.f32.gmra.mxu1 %v1187_v61  ;;  %v1201_v45 = vmax.f32 %v880_v11, 0.0  ;;  %v818_v62 = vadd.f32 %v2587_v59, %v2600_v12 }
 0x1de   :  { %v1065_v14 = vpop.f32.mrf.mxu0 }
 0x1df   :  { %v998_v30 = vadd.f32 %v997_v29, %v933_v3  ;;  %v1066_v20 = vadd.f32 %v1065_v14, %v2618_v37  ;;  %v1130_v19 = vpop.f32.mrf.mxu1  ;;  %v883_v14 = vadd.f32 %v2591_v13, %v818_v62 }
 0x1e1   :  { %v1186_v33 = vmax.f32 %v998_v30, 0.0  ;;  %v1131_v27 = vadd.f32 %v1130_v19, %v1066_v20  ;;  %1326 = vmatmul.f32.gmra.mxu2 %v1188_v28  ;;  %v1204_v19 = vmax.f32 %v2606_v16, 0.0  ;;  %v1205_v26 = vmax.f32 %v883_v14, 0.0 }
 0x1e2   :  { %1391 = vmatmul.f32.gmra.mxu3 %v1189_v40 }
 0x1e3   :  { %v1191_v22 = vmax.f32 %v1131_v27, 0.0  ;;  %1453 = vmatmul.f32.gmra.mxu0 %v1186_v33  ;;  %v821_v33 = vadd.f32 %v2604_v38, %v2600_v12 }
 0x1e4   :  { %v935_v47 = vpop.f32.mrf.mxu2 }
 0x1e5   :  { %v936_v50 = vadd.f32 %v935_v47, %v2632_v43  ;;  %v1000_v10 = vpop.f32.mrf.mxu3  ;;  %1521 = vmatmul.f32.gmra.mxu1 %v1191_v22  ;;  %v886_v15 = vadd.f32 %v2608_v4, %v821_v33 }
 0x1e6   :  { %v1068_v48 = vpop.f32.mrf.mxu0 }
 0x1e7   :  { %v1001_v41 = vadd.f32 %v1000_v10, %v936_v50  ;;  %v1069_v9 = vadd.f32 %v1068_v48, %v2618_v37  ;;  %v1133_v5 = vpop.f32.mrf.mxu1  ;;  %v1208_v10 = vmax.f32 %v2625_v63, 0.0  ;;  %v1209_v12 = vmax.f32 %v886_v15, 0.0  ;;  %v2727_v63 = vld [vmem:[%s2756_s8] ss:$0 sm:$0xff]  ;;  %s1707_s8 = smov [#allocation5]  }
 0x1e8   :  { %s1578_s30 = sshll.u32 %s1707_s8, 4  ;;  %s1579_s30 = int_to_ptr.vmem [resolvable:$true] %s1578_s30 }
 0x1e9   :  { %v1190_v51 = vmax.f32 %v1001_v41, 0.0  ;;  %v1134_v36 = vadd.f32 %v1133_v5, %v1069_v9  ;;  %1329 = vmatmul.f32.gmra.mxu2 %v1192_v44 }
 0x1ea   :  { %1394 = vmatmul.f32.gmra.mxu3 %v1193_v39 }
 0x1eb   :  { %v1195_v53 = vmax.f32 %v1134_v36, 0.0  ;;  %1456 = vmatmul.f32.gmra.mxu0 %v1190_v51 }
 0x1ec   :  { %v938_v31 = vpop.f32.mrf.mxu2 }
 0x1ed   :  { %v939_v1 = vadd.f32 %v938_v31, %v2632_v43  ;;  %v1003_v57 = vpop.f32.mrf.mxu3  ;;  %1524 = vmatmul.f32.gmra.mxu1 %v1195_v53 }
 0x1ee   :  { %v1071_v8 = vpop.f32.mrf.mxu0 }
 0x1ef   :  { %v1004_v58 = vadd.f32 %v1003_v57, %v939_v1  ;;  %v1072_v35 = vadd.f32 %v1071_v8, %v2618_v37  ;;  %v1136_v42 = vpop.f32.mrf.mxu1 }
 0x1f1   :  { %v1194_v7 = vmax.f32 %v1004_v58, 0.0  ;;  %v1137_v2 = vadd.f32 %v1136_v42, %v1072_v35  ;;  %1332 = vmatmul.f32.gmra.mxu2 %v1196_v21 }
 0x1f2   :  { %1397 = vmatmul.f32.gmra.mxu3 %v1197_v17 }
 0x1f3   :  { %v1199_v60 = vmax.f32 %v1137_v2, 0.0  ;;  %1459 = vmatmul.f32.gmra.mxu0 %v1194_v7 }
 0x1f4   :  { %v941_v23 = vpop.f32.mrf.mxu2 }
 0x1f5   :  { %v942_v6 = vadd.f32 %v941_v23, %v2632_v43  ;;  %v1006_v52 = vpop.f32.mrf.mxu3  ;;  %1527 = vmatmul.f32.gmra.mxu1 %v1199_v60 }
 0x1f6   :  { %v1074_v46 = vpop.f32.mrf.mxu0 }
 0x1f7   :  { %v1007_v61 = vadd.f32 %v1006_v52, %v942_v6  ;;  %v1075_v24 = vadd.f32 %v1074_v46, %v2618_v37  ;;  %v1139_v25 = vpop.f32.mrf.mxu1 }
 0x1f9   :  { %v1198_v3 = vmax.f32 %v1007_v61, 0.0  ;;  %v1140_v29 = vadd.f32 %v1139_v25, %v1075_v24  ;;  %1335 = vmatmul.f32.gmra.mxu2 %v1200_v18 }
 0x1fa   :  { %1400 = vmatmul.f32.gmra.mxu3 %v1201_v45 }
 0x1fb   :  { %v1203_v34 = vmax.f32 %v1140_v29, 0.0  ;;  %1462 = vmatmul.f32.gmra.mxu0 %v1198_v3 }
 0x1fc   :  { %v944_v28 = vpop.f32.mrf.mxu2 }
 0x1fd   :  { %v945_v30 = vadd.f32 %v944_v28, %v2632_v43  ;;  %v1009_v55 = vpop.f32.mrf.mxu3  ;;  %1530 = vmatmul.f32.gmra.mxu1 %v1203_v34 }
 0x1fe   :  { %v1077_v20 = vpop.f32.mrf.mxu0 }
 0x1ff   :  { %v1010_v40 = vadd.f32 %v1009_v55, %v945_v30  ;;  %v1078_v32 = vadd.f32 %v1077_v20, %v2618_v37  ;;  %v1142_v59 = vpop.f32.mrf.mxu1 }
 0x201   :  { %v1202_v27 = vmax.f32 %v1010_v40, 0.0  ;;  %v1143_v22 = vadd.f32 %v1142_v59, %v1078_v32  ;;  %1338 = vmatmul.f32.gmra.mxu2 %v1204_v19 }
 0x202   :  { %1403 = vmatmul.f32.gmra.mxu3 %v1205_v26 }
 0x203   :  { %v1207_v13 = vmax.f32 %v1143_v22, 0.0  ;;  %1465 = vmatmul.f32.gmra.mxu0 %v1202_v27 }
 0x204   :  { %v947_v0 = vpop.f32.mrf.mxu2 }
 0x205   :  { %v948_v47 = vadd.f32 %v947_v0, %v2632_v43  ;;  %v1012_v16 = vpop.f32.mrf.mxu3  ;;  %1533 = vmatmul.f32.gmra.mxu1 %v1207_v13 }
 0x206   :  { %v1080_v50 = vpop.f32.mrf.mxu0 }
 0x207   :  { %v1013_v48 = vadd.f32 %v1012_v16, %v948_v47  ;;  %v1081_v44 = vadd.f32 %v1080_v50, %v2618_v37  ;;  %v1145_v38 = vpop.f32.mrf.mxu1 }
 0x209   :  { %v1206_v41 = vmax.f32 %v1013_v48, 0.0  ;;  %v1146_v9 = vadd.f32 %v1145_v38, %v1081_v44  ;;  %1341 = vmatmul.f32.gmra.mxu2 %v1208_v10 }
 0x20a   :  { %1406 = vmatmul.f32.gmra.mxu3 %v1209_v12 }
 0x20b   :  { %v1211_v5 = vmax.f32 %v1146_v9, 0.0  ;;  %1468 = vmatmul.f32.gmra.mxu0 %v1206_v41 }
 0x20c   :  { %v950_v4 = vpop.f32.mrf.mxu2 }
 0x20d   :  { %v951_v39 = vadd.f32 %v950_v4, %v2632_v43  ;;  %v1015_v56 = vpop.f32.mrf.mxu3  ;;  %1536 = vmatmul.f32.gmra.mxu1 %v1211_v5 }
 0x20f   :  { %v1016_v51 = vadd.f32 %v1015_v56, %v951_v39 }
 0x211   :  { %v1210_v36 = vmax.f32 %v1016_v51, 0.0 }
 0x212   :  { %v1492_v37 = vpop.f32.mrf.mxu1 }
 0x213   :  { %1471 = vmatmul.f32.vlgmr.msra.gmra.mxu2 %v1210_v36 }
 0x214   :  { %v1297_v53 = vpop.f32.mrf.mxu2 }
 0x215   :  { %v1298_v49 = vadd.f32 %v2727_v63, %v1297_v53  ;;  %v1362_v31 = vpop.f32.mrf.mxu3 }
 0x217   :  { %v1363_v1 = vadd.f32 %v1362_v31, %v1298_v49 }
 0x218   :  { %v1427_v57 = vpop.f32.mrf.mxu0 }
 0x219   :  { %v1428_v8 = vadd.f32 %v1427_v57, %v1363_v1 }
 0x21a   :  { %v1495_v21 = vpop.f32.mrf.mxu1 }
 0x21b   :  { %v1493_v43 = vadd.f32 %v1492_v37, %v1428_v8 }
 0x21c   :  { %v1300_v58 = vpop.f32.mrf.mxu2 }
 0x21d   :  { %v1301_v35 = vadd.f32 %v2727_v63, %v1300_v58  ;;  %v1365_v42 = vpop.f32.mrf.mxu3  ;;  %1540 = vxpose.xlu1.b32.start [1/16] (narrow) %v1493_v43, 8 }
 0x21f   :  { %v1366_v17 = vadd.f32 %v1365_v42, %v1301_v35 }
 0x220   :  { %v1430_v54 = vpop.f32.mrf.mxu0 }
 0x221   :  { %v1431_v7 = vadd.f32 %v1430_v54, %v1366_v17 }
 0x222   :  { %v1498_v2 = vpop.f32.mrf.mxu1 }
 0x223   :  { %v1496_v60 = vadd.f32 %v1495_v21, %v1431_v7 }
 0x224   :  { %v1303_v11 = vpop.f32.mrf.mxu2 }
 0x225   :  { %v1304_v23 = vadd.f32 %v2727_v63, %v1303_v11  ;;  %v1368_v6 = vpop.f32.mrf.mxu3  ;;  %1541 = vxpose.xlu1.b32.cont [2/16] (narrow) %v1496_v60, 8 }
 0x227   :  { %v1369_v52 = vadd.f32 %v1368_v6, %v1304_v23 }
 0x228   :  { %v1433_v46 = vpop.f32.mrf.mxu0 }
 0x229   :  { %v1434_v18 = vadd.f32 %v1433_v46, %v1369_v52 }
 0x22a   :  { %v1501_v61 = vpop.f32.mrf.mxu1 }
 0x22b   :  { %v1499_v24 = vadd.f32 %v1498_v2, %v1434_v18 }
 0x22c   :  { %v1306_v25 = vpop.f32.mrf.mxu2 }
 0x22d   :  { %v1307_v45 = vadd.f32 %v2727_v63, %v1306_v25  ;;  %v1371_v62 = vpop.f32.mrf.mxu3  ;;  %1542 = vxpose.xlu1.b32.cont [3/16] (narrow) %v1499_v24, 8 }
 0x22f   :  { %v1372_v3 = vadd.f32 %v1371_v62, %v1307_v45 }
 0x230   :  { %v1436_v29 = vpop.f32.mrf.mxu0 }
 0x231   :  { %v1437_v34 = vadd.f32 %v1436_v29, %v1372_v3 }
 0x232   :  { %v1504_v14 = vpop.f32.mrf.mxu1 }
 0x233   :  { %v1502_v28 = vadd.f32 %v1501_v61, %v1437_v34 }
 0x234   :  { %v1309_v30 = vpop.f32.mrf.mxu2 }
 0x235   :  { %v1310_v55 = vadd.f32 %v2727_v63, %v1309_v30  ;;  %v1374_v20 = vpop.f32.mrf.mxu3  ;;  %1543 = vxpose.xlu1.b32.cont [4/16] (narrow) %v1502_v28, 8 }
 0x237   :  { %v1375_v19 = vadd.f32 %v1374_v20, %v1310_v55 }
 0x238   :  { %v1439_v40 = vpop.f32.mrf.mxu0 }
 0x239   :  { %v1440_v32 = vadd.f32 %v1439_v40, %v1375_v19 }
 0x23a   :  { %v1507_v59 = vpop.f32.mrf.mxu1 }
 0x23b   :  { %v1505_v26 = vadd.f32 %v1504_v14, %v1440_v32 }
 0x23c   :  { %v1312_v33 = vpop.f32.mrf.mxu2 }
 0x23d   :  { %v1313_v27 = vadd.f32 %v2727_v63, %v1312_v33  ;;  %v1377_v22 = vpop.f32.mrf.mxu3  ;;  %1544 = vxpose.xlu1.b32.cont [5/16] (narrow) %v1505_v26, 8 }
 0x23f   :  { %v1378_v13 = vadd.f32 %v1377_v22, %v1313_v27 }
 0x240   :  { %v1442_v15 = vpop.f32.mrf.mxu0 }
 0x241   :  { %v1443_v0 = vadd.f32 %v1442_v15, %v1378_v13 }
 0x242   :  { %v1510_v47 = vpop.f32.mrf.mxu1 }
 0x243   :  { %v1508_v16 = vadd.f32 %v1507_v59, %v1443_v0 }
 0x244   :  { %v1315_v50 = vpop.f32.mrf.mxu2 }
 0x245   :  { %v1316_v10 = vadd.f32 %v2727_v63, %v1315_v50  ;;  %v1380_v48 = vpop.f32.mrf.mxu3  ;;  %1545 = vxpose.xlu1.b32.cont [6/16] (narrow) %v1508_v16, 8 }
 0x247   :  { %v1381_v44 = vadd.f32 %v1380_v48, %v1316_v10 }
 0x248   :  { %v1445_v12 = vpop.f32.mrf.mxu0 }
 0x249   :  { %v1446_v38 = vadd.f32 %v1445_v12, %v1381_v44 }
 0x24a   :  { %v1513_v41 = vpop.f32.mrf.mxu1 }
 0x24b   :  { %v1511_v9 = vadd.f32 %v1510_v47, %v1446_v38 }
 0x24c   :  { %v1318_v5 = vpop.f32.mrf.mxu2 }
 0x24d   :  { %v1319_v4 = vadd.f32 %v2727_v63, %v1318_v5  ;;  %v1383_v39 = vpop.f32.mrf.mxu3  ;;  %1546 = vxpose.xlu1.b32.cont [7/16] (narrow) %v1511_v9, 8 }
 0x24f   :  { %v1384_v56 = vadd.f32 %v1383_v39, %v1319_v4 }
 0x250   :  { %v1448_v51 = vpop.f32.mrf.mxu0 }
 0x251   :  { %v1449_v36 = vadd.f32 %v1448_v51, %v1384_v56 }
 0x252   :  { %v1516_v37 = vpop.f32.mrf.mxu1 }
 0x253   :  { %v1514_v53 = vadd.f32 %v1513_v41, %v1449_v36 }
 0x254   :  { %v1321_v49 = vpop.f32.mrf.mxu2 }
 0x255   :  { %v1322_v31 = vadd.f32 %v2727_v63, %v1321_v49  ;;  %v1386_v1 = vpop.f32.mrf.mxu3  ;;  %1547 = vxpose.xlu1.b32.cont [8/16] (narrow) %v1514_v53, 8 }
 0x257   :  { %v1387_v57 = vadd.f32 %v1386_v1, %v1322_v31 }
 0x258   :  { %v1451_v8 = vpop.f32.mrf.mxu0 }
 0x259   :  { %v1452_v21 = vadd.f32 %v1451_v8, %v1387_v57 }
 0x25a   :  { %v1519_v43 = vpop.f32.mrf.mxu1 }
 0x25b   :  { %v1517_v58 = vadd.f32 %v1516_v37, %v1452_v21 }
 0x25c   :  { %v1324_v35 = vpop.f32.mrf.mxu2 }
 0x25d   :  { %v1325_v42 = vadd.f32 %v2727_v63, %v1324_v35  ;;  %v1389_v17 = vpop.f32.mrf.mxu3  ;;  %1548 = vxpose.xlu1.b32.cont [9/16] (narrow) %v1517_v58, 8 }
 0x25f   :  { %v1390_v54 = vadd.f32 %v1389_v17, %v1325_v42 }
 0x260   :  { %v1454_v7 = vpop.f32.mrf.mxu0 }
 0x261   :  { %v1455_v2 = vadd.f32 %v1454_v7, %v1390_v54 }
 0x262   :  { %v1522_v60 = vpop.f32.mrf.mxu1 }
 0x263   :  { %v1520_v11 = vadd.f32 %v1519_v43, %v1455_v2 }
 0x264   :  { %v1327_v23 = vpop.f32.mrf.mxu2 }
 0x265   :  { %v1328_v6 = vadd.f32 %v2727_v63, %v1327_v23  ;;  %v1392_v52 = vpop.f32.mrf.mxu3  ;;  %1549 = vxpose.xlu1.b32.cont [10/16] (narrow) %v1520_v11, 8 }
 0x267   :  { %v1393_v46 = vadd.f32 %v1392_v52, %v1328_v6 }
 0x268   :  { %v1457_v18 = vpop.f32.mrf.mxu0 }
 0x269   :  { %v1458_v61 = vadd.f32 %v1457_v18, %v1393_v46 }
 0x26a   :  { %v1525_v25 = vpop.f32.mrf.mxu1 }
 0x26b   :  { %v1523_v24 = vadd.f32 %v1522_v60, %v1458_v61 }
 0x26c   :  { %v1330_v45 = vpop.f32.mrf.mxu2 }
 0x26d   :  { %v1331_v62 = vadd.f32 %v2727_v63, %v1330_v45  ;;  %v1395_v3 = vpop.f32.mrf.mxu3  ;;  %1550 = vxpose.xlu1.b32.cont [11/16] (narrow) %v1523_v24, 8 }
 0x26f   :  { %v1396_v29 = vadd.f32 %v1395_v3, %v1331_v62 }
 0x270   :  { %v1460_v34 = vpop.f32.mrf.mxu0 }
 0x271   :  { %v1461_v14 = vadd.f32 %v1460_v34, %v1396_v29 }
 0x272   :  { %v1528_v19 = vpop.f32.mrf.mxu1 }
 0x273   :  { %v1526_v28 = vadd.f32 %v1525_v25, %v1461_v14 }
 0x274   :  { %v1333_v30 = vpop.f32.mrf.mxu2 }
 0x275   :  { %v1334_v55 = vadd.f32 %v2727_v63, %v1333_v30  ;;  %v1398_v20 = vpop.f32.mrf.mxu3  ;;  %1551 = vxpose.xlu1.b32.cont [12/16] (narrow) %v1526_v28, 8 }
 0x277   :  { %v1399_v40 = vadd.f32 %v1398_v20, %v1334_v55 }
 0x278   :  { %v1463_v32 = vpop.f32.mrf.mxu0 }
 0x279   :  { %v1464_v59 = vadd.f32 %v1463_v32, %v1399_v40 }
 0x27a   :  { %v1531_v15 = vpop.f32.mrf.mxu1 }
 0x27b   :  { %v1529_v26 = vadd.f32 %v1528_v19, %v1464_v59 }
 0x27c   :  { %v1336_v33 = vpop.f32.mrf.mxu2 }
 0x27d   :  { %v1337_v27 = vadd.f32 %v2727_v63, %v1336_v33  ;;  %v1401_v22 = vpop.f32.mrf.mxu3  ;;  %1552 = vxpose.xlu1.b32.cont [13/16] (narrow) %v1529_v26, 8 }
 0x27f   :  { %v1402_v13 = vadd.f32 %v1401_v22, %v1337_v27 }
 0x280   :  { %v1466_v0 = vpop.f32.mrf.mxu0 }
 0x281   :  { %v1467_v47 = vadd.f32 %v1466_v0, %v1402_v13 }
 0x282   :  { %v1534_v41 = vpop.f32.mrf.mxu1 }
 0x283   :  { %v1532_v16 = vadd.f32 %v1531_v15, %v1467_v47 }
 0x284   :  { %v1339_v50 = vpop.f32.mrf.mxu2 }
 0x285   :  { %v1340_v10 = vadd.f32 %v2727_v63, %v1339_v50  ;;  %1553 = vxpose.xlu1.b32.cont [14/16] (narrow) %v1532_v16, 8  ;;  %v1404_v48 = vpop.f32.mrf.mxu3 }
 0x287   :  { %v1405_v44 = vadd.f32 %v1404_v48, %v1340_v10 }
 0x288   :  { %v1469_v12 = vpop.f32.mrf.mxu0 }
 0x289   :  { %v1470_v38 = vadd.f32 %v1469_v12, %v1405_v44 }
 0x28a   :  { %v1537_v37 = vpop.f32.mrf.mxu1 }
 0x28b   :  { %v1535_v9 = vadd.f32 %v1534_v41, %v1470_v38 }
 0x28c   :  { %v1342_v5 = vpop.f32.mrf.mxu2 }
 0x28d   :  { %1554 = vxpose.xlu1.b32.cont [15/16] (narrow) %v1535_v9, 8  ;;  %v1343_v4 = vadd.f32 %v2727_v63, %v1342_v5  ;;  %v1407_v39 = vpop.f32.mrf.mxu3 }
 0x28f   :  { %v1408_v56 = vadd.f32 %v1407_v39, %v1343_v4 }
 0x296   :  { %v1472_v51 = vpop.f32.mrf.mxu2 }
 0x297   :  { %v1473_v36 = vadd.f32 %v1472_v51, %v1408_v56 }
 0x299   :  { %v1538_v53 = vadd.f32 %v1537_v37, %v1473_v36 }
 0x29b   :  { %1555 = vxpose.xlu1.b32.end [16/16] (narrow) %v1538_v53, 8 }
 0x2c7   :  { %v1556_v49 = vpop.trf.xlu1 }
 0x2c8   :  { %1572 = vst [vmem:[#allocation5] sm:$0xff] %v1556_v49 }
 0x2c9   :  { %1583 = dma.vmem_to_hbm [thread:$0]  %s1579_s30, 128, %s1581_s11, [#allocation4]  }
 0x2ca   :  { %1701 = dma.done.wait [#allocation4], 128  }
 0x2cb   :  { %1702 = vsyncadd [#allocation4], 4294967168 }
 0x2cc   :  { %1588 = vsyncpa [#allocation3], 1 }
 0x2cd   :  { %1589 = vsyncpa [#allocation4], 1 }

// kernel: tpu_custom_call.1
= control target key start
LH: loop header
LB: loop body
LE: loop exit
PB: predicated region body
PF: predicated region fallthrough
CT: control target
= control target key end

     0   :  { %14 = vsyncpa [#allocation3], 0  ;;  %s2748_s0 = inlined_call_operand.vmem [shape: f32[128,17], index: 0, kind: input, shape index: {}]   ;;  %s2749_s1 = inlined_call_operand.vmem [shape: f32[16,256], index: 1, kind: input, shape index: {}]   ;;  %s2750_s2 = inlined_call_operand.vmem [shape: f32[1,256], index: 2, kind: input, shape index: {}]   ;;  %s2751_s3 = inlined_call_operand.vmem [shape: f32[1,256], index: 3, kind: input, shape index: {}]   ;;  %s2752_s4 = inlined_call_operand.vmem [shape: f32[1,256], index: 4, kind: input, shape index: {}]   ;;  %s2753_s5 = inlined_call_operand.hbm [shape: f32[256,512], index: 5, kind: input, shape index: {}]   ;;  %s2754_s6 = inlined_call_operand.vmem [shape: f32[1,512], index: 6, kind: input, shape index: {}]   ;;  %s2755_s7 = inlined_call_operand.vmem [shape: f32[512,8], index: 7, kind: input, shape index: {}]   ;;  %s2756_s8 = inlined_call_operand.vmem [shape: f32[1,8], index: 8, kind: input, shape index: {}]   ;;  %s2757_s9 = inlined_call_operand.hbm [shape: f32[8,128], index: 9, kind: output, shape index: {}]  }
   0x1   :  { %15 = vsyncpa [#allocation4], 0  ;;  %s30_s11 = sshll.u32 %s2753_s5, 4  ;;  %s1703_s12 = smov [#allocation2]   ;;  %s31_s11 = int_to_ptr.hbm [resolvable:$true] %s30_s11 }
   0x2   :  { %s32_s13 = sshll.u32 %s1703_s12, 4  ;;  %s1704_s14 = smov 512   ;;  %s33_s13 = int_to_ptr.vmem [resolvable:$true] %s32_s13 }
   0x3   :  { %s1705_s15 = smov 32  }
   0x4   :  { %38 = dma.hbm_to_vmem [thread:$0]  %s31_s11, 16384, %s33_s13, [#allocation3], %s1704_s14, %s1704_s14, %s1705_s15  }
   0x5   :  { %1699 = dma.done.wait [#allocation3], 16384  }
   0x6   :  { %1700 = vsyncadd [#allocation3], 4294950912  ;;  %v1706_v0 = vmov 16   ;;  %v67_v1 = vld [vmem:[%s2749_s1 + $0x10] sm:$0xff]  ;;  %v68_v2 = vld [vmem:[%s2749_s1 + $0x18] sm:$0xff]  ;;  %vm75_vm0 = vcmask 130048  }
   0x7   :  { %1648 = vset.pattern.permute.xlu1 %v1706_v0  ;;  %1647 = vset.pattern.permute.xlu0 %v1706_v0  ;;  %v51_v3 = vld [vmem:[%s2748_s0 + $0x10] sm:$0xff]  ;;  %v49_v4 = vld [vmem:[%s2748_s0] sm:$0xff]  ;;  %v66_v6 = vld [vmem:[%s2749_s1 + $0x8] sm:$0xff]  ;;  %s1580_s11 = sshll.u32 %s2757_s9, 4  ;;  %s1581_s11 = int_to_ptr.hbm [resolvable:$true] %s1580_s11 }
   0x8   :  { %1649 = vset.pattern.permute.xlu2 %v1706_v0  ;;  %138 = vmatpush.msra.mxu0 %v67_v1  ;;  %v65_v5 = vld [vmem:[%s2749_s1] sm:$0xff]  ;;  %v58_v7 = vld [vmem:[%s2748_s0 + $0x48] sm:$0xff]  ;;  %v52_v10 = vld [vmem:[%s2748_s0 + $0x18] sm:$0xff] }
   0x9   :  { %1622 = vmatpush.msra.mxu2 %v67_v1  ;;  %203 = vmatpush.msra.mxu1 %v68_v2  ;;  %v1785_v8 = vld [vmem:[%s2748_s0 + $0x40] sm:$0xff]  ;;  %v50_v11 = vld [vmem:[%s2748_s0 + $0x8] sm:$0xff]  ;;  %v59_v12 = vld [vmem:[%s2748_s0 + $0x50] sm:$0xff] }
   0xa   :  { %1624 = vmatpush.msra.mxu3 %v68_v2  ;;  %296 = vperm.xlu1 %1648, %v51_v3   ;;  %v53_v9 = vld [vmem:[%s2748_s0 + $0x20] sm:$0xff]  ;;  %v54_v13 = vld [vmem:[%s2748_s0 + $0x28] sm:$0xff]  ;;  %v1814_v14 = vld [vmem:[%s2748_s0 + $0x38] sm:$0xff] }
   0xb   :  { %288 = vperm.xlu0 %1647, %v49_v4   ;;  %139 = vmatpush.msra.mxu0 %v65_v5  ;;  %v1819_v15 = vld [vmem:[%s2748_s0 + $0x30] sm:$0xff]  ;;  %v60_v16 = vld [vmem:[%s2748_s0 + $0x58] sm:$0xff]  ;;  %v61_v17 = vld [vmem:[%s2748_s0 + $0x60] sm:$0xff] }
   0xc   :  { %1623 = vmatpush.msra.mxu2 %v65_v5  ;;  %204 = vmatpush.msra.mxu1 %v66_v6  ;;  %v62_v18 = vld [vmem:[%s2748_s0 + $0x68] sm:$0xff]  ;;  %v614_v19 = vld [vmem:[#allocation2 + $0x3e0] sm:$0xff]  ;;  %v63_v21 = vld [vmem:[%s2748_s0 + $0x70] sm:$0xff] }
   0xd   :  { %1625 = vmatpush.msra.mxu3 %v66_v6  ;;  %1590 = vmatmul.msk.f32.vlgmr.msra.gmra.mxu0 %vm75_vm0, %v49_v4  ;;  %v551_v20 = vld [vmem:[#allocation2 + $0x1e8] sm:$0xff]  ;;  %v610_v22 = vld [vmem:[#allocation2 + $0x3c0] sm:$0xff]  ;;  %v1851_v24 = vld [vmem:[%s2748_s0 + $0x78] sm:$0xff] }
   0xe   :  { %1599 = vmatmul.msk.f32.vlgmr.msra.gmra.mxu2 %vm75_vm0, %v58_v7  ;;  %1606 = vmatmul.msk.f32.vlgmr.msra.gmra.mxu1 %vm75_vm0, %v49_v4  ;;  %v550_v23 = vld [vmem:[#allocation2 + $0x1e0] sm:$0xff]  ;;  %v547_v25 = vld [vmem:[#allocation2 + $0x1c8] sm:$0xff] }
   0xf   :  { %1614 = vmatmul.msk.f32.vlgmr.msra.gmra.mxu3 %vm75_vm0, %v1785_v8  ;;  %304 = vperm.xlu2 %1649, %v53_v9   ;;  %v606_v26 = vld [vmem:[#allocation2 + $0x3a0] sm:$0xff]  ;;  %v615_v28 = vld [vmem:[#allocation2 + $0x3e8] sm:$0xff] }
  0x10   :  { %693 = vmatpush.msrb.mxu3 %v614_v19  ;;  %758 = vmatpush.msrb.mxu0 %v551_v20  ;;  %v546_v27 = vld [vmem:[#allocation2 + $0x1c0] sm:$0xff]  ;;  %v543_v29 = vld [vmem:[#allocation2 + $0x1a8] sm:$0xff] }
  0x11   :  { %628 = vmatpush.msrb.mxu2 %v550_v23  ;;  %823 = vmatpush.msrb.mxu1 %v615_v28  ;;  %v611_v30 = vld [vmem:[#allocation2 + $0x3c8] sm:$0xff]  ;;  %v602_v31 = vld [vmem:[#allocation2 + $0x380] sm:$0xff]  ;;  %v552_v23 = vld [vmem:[#allocation2 + $0x1f0] sm:$0xff] }
  0x12   :  { %300 = vperm.xlu1 %1648, %v52_v10   ;;  %694 = vmatpush.msrb.mxu3 %v610_v22  ;;  %v542_v32 = vld [vmem:[#allocation2 + $0x1a0] sm:$0xff]  ;;  %v539_v33 = vld [vmem:[#allocation2 + $0x188] sm:$0xff] }
  0x13   :  { %292 = vperm.xlu0 %1647, %v50_v11   ;;  %759 = vmatpush.msrb.mxu0 %v547_v25  ;;  %v607_v34 = vld [vmem:[#allocation2 + $0x3a8] sm:$0xff]  ;;  %v598_v35 = vld [vmem:[#allocation2 + $0x360] sm:$0xff] }
  0x14   :  { %695 = vmatpush.msrb.mxu3 %v606_v26  ;;  %629 = vmatpush.msrb.mxu2 %v546_v27  ;;  %v538_v36 = vld [vmem:[#allocation2 + $0x180] sm:$0xff]  ;;  %v535_v37 = vld [vmem:[#allocation2 + $0x168] sm:$0xff] }
  0x15   :  { %1591 = vmatmul.msk.f32.gmra.mxu0 %vm75_vm0, %v50_v11  ;;  %824 = vmatpush.msrb.mxu1 %v611_v30  ;;  %v603_v38 = vld [vmem:[#allocation2 + $0x388] sm:$0xff]  ;;  %v534_v39 = vld [vmem:[#allocation2 + $0x160] sm:$0xff] }
  0x16   :  { %1600 = vmatmul.msk.f32.gmra.mxu2 %vm75_vm0, %v59_v12  ;;  %1607 = vmatmul.msk.f32.gmra.mxu1 %vm75_vm0, %v50_v11  ;;  %v594_v40 = vld [vmem:[#allocation2 + $0x340] sm:$0xff]  ;;  %v531_v41 = vld [vmem:[#allocation2 + $0x148] sm:$0xff] }
  0x17   :  { %1615 = vmatmul.msk.f32.gmra.mxu3 %vm75_vm0, %v58_v7  ;;  %308 = vperm.xlu2 %1649, %v54_v13   ;;  %v599_v42 = vld [vmem:[#allocation2 + $0x368] sm:$0xff]  ;;  %v530_v43 = vld [vmem:[#allocation2 + $0x140] sm:$0xff] }
  0x18   :  { %760 = vmatpush.msrb.mxu0 %v543_v29  ;;  %696 = vmatpush.msrb.mxu3 %v602_v31  ;;  %v590_v44 = vld [vmem:[#allocation2 + $0x320] sm:$0xff]  ;;  %v527_v45 = vld [vmem:[#allocation2 + $0x128] sm:$0xff] }
  0x19   :  { %630 = vmatpush.msrb.mxu2 %v542_v32  ;;  %825 = vmatpush.msrb.mxu1 %v607_v34  ;;  %v595_v46 = vld [vmem:[#allocation2 + $0x348] sm:$0xff]  ;;  %v526_v47 = vld [vmem:[#allocation2 + $0x120] sm:$0xff] }
  0x1a   :  { %316 = vperm.xlu1 %1648, %v1814_v14   ;;  %761 = vmatpush.msrb.mxu0 %v539_v33  ;;  %v586_v48 = vld [vmem:[#allocation2 + $0x300] sm:$0xff]  ;;  %v523_v49 = vld [vmem:[#allocation2 + $0x108] sm:$0xff] }
  0x1b   :  { %312 = vperm.xlu0 %1647, %v1819_v15   ;;  %697 = vmatpush.msrb.mxu3 %v598_v35  ;;  %v591_v50 = vld [vmem:[#allocation2 + $0x328] sm:$0xff]  ;;  %v522_v51 = vld [vmem:[#allocation2 + $0x100] sm:$0xff] }
  0x1c   :  { %631 = vmatpush.msrb.mxu2 %v538_v36  ;;  %762 = vmatpush.msrb.mxu0 %v535_v37  ;;  %v582_v52 = vld [vmem:[#allocation2 + $0x2e0] sm:$0xff]  ;;  %v519_v53 = vld [vmem:[#allocation2 + $0xe8] sm:$0xff]  ;;  %v548_v36 = vld [vmem:[#allocation2 + $0x1d0] sm:$0xff] }
  0x1d   :  { %1592 = vmatmul.msk.f32.gmra.mxu0 %vm75_vm0, %v51_v3  ;;  %826 = vmatpush.msrb.mxu1 %v603_v38  ;;  %v518_v54 = vld [vmem:[#allocation2 + $0xe0] sm:$0xff]  ;;  %v587_v59 = vld [vmem:[#allocation2 + $0x308] sm:$0xff] }
  0x1e   :  { %1601 = vmatmul.msk.f32.gmra.mxu2 %vm75_vm0, %v60_v16  ;;  %1608 = vmatmul.msk.f32.gmra.mxu1 %vm75_vm0, %v51_v3  ;;  %v578_v55 = vld [vmem:[#allocation2 + $0x2c0] sm:$0xff]  ;;  %v515_v62 = vld [vmem:[#allocation2 + $0xc8] sm:$0xff] }
  0x1f   :  { %1616 = vmatmul.msk.f32.gmra.mxu3 %vm75_vm0, %v59_v12  ;;  %320 = vperm.xlu2 %1649, %v1785_v8   ;;  %v514_v56 = vld [vmem:[#allocation2 + $0xc0] sm:$0xff]  ;;  %v583_v63 = vld [vmem:[#allocation2 + $0x2e8] sm:$0xff] }
  0x20   :  { %632 = vmatpush.msrb.mxu2 %v534_v39  ;;  %698 = vmatpush.msrb.mxu3 %v594_v40  ;;  %v574_v57 = vld [vmem:[#allocation2 + $0x2a0] sm:$0xff]  ;;  %v511_v2 = vld [vmem:[#allocation2 + $0xa8] sm:$0xff]  ;;  %v612_v39 = vld [vmem:[#allocation2 + $0x3d0] sm:$0xff] }
  0x21   :  { %763 = vmatpush.msrb.mxu0 %v531_v41  ;;  %827 = vmatpush.msrb.mxu1 %v599_v42  ;;  %v510_v58 = vld [vmem:[#allocation2 + $0xa0] sm:$0xff]  ;;  %v579_v3 = vld [vmem:[#allocation2 + $0x2c8] sm:$0xff]  ;;  %v553_v41 = vld [vmem:[#allocation2 + $0x1f8] sm:$0xff] }
  0x22   :  { %328 = vperm.xlu1 %1648, %v59_v12   ;;  %633 = vmatpush.msrb.mxu2 %v530_v43  ;;  %v570_v60 = vld [vmem:[#allocation2 + $0x280] sm:$0xff]  ;;  %v575_v4 = vld [vmem:[#allocation2 + $0x2a8] sm:$0xff] }
  0x23   :  { %324 = vperm.xlu0 %1647, %v58_v7   ;;  %699 = vmatpush.msrb.mxu3 %v590_v44  ;;  %v506_v61 = vld [vmem:[#allocation2 + $0x80] sm:$0xff]  ;;  %v507_v5 = vld [vmem:[#allocation2 + $0x88] sm:$0xff] }
  0x24   :  { %764 = vmatpush.msrb.mxu0 %v527_v45  ;;  %828 = vmatpush.msrb.mxu1 %v595_v46  ;;  %v502_v0 = vld [vmem:[#allocation2 + $0x60] sm:$0xff]  ;;  %v571_v6 = vld [vmem:[#allocation2 + $0x288] sm:$0xff] }
  0x25   :  { %1593 = vmatmul.msk.f32.gmra.mxu0 %vm75_vm0, %v52_v10  ;;  %634 = vmatpush.msrb.mxu2 %v526_v47  ;;  %v566_v1 = vld [vmem:[#allocation2 + $0x260] sm:$0xff]  ;;  %v567_v11 = vld [vmem:[#allocation2 + $0x268] sm:$0xff] }
  0x26   :  { %1602 = vmatmul.msk.f32.gmra.mxu2 %vm75_vm0, %v61_v17  ;;  %1609 = vmatmul.msk.f32.gmra.mxu1 %vm75_vm0, %v52_v10  ;;  %v498_v7 = vld [vmem:[#allocation2 + $0x40] sm:$0xff]  ;;  %v503_v10 = vld [vmem:[#allocation2 + $0x68] sm:$0xff] }
  0x27   :  { %1617 = vmatmul.msk.f32.gmra.mxu3 %vm75_vm0, %v60_v16  ;;  %332 = vperm.xlu2 %1649, %v60_v16   ;;  %v499_v12 = vld [vmem:[#allocation2 + $0x48] sm:$0xff]  ;;  %v554_v19 = vld [vmem:[#allocation2 + $0x200] sm:$0xff] }
  0x28   :  { %700 = vmatpush.msrb.mxu3 %v586_v48  ;;  %765 = vmatpush.msrb.mxu0 %v523_v49  ;;  %v495_v16 = vld [vmem:[#allocation2 + $0x28] sm:$0xff]  ;;  %v286_v25 = vld [vmem:[%s2751_s3] sm:$0x3]  ;;  %v544_v49 = vld [vmem:[#allocation2 + $0x1b0] sm:$0xff] }
  0x29   :  { %829 = vmatpush.msrb.mxu1 %v591_v50  ;;  %635 = vmatpush.msrb.mxu2 %v522_v51  ;;  %v491_v20 = vld [vmem:[#allocation2 + $0x8] sm:$0xff]  ;;  %v388_v27 = vld [vmem:[%s2752_s4] sm:$0x3]  ;;  %v1883_v28 = vperm.slane %v286_v25, 0  ;;  %v1885_v29 = vperm.slane %v286_v25, 1  ;;  %v617_v50 = vld [vmem:[#allocation2 + $0x3f8] sm:$0xff] }
  0x2a   :  { %340 = vperm.xlu1 %1648, %v62_v18   ;;  %701 = vmatpush.msrb.mxu3 %v582_v52  ;;  %v1887_v32 = vperm.slane %v388_v27, 0  ;;  %v1889_v33 = vperm.slane %v388_v27, 1  ;;  %v69_v46 = vld [vmem:[%s2750_s2] sm:$0x3] }
  0x2b   :  { %336 = vperm.xlu0 %1647, %v61_v17   ;;  %766 = vmatpush.msrb.mxu0 %v519_v53  ;;  %v1910_v53 = vperm.slane %v69_v46, 0 }
  0x2c   :  { %636 = vmatpush.msrb.mxu2 %v518_v54  ;;  %702 = vmatpush.msrb.mxu3 %v578_v55  ;;  %v1912_v54 = vperm.slane %v69_v46, 1 }
  0x2d   :  { %1594 = vmatmul.msk.f32.gmra.mxu0 %vm75_vm0, %v53_v9  ;;  %830 = vmatpush.msrb.mxu1 %v587_v59 }
  0x2e   :  { %1603 = vmatmul.msk.f32.gmra.mxu2 %vm75_vm0, %v62_v18  ;;  %1610 = vmatmul.msk.f32.gmra.mxu1 %vm75_vm0, %v53_v9 }
  0x2f   :  { %1618 = vmatmul.msk.f32.gmra.mxu3 %vm75_vm0, %v61_v17  ;;  %344 = vperm.xlu2 %1649, %v63_v21   ;;  %v559_v17 = vld [vmem:[#allocation2 + $0x228] sm:$0xff] }
  0x30   :  { %637 = vmatpush.msrb.mxu2 %v514_v56  ;;  %703 = vmatpush.msrb.mxu3 %v574_v57  ;;  %v608_v57 = vld [vmem:[#allocation2 + $0x3b0] sm:$0xff] }
  0x31   :  { %767 = vmatpush.msrb.mxu0 %v515_v62  ;;  %831 = vmatpush.msrb.mxu1 %v583_v63 }
  0x32   :  { %638 = vmatpush.msrb.mxu2 %v510_v58  ;;  %704 = vmatpush.msrb.mxu3 %v570_v60  ;;  %v549_v58 = vld [vmem:[#allocation2 + $0x1d8] sm:$0xff] }
  0x33   :  { %348 = vperm.xlu0 %1647, %v1851_v24   ;;  %768 = vmatpush.msrb.mxu0 %v511_v2 }
  0x34   :  { %639 = vmatpush.msrb.mxu2 %v506_v61  ;;  %705 = vmatpush.msrb.mxu3 %v566_v1 }
  0x35   :  { %1595 = vmatmul.msk.f32.gmra.mxu0 %vm75_vm0, %v54_v13  ;;  %832 = vmatpush.msrb.mxu1 %v579_v3 }
  0x36   :  { %1604 = vmatmul.msk.f32.gmra.mxu2 %vm75_vm0, %v63_v21  ;;  %1611 = vmatmul.msk.f32.gmra.mxu1 %vm75_vm0, %v54_v13  ;;  %v563_v13 = vld [vmem:[#allocation2 + $0x248] sm:$0xff] }
  0x37   :  { %1619 = vmatmul.msk.f32.gmra.mxu3 %vm75_vm0, %v62_v18  ;;  %640 = vmatpush.msrb.mxu2 %v502_v0  ;;  %v490_v18 = vld [vmem:[#allocation2] sm:$0xff] }
  0x38   :  { %833 = vmatpush.msrb.mxu1 %v575_v4  ;;  %769 = vmatpush.msrb.mxu0 %v507_v5 }
  0x39   :  { %641 = vmatpush.msrb.mxu2 %v498_v7 }
  0x3a   :  { %834 = vmatpush.msrb.mxu1 %v571_v6  ;;  %770 = vmatpush.msrb.mxu0 %v503_v10 }
  0x3c   :  { %835 = vmatpush.msrb.mxu1 %v567_v11  ;;  %771 = vmatpush.msrb.mxu0 %v499_v12 }
  0x3d   :  { %1596 = vmatmul.msk.f32.gmra.mxu0 %vm75_vm0, %v1819_v15 }
  0x3e   :  { %1605 = vmatmul.msk.f32.gmra.mxu2 %vm75_vm0, %v1851_v24  ;;  %1612 = vmatmul.msk.f32.gmra.mxu1 %vm75_vm0, %v1819_v15  ;;  %v558_v15 = vld [vmem:[#allocation2 + $0x220] sm:$0xff] }
  0x3f   :  { %1620 = vmatmul.msk.f32.gmra.mxu3 %vm75_vm0, %v63_v21  ;;  %836 = vmatpush.msrb.mxu1 %v563_v13  ;;  %v555_v21 = vld [vmem:[#allocation2 + $0x208] sm:$0xff]  ;;  %v540_v13 = vld [vmem:[#allocation2 + $0x190] sm:$0xff] }
  0x40   :  { %772 = vmatpush.msrb.mxu0 %v495_v16 }
  0x41   :  { %837 = vmatpush.msrb.mxu1 %v559_v17 }
  0x42   :  { %773 = vmatpush.msrb.mxu0 %v491_v20 }
  0x43   :  { %838 = vmatpush.msrb.mxu1 %v555_v21 }
  0x44   :  { %1018 = vmatpush.msra.mxu0 %v553_v41 }
  0x45   :  { %1597 = vmatmul.msk.f32.gmra.mxu0 %vm75_vm0, %v1814_v14  ;;  %1083 = vmatpush.msra.mxu1 %v617_v50 }
  0x46   :  { %1613 = vmatmul.msk.f32.gmra.mxu1 %vm75_vm0, %v1814_v14  ;;  %v494_v14 = vld [vmem:[#allocation2 + $0x20] sm:$0xff]  ;;  %1019 = vmatpush.msra.mxu0 %v549_v58  ;;  %v536_v58 = vld [vmem:[#allocation2 + $0x170] sm:$0xff] }
  0x47   :  { %1621 = vmatmul.msk.f32.gmra.mxu3 %vm75_vm0, %v1851_v24  ;;  %642 = vmatpush.msrb.mxu2 %v494_v14  ;;  %v616_v24 = vld [vmem:[#allocation2 + $0x3f0] sm:$0xff]  ;;  %v613_v14 = vld [vmem:[#allocation2 + $0x3d8] sm:$0xff] }
  0x48   :  { %1084 = vmatpush.msra.mxu1 %v613_v14 }
  0x49   :  { %643 = vmatpush.msrb.mxu2 %v490_v18 }
  0x4b   :  { %888 = vmatpush.msra.mxu2 %v552_v23  ;;  %v604_v23 = vld [vmem:[#allocation2 + $0x390] sm:$0xff] }
  0x4d   :  { %1598 = vmatmul.msk.f32.gmra.mxu0 %vm75_vm0, %v1785_v8  ;;  %v562_v8 = vld [vmem:[#allocation2 + $0x240] sm:$0xff]  ;;  %889 = vmatpush.msra.mxu2 %v548_v36 }
  0x4e   :  { %706 = vmatpush.msrb.mxu3 %v562_v8 }
  0x4f   :  { %890 = vmatpush.msra.mxu2 %v544_v49 }
  0x50   :  { %707 = vmatpush.msrb.mxu3 %v558_v15 }
  0x51   :  { %891 = vmatpush.msra.mxu2 %v540_v13 }
  0x52   :  { %708 = vmatpush.msrb.mxu3 %v554_v19 }
  0x53   :  { %892 = vmatpush.msra.mxu2 %v536_v58 }
  0x54   :  { %953 = vmatpush.msra.mxu3 %v616_v24  ;;  %v545_v24 = vld [vmem:[#allocation2 + $0x1b8] sm:$0xff] }
  0x55   :  { %1020 = vmatpush.msra.mxu0 %v545_v24 }
  0x56   :  { %954 = vmatpush.msra.mxu3 %v612_v39 }
  0x58   :  { %955 = vmatpush.msra.mxu3 %v608_v57 }
  0x5a   :  { %956 = vmatpush.msra.mxu3 %v604_v23 }
  0x69   :  { %v1873_v9 = vpop.permute.xlu2 %304 }
  0x71   :  { %v1875_v22 = vpop.permute.xlu2 %308 }
  0x79   :  { %v321_v26 = vpop.permute.xlu2 %320 }
  0x7a   :  { %v372_v34 = vmul.f32 %v1883_v28, %v321_v26  ;;  %v373_v35 = vmul.f32 %v1885_v29, %v321_v26 }
  0x7c   :  { %v297_v30 = vpop.permute.xlu1 %296  ;;  %v1894_v37 = vadd.f32 %v1887_v32, %v372_v34  ;;  %v1897_v38 = vadd.f32 %v1889_v33, %v373_v35 }
  0x7d   :  { %v289_v31 = vpop.permute.xlu0 %288  ;;  %v360_v15 = vmul.f32 %v1883_v28, %v297_v30  ;;  %v361_v16 = vmul.f32 %v1885_v29, %v297_v30 }
  0x7e   :  { %v356_v42 = vmul.f32 %v1883_v28, %v289_v31  ;;  %v357_v43 = vmul.f32 %v1885_v29, %v289_v31  ;;  %v443_v31 = vmax.f32 %v1897_v38, 0.0 }
  0x7f   :  { %v1952_v34 = vadd.f32 %v1887_v32, %v360_v15  ;;  %v1955_v35 = vadd.f32 %v1889_v33, %v361_v16 }
  0x80   :  { %v394_v51 = vadd.f32 %v1887_v32, %v356_v42  ;;  %v395_v52 = vadd.f32 %v1889_v33, %v357_v43 }
  0x81   :  { %v333_v40 = vpop.permute.xlu2 %332  ;;  %v430_v14 = vmax.f32 %v1952_v34, 0.0  ;;  %v431_v15 = vmax.f32 %v1955_v35, 0.0 }
  0x82   :  { %v378_v47 = vmul.f32 %v1883_v28, %v333_v40  ;;  %v379_v48 = vmul.f32 %v1885_v29, %v333_v40  ;;  %v426_v63 = vmax.f32 %v394_v51, 0.0  ;;  %v427_v0 = vmax.f32 %v395_v52, 0.0 }
  0x84   :  { %v1901_v44 = vpop.permute.xlu1 %300  ;;  %v1915_v55 = vadd.f32 %v1887_v32, %v378_v47  ;;  %v1918_v56 = vadd.f32 %v1889_v33, %v379_v48 }
  0x85   :  { %v293_v45 = vpop.permute.xlu0 %292 }
  0x86   :  { %v358_v1 = vmul.f32 %v1883_v28, %v293_v45  ;;  %v359_v4 = vmul.f32 %v1885_v29, %v293_v45 }
  0x88   :  { %v396_v18 = vadd.f32 %v1887_v32, %v358_v1  ;;  %v397_v19 = vadd.f32 %v1889_v33, %v359_v4  ;;  %v541_v4 = vld [vmem:[#allocation2 + $0x198] sm:$0xff] }
  0x89   :  { %v345_v59 = vpop.permute.xlu2 %344  ;;  %1021 = vmatpush.msra.mxu0 %v541_v4 }
  0x8a   :  { %v141_v60 = vpop.f32.mrf.mxu0  ;;  %v384_v61 = vmul.f32 %v1883_v28, %v345_v59  ;;  %v385_v62 = vmul.f32 %v1885_v29, %v345_v59  ;;  %v428_v40 = vmax.f32 %v396_v18, 0.0  ;;  %v429_v41 = vmax.f32 %v397_v19, 0.0  ;;  %v609_v59 = vld [vmem:[#allocation2 + $0x3b8] sm:$0xff] }
  0x8b   :  { %v142_v2 = vadd.f32 %v141_v60, %v1910_v53  ;;  %v206_v3 = vpop.f32.mrf.mxu1  ;;  %1085 = vmatpush.msra.mxu1 %v609_v59  ;;  %v362_v19 = vmul.f32 %v1883_v28, %v1901_v44 }
  0x8c   :  { %v207_v5 = vadd.f32 %v206_v3, %v1912_v54  ;;  %v1926_v6 = vpop.permute.xlu1 %316  ;;  %v1931_v8 = vadd.f32 %v1887_v32, %v384_v61  ;;  %v1934_v10 = vadd.f32 %v1889_v33, %v385_v62  ;;  %v600_v3 = vld [vmem:[#allocation2 + $0x370] sm:$0xff] }
  0x8d   :  { %v1928_v7 = vpop.permute.xlu0 %312  ;;  %v254_v11 = vmax.f32 %v142_v2, 0.0  ;;  %957 = vmatpush.msra.mxu3 %v600_v3  ;;  %v448_v3 = vmax.f32 %v1915_v55, 0.0 }
  0x8e   :  { %v255_v12 = vmax.f32 %v207_v5, 0.0 }
  0x8f   :  { %v1938_v17 = vmul.f32 %v426_v63, %v254_v11 }
  0x90   :  { %v1942_v20 = vmul.f32 %v427_v0, %v255_v12 }
  0x91   :  { %v168_v21 = vpop.f32.mrf.mxu2  ;;  %644 = vmatmul.f32.vlgmr.msrb.gmra.mxu2 %v1938_v17  ;;  %774 = vmatmul.f32.vlgmr.msrb.gmra.mxu0 %v1938_v17 }
  0x92   :  { %v230_v25 = vpop.f32.mrf.mxu3  ;;  %v169_v26 = vadd.f32 %v168_v21, %v1910_v53  ;;  %709 = vmatmul.f32.vlgmr.msrb.gmra.mxu3 %v1942_v20  ;;  %839 = vmatmul.f32.vlgmr.msrb.gmra.mxu1 %v1942_v20  ;;  %v144_v30 = vpop.f32.mrf.mxu0 }
  0x93   :  { %v231_v27 = vadd.f32 %v230_v25, %v1912_v54  ;;  %v145_v36 = vadd.f32 %v144_v30, %v1910_v53  ;;  %v209_v39 = vpop.f32.mrf.mxu1 }
  0x94   :  { %v210_v43 = vadd.f32 %v209_v39, %v1912_v54  ;;  %v329_v45 = vpop.permute.xlu1 %328  ;;  %v272_v50 = vmax.f32 %v169_v26, 0.0  ;;  %v363_v26 = vmul.f32 %v1885_v29, %v1901_v44 }
  0x95   :  { %v271_v42 = vmax.f32 %v231_v27, 0.0  ;;  %v325_v46 = vpop.permute.xlu0 %324  ;;  %v256_v47 = vmax.f32 %v145_v36, 0.0  ;;  %v376_v38 = vmul.f32 %v1883_v28, %v329_v45  ;;  %v377_v48 = vmul.f32 %v1885_v29, %v329_v45 }
  0x96   :  { %v374_v49 = vmul.f32 %v1883_v28, %v325_v46  ;;  %v257_v51 = vmax.f32 %v210_v43, 0.0  ;;  %v375_v52 = vmul.f32 %v1885_v29, %v325_v46  ;;  %v532_v46 = vld [vmem:[#allocation2 + $0x150] sm:$0xff]  ;;  %v401_v4 = vadd.f32 %v1889_v33, %v363_v26 }
  0x97   :  { %v1963_v57 = vmul.f32 %v443_v31, %v271_v42  ;;  %v1965_v60 = vmul.f32 %v428_v40, %v256_v47  ;;  %v414_v61 = vadd.f32 %v1887_v32, %v376_v38  ;;  %v1969_v62 = vadd.f32 %v1889_v33, %v377_v48  ;;  %v605_v47 = vld [vmem:[#allocation2 + $0x398] sm:$0xff]  ;;  %893 = vmatpush.msra.mxu2 %v532_v46 }
  0x98   :  { %v412_v63 = vadd.f32 %v1887_v32, %v374_v49  ;;  %v1972_v0 = vmul.f32 %v429_v41, %v257_v51  ;;  %v413_v1 = vadd.f32 %v1889_v33, %v375_v52  ;;  %1086 = vmatpush.msra.mxu1 %v605_v47  ;;  %v592_v47 = vld [vmem:[#allocation2 + $0x330] sm:$0xff] }
  0x99   :  { %v171_v2 = vpop.f32.mrf.mxu2  ;;  %v446_v5 = vmax.f32 %v414_v61, 0.0  ;;  %647 = vmatmul.f32.gmra.mxu2 %v1965_v60  ;;  %777 = vmatmul.f32.gmra.mxu0 %v1965_v60  ;;  %v596_v61 = vld [vmem:[#allocation2 + $0x350] sm:$0xff] }
  0x9a   :  { %v444_v11 = vmax.f32 %v412_v63, 0.0  ;;  %v172_v12 = vadd.f32 %v171_v2, %v1910_v53  ;;  %v233_v13 = vpop.f32.mrf.mxu3  ;;  %712 = vmatmul.f32.gmra.mxu3 %v1972_v0  ;;  %842 = vmatmul.f32.gmra.mxu1 %v1972_v0  ;;  %v147_v18 = vpop.f32.mrf.mxu0  ;;  %v445_v27 = vmax.f32 %v413_v1, 0.0  ;;  %v537_v63 = vld [vmem:[#allocation2 + $0x178] sm:$0xff] }
  0x9b   :  { %v234_v16 = vadd.f32 %v233_v13, %v1912_v54  ;;  %v148_v24 = vadd.f32 %v147_v18, %v1910_v53  ;;  %v212_v25 = vpop.f32.mrf.mxu1  ;;  %v365_v13 = vmul.f32 %v1885_v29, %v1873_v9  ;;  %958 = vmatpush.msra.mxu3 %v596_v61  ;;  %1022 = vmatpush.msra.mxu0 %v537_v63  ;;  %v447_v18 = vmax.f32 %v1969_v62, 0.0 }
  0x9c   :  { %v1985_v21 = vmul.f32 %v444_v11, %v272_v50  ;;  %v274_v23 = vmax.f32 %v172_v12, 0.0  ;;  %v213_v31 = vadd.f32 %v212_v25, %v1912_v54  ;;  %v341_v34 = vpop.permute.xlu1 %340  ;;  %v400_v50 = vadd.f32 %v1887_v32, %v362_v19 }
  0x9d   :  { %v273_v30 = vmax.f32 %v234_v16, 0.0  ;;  %v337_v35 = vpop.permute.xlu0 %336  ;;  %v258_v39 = vmax.f32 %v148_v24, 0.0  ;;  %v382_v40 = vmul.f32 %v1883_v28, %v341_v34  ;;  %v383_v41 = vmul.f32 %v1885_v29, %v341_v34  ;;  %959 = vmatpush.msra.mxu3 %v592_v47  ;;  %v520_v47 = vld [vmem:[#allocation2 + $0xf0] sm:$0xff] }
  0x9e   :  { %v1991_v36 = vmul.f32 %v446_v5, %v274_v23  ;;  %v259_v43 = vmax.f32 %v213_v31, 0.0  ;;  %v380_v45 = vmul.f32 %v1883_v28, %v337_v35  ;;  %v381_v44 = vmul.f32 %v1885_v29, %v337_v35 }
  0x9f   :  { %v1995_v42 = vmul.f32 %v445_v27, %v273_v30  ;;  %v1999_v38 = vmul.f32 %v430_v14, %v258_v39  ;;  %v2002_v48 = vadd.f32 %v1887_v32, %v382_v40  ;;  %v2005_v49 = vadd.f32 %v1889_v33, %v383_v41  ;;  %v528_v39 = vld [vmem:[#allocation2 + $0x130] sm:$0xff]  ;;  %v601_v40 = vld [vmem:[#allocation2 + $0x378] sm:$0xff] }
  0xa0   :  { %v2008_v51 = vmul.f32 %v431_v15, %v259_v43  ;;  %v2011_v52 = vadd.f32 %v1887_v32, %v380_v45  ;;  %v2014_v58 = vadd.f32 %v1889_v33, %v381_v44  ;;  %v364_v5 = vmul.f32 %v1883_v28, %v1873_v9  ;;  %894 = vmatpush.msra.mxu2 %v528_v39 }
  0xa1   :  { %v174_v59 = vpop.f32.mrf.mxu2  ;;  %650 = vmatmul.f32.gmra.mxu2 %v1999_v38  ;;  %780 = vmatmul.f32.gmra.mxu0 %v1999_v38  ;;  %v432_v16 = vmax.f32 %v400_v50, 0.0  ;;  %v433_v30 = vmax.f32 %v401_v4, 0.0  ;;  %v403_v45 = vadd.f32 %v1889_v33, %v365_v13  ;;  %v533_v50 = vld [vmem:[#allocation2 + $0x158] sm:$0xff]  ;;  %v449_v63 = vmax.f32 %v1918_v56, 0.0 }
  0xa2   :  { %v175_v1 = vadd.f32 %v174_v59, %v1910_v53  ;;  %v236_v2 = vpop.f32.mrf.mxu3  ;;  %715 = vmatmul.f32.gmra.mxu3 %v2008_v51  ;;  %845 = vmatmul.f32.gmra.mxu1 %v2008_v51  ;;  %v150_v12 = vpop.f32.mrf.mxu0  ;;  %v402_v31 = vadd.f32 %v1887_v32, %v364_v5  ;;  %v450_v4 = vmax.f32 %v2011_v52, 0.0 }
  0xa3   :  { %v237_v11 = vadd.f32 %v236_v2, %v1912_v54  ;;  %v151_v14 = vadd.f32 %v150_v12, %v1910_v53  ;;  %v215_v15 = vpop.f32.mrf.mxu1  ;;  %1087 = vmatpush.msra.mxu1 %v601_v40  ;;  %1023 = vmatpush.msra.mxu0 %v533_v50  ;;  %v435_v13 = vmax.f32 %v403_v45, 0.0  ;;  %v593_v50 = vld [vmem:[#allocation2 + $0x338] sm:$0xff] }
  0xa4   :  { %v276_v55 = vmax.f32 %v175_v1, 0.0  ;;  %v216_v23 = vadd.f32 %v215_v15, %v1912_v54 }
  0xa5   :  { %v275_v19 = vmax.f32 %v237_v11, 0.0  ;;  %v349_v24 = vpop.permute.xlu0 %348  ;;  %v260_v26 = vmax.f32 %v151_v14, 0.0  ;;  %v366_v14 = vmul.f32 %v1883_v28, %v1875_v22 }
  0xa6   :  { %v2031_v25 = vmul.f32 %v448_v3, %v276_v55  ;;  %v386_v27 = vmul.f32 %v1883_v28, %v349_v24  ;;  %v387_v9 = vmul.f32 %v1885_v29, %v349_v24  ;;  %v261_v35 = vmax.f32 %v216_v23, 0.0  ;;  %v524_v23 = vld [vmem:[#allocation2 + $0x110] sm:$0xff]  ;;  %v597_v24 = vld [vmem:[#allocation2 + $0x358] sm:$0xff] }
  0xa7   :  { %v2036_v34 = vmul.f32 %v447_v18, %v275_v19  ;;  %v2038_v62 = vmul.f32 %v432_v16, %v260_v26  ;;  %v434_v3 = vmax.f32 %v402_v31, 0.0  ;;  %v367_v18 = vmul.f32 %v1885_v29, %v1875_v22  ;;  %895 = vmatpush.msra.mxu2 %v524_v23  ;;  %1088 = vmatpush.msra.mxu1 %v597_v24 }
  0xa8   :  { %v2041_v41 = vadd.f32 %v1887_v32, %v386_v27  ;;  %v2044_v43 = vadd.f32 %v1889_v33, %v387_v9  ;;  %v2047_v44 = vmul.f32 %v433_v30, %v261_v35  ;;  %v588_v27 = vld [vmem:[#allocation2 + $0x310] sm:$0xff]  ;;  %v529_v9 = vld [vmem:[#allocation2 + $0x138] sm:$0xff]  ;;  %v404_v35 = vadd.f32 %v1887_v32, %v366_v14 }
  0xa9   :  { %v177_v46 = vpop.f32.mrf.mxu2  ;;  %653 = vmatmul.f32.gmra.mxu2 %v2038_v62  ;;  %783 = vmatmul.f32.gmra.mxu0 %v2038_v62  ;;  %v405_v40 = vadd.f32 %v1889_v33, %v367_v18 }
  0xaa   :  { %v178_v59 = vadd.f32 %v177_v46, %v1910_v53  ;;  %v239_v61 = vpop.f32.mrf.mxu3  ;;  %718 = vmatmul.f32.gmra.mxu3 %v2047_v44  ;;  %848 = vmatmul.f32.gmra.mxu1 %v2047_v44  ;;  %v153_v2 = vpop.f32.mrf.mxu0 }
  0xab   :  { %v240_v1 = vadd.f32 %v239_v61, %v1912_v54  ;;  %v154_v11 = vadd.f32 %v153_v2, %v1910_v53  ;;  %v218_v12 = vpop.f32.mrf.mxu1  ;;  %960 = vmatpush.msra.mxu3 %v588_v27  ;;  %1024 = vmatpush.msra.mxu0 %v529_v9  ;;  %v452_v61 = vmax.f32 %v2002_v48, 0.0  ;;  %v437_v14 = vmax.f32 %v405_v40, 0.0  ;;  %v580_v40 = vld [vmem:[#allocation2 + $0x2d0] sm:$0xff] }
  0xac   :  { %v278_v5 = vmax.f32 %v178_v59, 0.0  ;;  %v219_v56 = vadd.f32 %v218_v12, %v1912_v54  ;;  %v584_v59 = vld [vmem:[#allocation2 + $0x2f0] sm:$0xff]  ;;  %896 = vmatpush.msra.mxu2 %v520_v47  ;;  %1089 = vmatpush.msra.mxu1 %v593_v50  ;;  %v368_v12 = vmul.f32 %v1883_v28, %v1928_v7 }
  0xad   :  { %v277_v55 = vmax.f32 %v240_v1, 0.0  ;;  %v262_v16 = vmax.f32 %v154_v11, 0.0  ;;  %961 = vmatpush.msra.mxu3 %v584_v59  ;;  %v521_v59 = vld [vmem:[#allocation2 + $0xf8] sm:$0xff] }
  0xae   :  { %v2061_v15 = vmul.f32 %v450_v4, %v278_v5  ;;  %v263_v19 = vmax.f32 %v219_v56, 0.0  ;;  %v451_v4 = vmax.f32 %v2014_v58, 0.0  ;;  %v369_v56 = vmul.f32 %v1885_v29, %v1928_v7 }
  0xaf   :  { %v2065_v52 = vmul.f32 %v449_v63, %v277_v55  ;;  %v2067_v26 = vmul.f32 %v434_v3, %v262_v16  ;;  %v525_v3 = vld [vmem:[#allocation2 + $0x118] sm:$0xff]  ;;  %v406_v24 = vadd.f32 %v1887_v32, %v368_v12  ;;  %962 = vmatpush.msra.mxu3 %v580_v40 }
  0xb0   :  { %v2069_v30 = vmul.f32 %v435_v13, %v263_v19  ;;  %1025 = vmatpush.msra.mxu0 %v525_v3  ;;  %v436_v13 = vmax.f32 %v404_v35, 0.0  ;;  %v407_v7 = vadd.f32 %v1889_v33, %v369_v56 }
  0xb1   :  { %v180_v31 = vpop.f32.mrf.mxu2  ;;  %656 = vmatmul.f32.gmra.mxu2 %v2067_v26  ;;  %786 = vmatmul.f32.gmra.mxu0 %v2067_v26  ;;  %v438_v3 = vmax.f32 %v406_v24, 0.0  ;;  %v512_v24 = vld [vmem:[#allocation2 + $0xb0] sm:$0xff] }
  0xb2   :  { %v181_v22 = vadd.f32 %v180_v31, %v1910_v53  ;;  %v242_v39 = vpop.f32.mrf.mxu3  ;;  %721 = vmatmul.f32.gmra.mxu3 %v2069_v30  ;;  %851 = vmatmul.f32.gmra.mxu1 %v2069_v30  ;;  %v156_v46 = vpop.f32.mrf.mxu0 }
  0xb3   :  { %v243_v45 = vadd.f32 %v242_v39, %v1912_v54  ;;  %v157_v1 = vadd.f32 %v156_v46, %v1910_v53  ;;  %v221_v2 = vpop.f32.mrf.mxu1  ;;  %v589_v39 = vld [vmem:[#allocation2 + $0x318] sm:$0xff]  ;;  %1026 = vmatpush.msra.mxu0 %v521_v59 }
  0xb4   :  { %v280_v63 = vmax.f32 %v181_v22, 0.0  ;;  %v222_v11 = vadd.f32 %v221_v2, %v1912_v54  ;;  %v516_v22 = vld [vmem:[#allocation2 + $0xd0] sm:$0xff]  ;;  %1090 = vmatpush.msra.mxu1 %v589_v39  ;;  %v370_v2 = vmul.f32 %v1883_v28, %v1926_v6 }
  0xb5   :  { %v279_v5 = vmax.f32 %v243_v45, 0.0  ;;  %v264_v48 = vmax.f32 %v157_v1, 0.0  ;;  %v454_v45 = vmax.f32 %v1931_v8, 0.0  ;;  %897 = vmatpush.msra.mxu2 %v516_v22  ;;  %v517_v22 = vld [vmem:[#allocation2 + $0xd8] sm:$0xff] }
  0xb6   :  { %v2085_v55 = vmul.f32 %v452_v61, %v280_v63  ;;  %v265_v18 = vmax.f32 %v222_v11, 0.0  ;;  %v453_v61 = vmax.f32 %v2005_v49, 0.0  ;;  %v439_v11 = vmax.f32 %v407_v7, 0.0  ;;  %1027 = vmatpush.msra.mxu0 %v517_v22  ;;  %v492_v22 = vld [vmem:[#allocation2 + $0x10] sm:$0xff] }
  0xb7   :  { %v2089_v16 = vmul.f32 %v451_v4, %v279_v5  ;;  %v2091_v58 = vmul.f32 %v436_v13, %v264_v48  ;;  %v371_v5 = vmul.f32 %v1885_v29, %v1926_v6  ;;  %898 = vmatpush.msra.mxu2 %v512_v24  ;;  %v573_v24 = vld [vmem:[#allocation2 + $0x298] sm:$0xff] }
  0xb8   :  { %v2093_v19 = vmul.f32 %v437_v14, %v265_v18  ;;  %v408_v14 = vadd.f32 %v1887_v32, %v370_v2  ;;  %v456_v32 = vmax.f32 %v2041_v41, 0.0 }
  0xb9   :  { %v183_v23 = vpop.f32.mrf.mxu2  ;;  %659 = vmatmul.f32.gmra.mxu2 %v2091_v58  ;;  %789 = vmatmul.f32.gmra.mxu0 %v2091_v58  ;;  %v409_v29 = vadd.f32 %v1889_v33, %v371_v5  ;;  %v455_v33 = vmax.f32 %v1934_v10, 0.0  ;;  %v572_v5 = vld [vmem:[#allocation2 + $0x290] sm:$0xff] }
  0xba   :  { %v184_v27 = vadd.f32 %v183_v23, %v1910_v53  ;;  %v245_v9 = vpop.f32.mrf.mxu3  ;;  %724 = vmatmul.f32.gmra.mxu3 %v2093_v19  ;;  %854 = vmatmul.f32.gmra.mxu1 %v2093_v19  ;;  %v159_v35 = vpop.f32.mrf.mxu0 }
  0xbb   :  { %v246_v31 = vadd.f32 %v245_v9, %v1912_v54  ;;  %v160_v47 = vadd.f32 %v159_v35, %v1910_v53  ;;  %v224_v50 = vpop.f32.mrf.mxu1  ;;  %v576_v9 = vld [vmem:[#allocation2 + $0x2b0] sm:$0xff] }
  0xbc   :  { %v282_v46 = vmax.f32 %v184_v27, 0.0  ;;  %v225_v1 = vadd.f32 %v224_v50, %v1912_v54  ;;  %v585_v27 = vld [vmem:[#allocation2 + $0x2f8] sm:$0xff]  ;;  %963 = vmatpush.msra.mxu3 %v576_v9  ;;  %v441_v50 = vmax.f32 %v409_v29, 0.0 }
  0xbd   :  { %v281_v63 = vmax.f32 %v246_v31, 0.0  ;;  %v266_v8 = vmax.f32 %v160_v47, 0.0  ;;  %1091 = vmatpush.msra.mxu1 %v585_v27  ;;  %v564_v27 = vld [vmem:[#allocation2 + $0x250] sm:$0xff]  ;;  %v505_v9 = vld [vmem:[#allocation2 + $0x78] sm:$0xff] }
  0xbe   :  { %v2109_v4 = vmul.f32 %v454_v45, %v282_v46  ;;  %v267_v13 = vmax.f32 %v225_v1, 0.0  ;;  %v440_v45 = vmax.f32 %v408_v14, 0.0  ;;  %964 = vmatpush.msra.mxu3 %v572_v5  ;;  %v1275_v5 = vld [vmem:[%s2755_s7 + $0x1f8] sm:$0xff] }
  0xbf   :  { %v2113_v12 = vmul.f32 %v453_v61, %v281_v63  ;;  %v2115_v49 = vmul.f32 %v438_v3, %v266_v8  ;;  %v508_v3 = vld [vmem:[#allocation2 + $0x90] sm:$0xff]  ;;  %v581_v8 = vld [vmem:[#allocation2 + $0x2d8] sm:$0xff] }
  0xc0   :  { %v2117_v48 = vmul.f32 %v439_v11, %v267_v13  ;;  %899 = vmatpush.msra.mxu2 %v508_v3  ;;  %1092 = vmatpush.msra.mxu1 %v581_v8  ;;  %v513_v13 = vld [vmem:[#allocation2 + $0xb8] sm:$0xff]  ;;  %v1225_v8 = vld [vmem:[%s2755_s7 + $0x68] sm:$0xff] }
  0xc1   :  { %v186_v56 = vpop.f32.mrf.mxu2  ;;  %662 = vmatmul.f32.gmra.mxu2 %v2115_v49  ;;  %792 = vmatmul.f32.gmra.mxu0 %v2115_v49  ;;  %v2194_v3 = vld [vmem:[%s2755_s7 + $0x178] sm:$0xff] }
  0xc2   :  { %v187_v28 = vadd.f32 %v186_v56, %v1910_v53  ;;  %v248_v18 = vpop.f32.mrf.mxu3  ;;  %727 = vmatmul.f32.gmra.mxu3 %v2117_v48  ;;  %857 = vmatmul.f32.gmra.mxu1 %v2117_v48  ;;  %v162_v23 = vpop.f32.mrf.mxu0  ;;  %v457_v56 = vmax.f32 %v2044_v43, 0.0  ;;  %v577_v43 = vld [vmem:[#allocation2 + $0x2b8] sm:$0xff] }
  0xc3   :  { %v249_v6 = vadd.f32 %v248_v18, %v1912_v54  ;;  %v163_v31 = vadd.f32 %v162_v23, %v1910_v53  ;;  %v227_v35 = vpop.f32.mrf.mxu1  ;;  %1028 = vmatpush.msra.mxu0 %v513_v13  ;;  %1093 = vmatpush.msra.mxu1 %v577_v43  ;;  %v509_v23 = vld [vmem:[#allocation2 + $0x98] sm:$0xff]  ;;  %v2213_v13 = vld [vmem:[%s2755_s7 + $0x170] sm:$0xff] }
  0xc4   :  { %v284_v7 = vmax.f32 %v187_v28, 0.0  ;;  %v228_v40 = vadd.f32 %v227_v35, %v1912_v54  ;;  %v501_v35 = vld [vmem:[#allocation2 + $0x58] sm:$0xff] }
  0xc5   :  { %v283_v39 = vmax.f32 %v249_v6, 0.0  ;;  %v268_v47 = vmax.f32 %v163_v31, 0.0  ;;  %v568_v6 = vld [vmem:[#allocation2 + $0x270] sm:$0xff]  ;;  %1029 = vmatpush.msra.mxu0 %v509_v23  ;;  %1094 = vmatpush.msra.mxu1 %v573_v24  ;;  %v2244_v23 = vld [vmem:[%s2755_s7 + $0x168] sm:$0xff] }
  0xc6   :  { %v2131_v46 = vmul.f32 %v456_v32, %v284_v7  ;;  %v269_v59 = vmax.f32 %v228_v40, 0.0  ;;  %965 = vmatpush.msra.mxu3 %v568_v6  ;;  %v496_v32 = vld [vmem:[#allocation2 + $0x30] sm:$0xff]  ;;  %v569_v7 = vld [vmem:[#allocation2 + $0x278] sm:$0xff]  ;;  %v1240_v6 = vld [vmem:[%s2755_s7 + $0xe0] sm:$0xff] }
  0xc7   :  { %v2133_v41 = vmul.f32 %v455_v33, %v283_v39  ;;  %v2135_v61 = vmul.f32 %v440_v45, %v268_v47  ;;  %1030 = vmatpush.msra.mxu0 %v505_v9  ;;  %v560_v31 = vld [vmem:[#allocation2 + $0x230] sm:$0xff]  ;;  %1095 = vmatpush.msra.mxu1 %v569_v7  ;;  %v565_v33 = vld [vmem:[#allocation2 + $0x258] sm:$0xff] }
  0xc8   :  { %v2137_v63 = vmul.f32 %v441_v50, %v269_v59  ;;  %966 = vmatpush.msra.mxu3 %v564_v27  ;;  %v556_v39 = vld [vmem:[#allocation2 + $0x210] sm:$0xff]  ;;  %v497_v40 = vld [vmem:[#allocation2 + $0x38] sm:$0xff] }
  0xc9   :  { %665 = vmatmul.f32.gmra.mxu2 %v2135_v61  ;;  %795 = vmatmul.f32.gmra.mxu0 %v2135_v61  ;;  %v561_v45 = vld [vmem:[#allocation2 + $0x238] sm:$0xff] }
  0xca   :  { %v251_v1 = vpop.f32.mrf.mxu3  ;;  %730 = vmatmul.f32.gmra.mxu3 %v2137_v63  ;;  %860 = vmatmul.f32.gmra.mxu1 %v2137_v63  ;;  %v165_v2 = vpop.f32.mrf.mxu0  ;;  %v493_v47 = vld [vmem:[#allocation2 + $0x18] sm:$0xff] }
  0xcb   :  { %v252_v10 = vadd.f32 %v251_v1, %v1912_v54  ;;  %v166_v11 = vadd.f32 %v165_v2, %v1910_v53  ;;  %v442_v54 = vmax.f32 %v1894_v37, 0.0  ;;  %v504_v53 = vld [vmem:[#allocation2 + $0x70] sm:$0xff]  ;;  %967 = vmatpush.msra.mxu3 %v560_v31  ;;  %1031 = vmatpush.msra.mxu0 %v501_v35  ;;  %v557_v50 = vld [vmem:[#allocation2 + $0x218] sm:$0xff]  ;;  %v2270_v35 = vld [vmem:[%s2755_s7 + $0x160] sm:$0xff] }
  0xcc   :  { %900 = vmatpush.msra.mxu2 %v504_v53  ;;  %v500_v37 = vld [vmem:[#allocation2 + $0x50] sm:$0xff]  ;;  %1096 = vmatpush.msra.mxu1 %v565_v33  ;;  %v1227_v59 = vld [vmem:[%s2755_s7 + $0x78] sm:$0xff]  ;;  %v2229_v53 = vld [vmem:[%s2754_s6] sm:$0xf] }
  0xcd   :  { %v285_v14 = vmax.f32 %v252_v10, 0.0  ;;  %v270_v28 = vmax.f32 %v166_v11, 0.0  ;;  %968 = vmatpush.msra.mxu3 %v556_v39  ;;  %1032 = vmatpush.msra.mxu0 %v497_v40  ;;  %v1243_v1 = vld [vmem:[%s2755_s7 + $0xf8] sm:$0xff]  ;;  %v1226_v10 = vld [vmem:[%s2755_s7 + $0x70] sm:$0xff]  ;;  %v1241_v11 = vld [vmem:[%s2755_s7 + $0xe8] sm:$0xff]  ;;  %v2234_v43 = vperm.slane %v2229_v53, 0 }
  0xce   :  { %901 = vmatpush.msra.mxu2 %v500_v37  ;;  %1097 = vmatpush.msra.mxu1 %v561_v45  ;;  %v1242_v2 = vld [vmem:[%s2755_s7 + $0xf0] sm:$0xff]  ;;  %v1239_v31 = vld [vmem:[%s2755_s7 + $0xd8] sm:$0xff] }
  0xcf   :  { %v2147_v18 = vmul.f32 %v457_v56, %v285_v14  ;;  %v2149_v29 = vmul.f32 %v442_v54, %v270_v28  ;;  %1033 = vmatpush.msra.mxu0 %v493_v47  ;;  %1345 = vmatpush.msrb.mxu3 %v1243_v1  ;;  %v1224_v56 = vld [vmem:[%s2755_s7 + $0x60] sm:$0xff]  ;;  %v1274_v14 = vld [vmem:[%s2755_s7 + $0x1f0] sm:$0xff]  ;;  %v1221_v1 = vld [vmem:[%s2755_s7 + $0x48] sm:$0xff] }
  0xd0   :  { %902 = vmatpush.msra.mxu2 %v496_v32  ;;  %1098 = vmatpush.msra.mxu1 %v557_v50  ;;  %v1238_v50 = vld [vmem:[%s2755_s7 + $0xd0] sm:$0xff] }
  0xd1   :  { %668 = vmatmul.f32.gmra.mxu2 %v2149_v29  ;;  %798 = vmatmul.f32.gmra.mxu0 %v2149_v29 }
  0xd2   :  { %733 = vmatmul.f32.gmra.mxu3 %v1963_v57  ;;  %863 = vmatmul.f32.gmra.mxu1 %v1963_v57 }
  0xd3   :  { %903 = vmatpush.msra.mxu2 %v492_v22  ;;  %1346 = vmatpush.msrb.mxu3 %v1242_v2  ;;  %v1222_v22 = vld [vmem:[%s2755_s7 + $0x50] sm:$0xff] }
  0xd4   :  { %1410 = vmatpush.msrb.mxu0 %v2194_v3  ;;  %1475 = vmatpush.msrb.mxu1 %v1275_v5 }
  0xd5   :  { %1280 = vmatpush.msrb.mxu2 %v1227_v59  ;;  %1347 = vmatpush.msrb.mxu3 %v1241_v11  ;;  %v2296_v59 = vld [vmem:[%s2755_s7 + $0x158] sm:$0xff] }
  0xd6   :  { %1411 = vmatpush.msrb.mxu0 %v2213_v13  ;;  %1476 = vmatpush.msrb.mxu1 %v1274_v14  ;;  %v2322_v14 = vld [vmem:[%s2755_s7 + $0x150] sm:$0xff] }
  0xd7   :  { %1281 = vmatpush.msrb.mxu2 %v1226_v10  ;;  %1348 = vmatpush.msrb.mxu3 %v1240_v6  ;;  %v1220_v6 = vld [vmem:[%s2755_s7 + $0x40] sm:$0xff] }
  0xd8   :  { %1412 = vmatpush.msrb.mxu0 %v2244_v23 }
  0xd9   :  { %671 = vmatmul.f32.gmra.mxu2 %v1985_v21  ;;  %801 = vmatmul.f32.gmra.mxu0 %v1985_v21 }
  0xda   :  { %736 = vmatmul.f32.gmra.mxu3 %v1995_v42  ;;  %866 = vmatmul.f32.gmra.mxu1 %v1995_v42 }
  0xdb   :  { %1282 = vmatpush.msrb.mxu2 %v1225_v8  ;;  %1349 = vmatpush.msrb.mxu3 %v1239_v31  ;;  %v1236_v31 = vld [vmem:[%s2755_s7 + $0xc0] sm:$0xff] }
  0xdc   :  { %1413 = vmatpush.msrb.mxu0 %v2270_v35 }
  0xdd   :  { %1283 = vmatpush.msrb.mxu2 %v1224_v56  ;;  %1350 = vmatpush.msrb.mxu3 %v1238_v50  ;;  %v1237_v56 = vld [vmem:[%s2755_s7 + $0xc8] sm:$0xff] }
  0xde   :  { %1414 = vmatpush.msrb.mxu0 %v2296_v59 }
  0xdf   :  { %1351 = vmatpush.msrb.mxu3 %v1237_v56 }
  0xe0   :  { %1415 = vmatpush.msrb.mxu0 %v2322_v14 }
  0xe1   :  { %674 = vmatmul.f32.gmra.mxu2 %v1991_v36  ;;  %804 = vmatmul.f32.gmra.mxu0 %v1991_v36 }
  0xe2   :  { %739 = vmatmul.f32.gmra.mxu3 %v2036_v34  ;;  %869 = vmatmul.f32.gmra.mxu1 %v2036_v34 }
  0xe3   :  { %1352 = vmatpush.msrb.mxu3 %v1236_v31  ;;  %v1217_v31 = vld [vmem:[%s2755_s7 + $0x28] sm:$0xff] }
  0xe9   :  { %677 = vmatmul.f32.gmra.mxu2 %v2031_v25  ;;  %807 = vmatmul.f32.gmra.mxu0 %v2031_v25 }
  0xea   :  { %742 = vmatmul.f32.gmra.mxu3 %v2065_v52  ;;  %872 = vmatmul.f32.gmra.mxu1 %v2065_v52 }
  0xf1   :  { %680 = vmatmul.f32.gmra.mxu2 %v2061_v15  ;;  %810 = vmatmul.f32.gmra.mxu0 %v2061_v15 }
  0xf2   :  { %745 = vmatmul.f32.gmra.mxu3 %v2089_v16  ;;  %875 = vmatmul.f32.gmra.mxu1 %v2089_v16 }
  0xf9   :  { %683 = vmatmul.f32.gmra.mxu2 %v2085_v55  ;;  %813 = vmatmul.f32.gmra.mxu0 %v2085_v55 }
  0xfa   :  { %748 = vmatmul.f32.gmra.mxu3 %v2113_v12  ;;  %878 = vmatmul.f32.gmra.mxu1 %v2113_v12 }
 0x101   :  { %686 = vmatmul.f32.gmra.mxu2 %v2109_v4  ;;  %816 = vmatmul.f32.gmra.mxu0 %v2109_v4 }
 0x102   :  { %751 = vmatmul.f32.gmra.mxu3 %v2133_v41  ;;  %881 = vmatmul.f32.gmra.mxu1 %v2133_v41 }
 0x109   :  { %689 = vmatmul.f32.gmra.mxu2 %v2131_v46  ;;  %819 = vmatmul.f32.gmra.mxu0 %v2131_v46 }
 0x10a   :  { %754 = vmatmul.f32.gmra.mxu3 %v2147_v18  ;;  %884 = vmatmul.f32.gmra.mxu1 %v2147_v18 }
 0x10e   :  { %v2222_v54 = vpop.f32.mrf.mxu0 }
 0x10f   :  { %v2224_v28 = vpop.f32.mrf.mxu1 }
 0x111   :  { %904 = vmatmul.f32.vlgmr.msra.gmra.mxu2 %v1938_v17  ;;  %1034 = vmatmul.f32.vlgmr.msra.gmra.mxu0 %v1938_v17  ;;  %v1223_v17 = vld [vmem:[%s2755_s7 + $0x58] sm:$0xff] }
 0x112   :  { %969 = vmatmul.f32.vlgmr.msra.gmra.mxu3 %v1942_v20  ;;  %1099 = vmatmul.f32.vlgmr.msra.gmra.mxu1 %v1942_v20  ;;  %v1273_v20 = vld [vmem:[%s2755_s7 + $0x1e8] sm:$0xff] }
 0x113   :  { %1284 = vmatpush.msrb.mxu2 %v1223_v17  ;;  %1477 = vmatpush.msrb.mxu1 %v1273_v20 }
 0x114   :  { %v645_v37 = vpop.f32.mrf.mxu2 }
 0x115   :  { %v646_v24 = vadd.f32 %v645_v37, %v2234_v43  ;;  %v710_v27 = vpop.f32.mrf.mxu3  ;;  %1285 = vmatpush.msrb.mxu2 %v1222_v22  ;;  %v2348_v22 = vld [vmem:[%s2755_s7 + $0x148] sm:$0xff] }
 0x116   :  { %v2254_v9 = vpop.f32.mrf.mxu0  ;;  %1416 = vmatpush.msrb.mxu0 %v2348_v22 }
 0x117   :  { %v2256_v32 = vadd.f32 %v710_v27, %v646_v24  ;;  %v2258_v7 = vpop.f32.mrf.mxu1  ;;  %1286 = vmatpush.msrb.mxu2 %v1221_v1 }
 0x119   :  { %907 = vmatmul.f32.gmra.mxu2 %v1965_v60  ;;  %1037 = vmatmul.f32.gmra.mxu0 %v1965_v60  ;;  %v1272_v60 = vld [vmem:[%s2755_s7 + $0x1e0] sm:$0xff] }
 0x11a   :  { %972 = vmatmul.f32.gmra.mxu3 %v1972_v0  ;;  %1102 = vmatmul.f32.gmra.mxu1 %v1972_v0 }
 0x11b   :  { %1478 = vmatpush.msrb.mxu1 %v1272_v60  ;;  %1287 = vmatpush.msrb.mxu2 %v1220_v6 }
 0x11c   :  { %v648_v33 = vpop.f32.mrf.mxu2 }
 0x11d   :  { %v649_v0 = vadd.f32 %v648_v33, %v2234_v43  ;;  %v713_v39 = vpop.f32.mrf.mxu3  ;;  %v1219_v33 = vld [vmem:[%s2755_s7 + $0x38] sm:$0xff] }
 0x11e   :  { %v2280_v40 = vpop.f32.mrf.mxu0  ;;  %1288 = vmatpush.msrb.mxu2 %v1219_v33 }
 0x11f   :  { %v2282_v45 = vadd.f32 %v713_v39, %v649_v0  ;;  %v2284_v47 = vpop.f32.mrf.mxu1 }
 0x121   :  { %910 = vmatmul.f32.gmra.mxu2 %v1999_v38  ;;  %1040 = vmatmul.f32.gmra.mxu0 %v1999_v38  ;;  %v1271_v38 = vld [vmem:[%s2755_s7 + $0x1d8] sm:$0xff] }
 0x122   :  { %975 = vmatmul.f32.gmra.mxu3 %v2008_v51  ;;  %1105 = vmatmul.f32.gmra.mxu1 %v2008_v51 }
 0x123   :  { %1479 = vmatpush.msrb.mxu1 %v1271_v38  ;;  %v2374_v38 = vld [vmem:[%s2755_s7 + $0x140] sm:$0xff] }
 0x124   :  { %v651_v10 = vpop.f32.mrf.mxu2  ;;  %1417 = vmatpush.msrb.mxu0 %v2374_v38 }
 0x125   :  { %v652_v51 = vadd.f32 %v651_v10, %v2234_v43  ;;  %v716_v2 = vpop.f32.mrf.mxu3  ;;  %v1235_v10 = vld [vmem:[%s2755_s7 + $0xb8] sm:$0xff] }
 0x126   :  { %v2306_v8 = vpop.f32.mrf.mxu0  ;;  %1353 = vmatpush.msrb.mxu3 %v1235_v10  ;;  %v1233_v10 = vld [vmem:[%s2755_s7 + $0xa8] sm:$0xff] }
 0x127   :  { %v2308_v5 = vadd.f32 %v716_v2, %v652_v51  ;;  %v2310_v11 = vpop.f32.mrf.mxu1  ;;  %v1218_v51 = vld [vmem:[%s2755_s7 + $0x30] sm:$0xff] }
 0x128   :  { %1289 = vmatpush.msrb.mxu2 %v1218_v51  ;;  %v2426_v51 = vld [vmem:[%s2755_s7 + $0x130] sm:$0xff] }
 0x129   :  { %913 = vmatmul.f32.gmra.mxu2 %v2038_v62  ;;  %1043 = vmatmul.f32.gmra.mxu0 %v2038_v62  ;;  %v1270_v62 = vld [vmem:[%s2755_s7 + $0x1d0] sm:$0xff] }
 0x12a   :  { %978 = vmatmul.f32.gmra.mxu3 %v2047_v44  ;;  %1108 = vmatmul.f32.gmra.mxu1 %v2047_v44 }
 0x12b   :  { %1480 = vmatpush.msrb.mxu1 %v1270_v62  ;;  %1290 = vmatpush.msrb.mxu2 %v1217_v31 }
 0x12c   :  { %v654_v17 = vpop.f32.mrf.mxu2 }
 0x12d   :  { %v655_v44 = vadd.f32 %v654_v17, %v2234_v43  ;;  %v719_v37 = vpop.f32.mrf.mxu3 }
 0x12e   :  { %v2332_v20 = vpop.f32.mrf.mxu0 }
 0x12f   :  { %v2334_v24 = vadd.f32 %v719_v37, %v655_v44  ;;  %v2336_v27 = vpop.f32.mrf.mxu1  ;;  %v1234_v44 = vld [vmem:[%s2755_s7 + $0xb0] sm:$0xff]  ;;  %v2400_v37 = vld [vmem:[%s2755_s7 + $0x138] sm:$0xff] }
 0x130   :  { %1354 = vmatpush.msrb.mxu3 %v1234_v44  ;;  %1418 = vmatpush.msrb.mxu0 %v2400_v37 }
 0x131   :  { %916 = vmatmul.f32.gmra.mxu2 %v2067_v26  ;;  %1046 = vmatmul.f32.gmra.mxu0 %v2067_v26  ;;  %v1269_v26 = vld [vmem:[%s2755_s7 + $0x1c8] sm:$0xff] }
 0x132   :  { %981 = vmatmul.f32.gmra.mxu3 %v2069_v30  ;;  %1111 = vmatmul.f32.gmra.mxu1 %v2069_v30 }
 0x133   :  { %1481 = vmatpush.msrb.mxu1 %v1269_v26  ;;  %1355 = vmatpush.msrb.mxu3 %v1233_v10 }
 0x134   :  { %v657_v60 = vpop.f32.mrf.mxu2  ;;  %1419 = vmatpush.msrb.mxu0 %v2426_v51 }
 0x135   :  { %v658_v30 = vadd.f32 %v657_v60, %v2234_v43  ;;  %v722_v0 = vpop.f32.mrf.mxu3 }
 0x136   :  { %v2358_v39 = vpop.f32.mrf.mxu0 }
 0x137   :  { %v2360_v50 = vadd.f32 %v722_v0, %v658_v30  ;;  %v2362_v1 = vpop.f32.mrf.mxu1 }
 0x139   :  { %919 = vmatmul.f32.gmra.mxu2 %v2091_v58  ;;  %1049 = vmatmul.f32.gmra.mxu0 %v2091_v58  ;;  %v1268_v58 = vld [vmem:[%s2755_s7 + $0x1c0] sm:$0xff] }
 0x13a   :  { %984 = vmatmul.f32.gmra.mxu3 %v2093_v19  ;;  %1114 = vmatmul.f32.gmra.mxu1 %v2093_v19 }
 0x13b   :  { %1482 = vmatpush.msrb.mxu1 %v1268_v58 }
 0x13c   :  { %v660_v2 = vpop.f32.mrf.mxu2 }
 0x13d   :  { %v661_v19 = vadd.f32 %v660_v2, %v2234_v43  ;;  %v725_v56 = vpop.f32.mrf.mxu3  ;;  %v1216_v2 = vld [vmem:[%s2755_s7 + $0x20] sm:$0xff] }
 0x13e   :  { %v2384_v6 = vpop.f32.mrf.mxu0  ;;  %1291 = vmatpush.msrb.mxu2 %v1216_v2 }
 0x13f   :  { %v2386_v17 = vadd.f32 %v725_v56, %v661_v19  ;;  %v2388_v62 = vpop.f32.mrf.mxu1 }
 0x141   :  { %922 = vmatmul.f32.gmra.mxu2 %v2115_v49  ;;  %1052 = vmatmul.f32.gmra.mxu0 %v2115_v49  ;;  %v1267_v49 = vld [vmem:[%s2755_s7 + $0x1b8] sm:$0xff] }
 0x142   :  { %987 = vmatmul.f32.gmra.mxu3 %v2117_v48  ;;  %1117 = vmatmul.f32.gmra.mxu1 %v2117_v48 }
 0x143   :  { %1483 = vmatpush.msrb.mxu1 %v1267_v49  ;;  %v2452_v49 = vld [vmem:[%s2755_s7 + $0x128] sm:$0xff] }
 0x144   :  { %v663_v33 = vpop.f32.mrf.mxu2  ;;  %1420 = vmatpush.msrb.mxu0 %v2452_v49 }
 0x145   :  { %v664_v48 = vadd.f32 %v663_v33, %v2234_v43  ;;  %v728_v60 = vpop.f32.mrf.mxu3  ;;  %v1232_v33 = vld [vmem:[%s2755_s7 + $0xa0] sm:$0xff] }
 0x146   :  { %v2410_v26 = vpop.f32.mrf.mxu0  ;;  %1356 = vmatpush.msrb.mxu3 %v1232_v33  ;;  %v1214_v33 = vld [vmem:[%s2755_s7 + $0x10] sm:$0xff] }
 0x147   :  { %v2412_v30 = vadd.f32 %v728_v60, %v664_v48  ;;  %v2414_v0 = vpop.f32.mrf.mxu1  ;;  %v1215_v48 = vld [vmem:[%s2755_s7 + $0x18] sm:$0xff] }
 0x148   :  { %1292 = vmatpush.msrb.mxu2 %v1215_v48 }
 0x149   :  { %925 = vmatmul.f32.gmra.mxu2 %v2135_v61  ;;  %1055 = vmatmul.f32.gmra.mxu0 %v2135_v61  ;;  %v1266_v61 = vld [vmem:[%s2755_s7 + $0x1b0] sm:$0xff] }
 0x14a   :  { %990 = vmatmul.f32.gmra.mxu3 %v2137_v63  ;;  %1120 = vmatmul.f32.gmra.mxu1 %v2137_v63 }
 0x14b   :  { %1484 = vmatpush.msrb.mxu1 %v1266_v61  ;;  %1293 = vmatpush.msrb.mxu2 %v1214_v33  ;;  %v2504_v33 = vld [vmem:[%s2755_s7 + $0x118] sm:$0xff] }
 0x14c   :  { %v666_v58 = vpop.f32.mrf.mxu2 }
 0x14d   :  { %v667_v63 = vadd.f32 %v666_v58, %v2234_v43  ;;  %v731_v19 = vpop.f32.mrf.mxu3 }
 0x14e   :  { %v2436_v56 = vpop.f32.mrf.mxu0 }
 0x14f   :  { %v2438_v44 = vadd.f32 %v731_v19, %v667_v63  ;;  %v2440_v31 = vpop.f32.mrf.mxu1  ;;  %v1231_v63 = vld [vmem:[%s2755_s7 + $0x98] sm:$0xff]  ;;  %v2478_v19 = vld [vmem:[%s2755_s7 + $0x120] sm:$0xff] }
 0x150   :  { %1357 = vmatpush.msrb.mxu3 %v1231_v63  ;;  %1421 = vmatpush.msrb.mxu0 %v2478_v19  ;;  %v1230_v63 = vld [vmem:[%s2755_s7 + $0x90] sm:$0xff] }
 0x151   :  { %928 = vmatmul.f32.gmra.mxu2 %v2149_v29  ;;  %1058 = vmatmul.f32.gmra.mxu0 %v2149_v29 }
 0x152   :  { %993 = vmatmul.f32.gmra.mxu3 %v1963_v57  ;;  %1123 = vmatmul.f32.gmra.mxu1 %v1963_v57  ;;  %v1265_v57 = vld [vmem:[%s2755_s7 + $0x1a8] sm:$0xff] }
 0x153   :  { %1485 = vmatpush.msrb.mxu1 %v1265_v57  ;;  %1358 = vmatpush.msrb.mxu3 %v1230_v63  ;;  %v1229_v63 = vld [vmem:[%s2755_s7 + $0x88] sm:$0xff] }
 0x154   :  { %v669_v60 = vpop.f32.mrf.mxu2  ;;  %1422 = vmatpush.msrb.mxu0 %v2504_v33 }
 0x155   :  { %v670_v29 = vadd.f32 %v669_v60, %v2234_v43  ;;  %v734_v10 = vpop.f32.mrf.mxu3  ;;  %1359 = vmatpush.msrb.mxu3 %v1229_v63  ;;  %v1228_v63 = vld [vmem:[%s2755_s7 + $0x80] sm:$0xff] }
 0x156   :  { %v2462_v2 = vpop.f32.mrf.mxu0 }
 0x157   :  { %v2464_v58 = vadd.f32 %v734_v10, %v670_v29  ;;  %v2466_v61 = vpop.f32.mrf.mxu1  ;;  %1360 = vmatpush.msrb.mxu3 %v1228_v63 }
 0x159   :  { %931 = vmatmul.f32.gmra.mxu2 %v1985_v21  ;;  %1061 = vmatmul.f32.gmra.mxu0 %v1985_v21  ;;  %v1264_v21 = vld [vmem:[%s2755_s7 + $0x1a0] sm:$0xff] }
 0x15a   :  { %996 = vmatmul.f32.gmra.mxu3 %v1995_v42  ;;  %1126 = vmatmul.f32.gmra.mxu1 %v1995_v42 }
 0x15b   :  { %1486 = vmatpush.msrb.mxu1 %v1264_v21 }
 0x15c   :  { %v672_v48 = vpop.f32.mrf.mxu2 }
 0x15d   :  { %v673_v42 = vadd.f32 %v672_v48, %v2234_v43  ;;  %v737_v60 = vpop.f32.mrf.mxu3  ;;  %v1213_v48 = vld [vmem:[%s2755_s7 + $0x8] sm:$0xff] }
 0x15e   :  { %v2488_v57 = vpop.f32.mrf.mxu0  ;;  %1294 = vmatpush.msrb.mxu2 %v1213_v48  ;;  %v2530_v48 = vld [vmem:[%s2755_s7 + $0x110] sm:$0xff] }
 0x15f   :  { %2758 = vst [vmem:[#allocation8_spill] sm:$0xff] %v2488_v57  ;;  %v2490_v29 = vadd.f32 %v737_v60, %v673_v42  ;;  %v2492_v10 = vpop.f32.mrf.mxu1  ;;  %1423 = vmatpush.msrb.mxu0 %v2530_v48 }
 0x160   :  { %2759 = vst [vmem:[#allocation9_spill] sm:$0xff] %v2492_v10 }
 0x161   :  { %934 = vmatmul.f32.gmra.mxu2 %v1991_v36  ;;  %1064 = vmatmul.f32.gmra.mxu0 %v1991_v36  ;;  %v1263_v36 = vld [vmem:[%s2755_s7 + $0x198] sm:$0xff] }
 0x162   :  { %999 = vmatmul.f32.gmra.mxu3 %v2036_v34  ;;  %1129 = vmatmul.f32.gmra.mxu1 %v2036_v34 }
 0x163   :  { %1487 = vmatpush.msrb.mxu1 %v1263_v36 }
 0x164   :  { %v675_v21 = vpop.f32.mrf.mxu2 }
 0x165   :  { %v676_v34 = vadd.f32 %v675_v21, %v2234_v43  ;;  %v740_v42 = vpop.f32.mrf.mxu3  ;;  %v1212_v21 = vld [vmem:[%s2755_s7] sm:$0xff] }
 0x166   :  { %v2514_v60 = vpop.f32.mrf.mxu0  ;;  %1295 = vmatpush.msrb.mxu2 %v1212_v21  ;;  %v2561_v21 = vld [vmem:[%s2755_s7 + $0x108] sm:$0xff] }
 0x167   :  { %2760 = vst [vmem:[#allocation10_spill] sm:$0xff] %v2514_v60  ;;  %v2516_v10 = vadd.f32 %v740_v42, %v676_v34  ;;  %v2518_v57 = vpop.f32.mrf.mxu1  ;;  %1424 = vmatpush.msrb.mxu0 %v2561_v21 }
 0x168   :  { %2761 = vst [vmem:[#allocation11_spill] sm:$0xff] %v2518_v57  ;;  %1626 = vmatpush.msra.mxu2 %v2194_v3  ;;  %v1261_v3 = vld [vmem:[%s2755_s7 + $0x188] sm:$0xff] }
 0x169   :  { %937 = vmatmul.f32.gmra.mxu2 %v2031_v25  ;;  %1067 = vmatmul.f32.gmra.mxu0 %v2031_v25  ;;  %v1262_v25 = vld [vmem:[%s2755_s7 + $0x190] sm:$0xff] }
 0x16a   :  { %1002 = vmatmul.f32.gmra.mxu3 %v2065_v52  ;;  %1132 = vmatmul.f32.gmra.mxu1 %v2065_v52 }
 0x16b   :  { %1488 = vmatpush.msrb.mxu1 %v1262_v25  ;;  %1627 = vmatpush.msra.mxu2 %v2213_v13 }
 0x16c   :  { %v678_v36 = vpop.f32.mrf.mxu2 }
 0x16d   :  { %v679_v52 = vadd.f32 %v678_v36, %v2234_v43  ;;  %v743_v34 = vpop.f32.mrf.mxu3  ;;  %1489 = vmatpush.msrb.mxu1 %v1261_v3  ;;  %1628 = vmatpush.msra.mxu2 %v2244_v23  ;;  %v1244_v23 = vld [vmem:[%s2755_s7 + $0x100] sm:$0xff] }
 0x16e   :  { %v2540_v42 = vpop.f32.mrf.mxu0  ;;  %1425 = vmatpush.msrb.mxu0 %v1244_v23 }
 0x16f   :  { %v2543_v57 = vadd.f32 %v743_v34, %v679_v52  ;;  %v2545_v60 = vpop.f32.mrf.mxu1  ;;  %1629 = vmatpush.msra.mxu2 %v2270_v35 }
 0x171   :  { %940 = vmatmul.f32.gmra.mxu2 %v2061_v15  ;;  %1070 = vmatmul.f32.gmra.mxu0 %v2061_v15  ;;  %v1260_v15 = vld [vmem:[%s2755_s7 + $0x180] sm:$0xff] }
 0x172   :  { %1005 = vmatmul.f32.gmra.mxu3 %v2089_v16  ;;  %1135 = vmatmul.f32.gmra.mxu1 %v2089_v16 }
 0x173   :  { %1490 = vmatpush.msrb.mxu1 %v1260_v15  ;;  %1630 = vmatpush.msra.mxu2 %v2296_v59 }
 0x174   :  { %v681_v13 = vpop.f32.mrf.mxu2 }
 0x175   :  { %v682_v16 = vadd.f32 %v681_v13, %v2234_v43  ;;  %v746_v36 = vpop.f32.mrf.mxu3  ;;  %1631 = vmatpush.msra.mxu2 %v2322_v14 }
 0x176   :  { %v2569_v25 = vpop.f32.mrf.mxu0 }
 0x177   :  { %v2572_v52 = vadd.f32 %v746_v36, %v682_v16  ;;  %v2574_v34 = vpop.f32.mrf.mxu1  ;;  %1632 = vmatpush.msra.mxu2 %v2348_v22 }
 0x179   :  { %943 = vmatmul.f32.gmra.mxu2 %v2085_v55  ;;  %1073 = vmatmul.f32.gmra.mxu0 %v2085_v55 }
 0x17a   :  { %1008 = vmatmul.f32.gmra.mxu3 %v2113_v12  ;;  %1138 = vmatmul.f32.gmra.mxu1 %v2113_v12  ;;  %v2600_v12 = vperm.slane %v2229_v53, 1 }
 0x17b   :  { %1633 = vmatpush.msra.mxu2 %v2374_v38 }
 0x17c   :  { %v684_v35 = vpop.f32.mrf.mxu2 }
 0x17d   :  { %v685_v63 = vadd.f32 %v684_v35, %v2234_v43  ;;  %v749_v3 = vpop.f32.mrf.mxu3  ;;  %1634 = vmatpush.msra.mxu2 %v2400_v37  ;;  %v2618_v37 = vperm.slane %v2229_v53, 3 }
 0x17e   :  { %v2587_v59 = vpop.f32.mrf.mxu0 }
 0x17f   :  { %v2589_v55 = vadd.f32 %v749_v3, %v685_v63  ;;  %v2591_v13 = vpop.f32.mrf.mxu1  ;;  %1635 = vmatpush.msra.mxu2 %v2426_v51 }
 0x181   :  { %946 = vmatmul.f32.gmra.mxu2 %v2109_v4  ;;  %1076 = vmatmul.f32.gmra.mxu0 %v2109_v4 }
 0x182   :  { %1011 = vmatmul.f32.gmra.mxu3 %v2133_v41  ;;  %1141 = vmatmul.f32.gmra.mxu1 %v2133_v41  ;;  %v776_v41 = vadd.f32 %v2222_v54, %v2600_v12 }
 0x183   :  { %1636 = vmatpush.msra.mxu2 %v2452_v49 }
 0x184   :  { %v687_v14 = vpop.f32.mrf.mxu2  ;;  %v841_v51 = vadd.f32 %v2224_v28, %v776_v41  ;;  %v779_v28 = vadd.f32 %v2254_v9, %v2600_v12  ;;  %v1152_v9 = vmax.f32 %v2282_v45, 0.0 }
 0x185   :  { %v688_v22 = vadd.f32 %v687_v14, %v2234_v43  ;;  %v752_v15 = vpop.f32.mrf.mxu3  ;;  %1637 = vmatpush.msra.mxu2 %v2478_v19 }
 0x186   :  { %v2604_v38 = vpop.f32.mrf.mxu0  ;;  %v1149_v14 = vmax.f32 %v841_v51, 0.0 }
 0x187   :  { %v2606_v16 = vadd.f32 %v752_v15, %v688_v22  ;;  %v2608_v4 = vpop.f32.mrf.mxu1  ;;  %1638 = vmatpush.msra.mxu2 %v2504_v33  ;;  %v844_v33 = vadd.f32 %v2258_v7, %v779_v28 }
 0x189   :  { %949 = vmatmul.f32.gmra.mxu2 %v2131_v46  ;;  %1079 = vmatmul.f32.gmra.mxu0 %v2131_v46  ;;  %v1148_v46 = vmax.f32 %v2256_v32, 0.0 }
 0x18a   :  { %1014 = vmatmul.f32.gmra.mxu3 %v2147_v18  ;;  %1144 = vmatmul.f32.gmra.mxu1 %v2147_v18 }
 0x18b   :  { %1639 = vmatpush.msra.mxu2 %v2530_v48 }
 0x18c   :  { %v690_v36 = vpop.f32.mrf.mxu2 }
 0x18d   :  { %v691_v49 = vadd.f32 %v690_v36, %v2234_v43  ;;  %v755_v35 = vpop.f32.mrf.mxu3  ;;  %v2632_v43 = vperm.slane %v2229_v53, 2  ;;  %1640 = vmatpush.msra.mxu2 %v2561_v21  ;;  %v782_v21 = vadd.f32 %v2280_v40, %v2600_v12 }
 0x18e   :  { %v1035_v54 = vpop.f32.mrf.mxu0 }
 0x18f   :  { %v2625_v63 = vadd.f32 %v755_v35, %v691_v49  ;;  %v1036_v18 = vadd.f32 %v1035_v54, %v2618_v37  ;;  %v1100_v3 = vpop.f32.mrf.mxu1  ;;  %1641 = vmatpush.msra.mxu2 %v1244_v23  ;;  %v1153_v49 = vmax.f32 %v844_v33, 0.0  ;;  %v847_v23 = vadd.f32 %v2284_v47, %v782_v21 }
 0x190   :  { %v785_v33 = vadd.f32 %v2306_v8, %v2600_v12 }
 0x191   :  { %v1101_v19 = vadd.f32 %v1100_v3, %v1036_v18  ;;  %1296 = vmatmul.f32.vlgmr.msrb.gmra.mxu2 %v1148_v46 }
 0x192   :  { %1361 = vmatmul.f32.vlgmr.msrb.gmra.mxu3 %v1149_v14  ;;  %v1156_v14 = vmax.f32 %v2308_v5, 0.0 }
 0x193   :  { %v1151_v32 = vmax.f32 %v1101_v19, 0.0 }
 0x194   :  { %v905_v22 = vpop.f32.mrf.mxu2 }
 0x195   :  { %v906_v15 = vadd.f32 %v905_v22, %v2632_v43  ;;  %v970_v48 = vpop.f32.mrf.mxu3  ;;  %1491 = vmatmul.f32.vlgmr.msrb.gmra.mxu1 %v1151_v32  ;;  %v1157_v32 = vmax.f32 %v847_v23, 0.0 }
 0x196   :  { %v1038_v41 = vpop.f32.mrf.mxu0 }
 0x197   :  { %v971_v51 = vadd.f32 %v970_v48, %v906_v15  ;;  %v1039_v36 = vadd.f32 %v1038_v41, %v2618_v37  ;;  %v1103_v53 = vpop.f32.mrf.mxu1  ;;  %v850_v48 = vadd.f32 %v2310_v11, %v785_v33 }
 0x199   :  { %v1150_v35 = vmax.f32 %v971_v51, 0.0  ;;  %v1104_v54 = vadd.f32 %v1103_v53, %v1039_v36  ;;  %1299 = vmatmul.f32.gmra.mxu2 %v1152_v9  ;;  %v1160_v36 = vmax.f32 %v2334_v24, 0.0  ;;  %v1161_v21 = vmax.f32 %v850_v48, 0.0 }
 0x19a   :  { %1364 = vmatmul.f32.gmra.mxu3 %v1153_v49 }
 0x19b   :  { %v1155_v7 = vmax.f32 %v1104_v54, 0.0  ;;  %1426 = vmatmul.f32.vlgmr.msrb.gmra.mxu0 %v1150_v35  ;;  %v788_v35 = vadd.f32 %v2332_v20, %v2600_v12 }
 0x19c   :  { %v908_v46 = vpop.f32.mrf.mxu2 }
 0x19d   :  { %v909_v18 = vadd.f32 %v908_v46, %v2632_v43  ;;  %v973_v45 = vpop.f32.mrf.mxu3  ;;  %1494 = vmatmul.f32.gmra.mxu1 %v1155_v7  ;;  %v853_v23 = vadd.f32 %v2336_v27, %v788_v35 }
 0x19e   :  { %v1041_v3 = vpop.f32.mrf.mxu0 }
 0x19f   :  { %v974_v28 = vadd.f32 %v973_v45, %v909_v18  ;;  %v1042_v19 = vadd.f32 %v1041_v3, %v2618_v37  ;;  %v1106_v40 = vpop.f32.mrf.mxu1  ;;  %v1164_v3 = vmax.f32 %v2360_v50, 0.0 }
 0x1a1   :  { %v1154_v22 = vmax.f32 %v974_v28, 0.0  ;;  %v1107_v15 = vadd.f32 %v1106_v40, %v1042_v19  ;;  %1302 = vmatmul.f32.gmra.mxu2 %v1156_v14  ;;  %v1165_v19 = vmax.f32 %v853_v23, 0.0  ;;  %v791_v40 = vadd.f32 %v2358_v39, %v2600_v12 }
 0x1a2   :  { %1367 = vmatmul.f32.gmra.mxu3 %v1157_v32 }
 0x1a3   :  { %v1159_v47 = vmax.f32 %v1107_v15, 0.0  ;;  %1429 = vmatmul.f32.gmra.mxu0 %v1154_v22  ;;  %v856_v22 = vadd.f32 %v2362_v1, %v791_v40 }
 0x1a4   :  { %v911_v41 = vpop.f32.mrf.mxu2 }
 0x1a5   :  { %v912_v9 = vadd.f32 %v911_v41, %v2632_v43  ;;  %v976_v5 = vpop.f32.mrf.mxu3  ;;  %1497 = vmatmul.f32.gmra.mxu1 %v1159_v47  ;;  %v1168_v41 = vmax.f32 %v2386_v17, 0.0 }
 0x1a6   :  { %v1044_v51 = vpop.f32.mrf.mxu0 }
 0x1a7   :  { %v977_v53 = vadd.f32 %v976_v5, %v912_v9  ;;  %v1045_v49 = vadd.f32 %v1044_v51, %v2618_v37  ;;  %v1109_v8 = vpop.f32.mrf.mxu1  ;;  %v1169_v51 = vmax.f32 %v856_v22, 0.0 }
 0x1a9   :  { %v1158_v54 = vmax.f32 %v977_v53, 0.0  ;;  %v1110_v7 = vadd.f32 %v1109_v8, %v1045_v49  ;;  %1305 = vmatmul.f32.gmra.mxu2 %v1160_v36  ;;  %v794_v36 = vadd.f32 %v2384_v6, %v2600_v12 }
 0x1aa   :  { %1370 = vmatmul.f32.gmra.mxu3 %v1161_v21 }
 0x1ab   :  { %v1163_v11 = vmax.f32 %v1110_v7, 0.0  ;;  %1432 = vmatmul.f32.gmra.mxu0 %v1158_v54  ;;  %v859_v8 = vadd.f32 %v2388_v62, %v794_v36  ;;  %v1172_v7 = vmax.f32 %v2412_v30, 0.0  ;;  %v803_v36 = vadd.f32 %v2462_v2, %v2600_v12 }
 0x1ac   :  { %v914_v46 = vpop.f32.mrf.mxu2 }
 0x1ad   :  { %v915_v18 = vadd.f32 %v914_v46, %v2632_v43  ;;  %v979_v24 = vpop.f32.mrf.mxu3  ;;  %1500 = vmatmul.f32.gmra.mxu1 %v1163_v11  ;;  %v1173_v46 = vmax.f32 %v859_v8, 0.0 }
 0x1ae   :  { %v1047_v45 = vpop.f32.mrf.mxu0 }
 0x1af   :  { %v980_v14 = vadd.f32 %v979_v24, %v915_v18  ;;  %v1048_v28 = vadd.f32 %v1047_v45, %v2618_v37  ;;  %v1112_v20 = vpop.f32.mrf.mxu1  ;;  %v797_v18 = vadd.f32 %v2410_v26, %v2600_v12 }
 0x1b1   :  { %v1162_v32 = vmax.f32 %v980_v14, 0.0  ;;  %v1113_v33 = vadd.f32 %v1112_v20, %v1048_v28  ;;  %1308 = vmatmul.f32.gmra.mxu2 %v1164_v3  ;;  %v862_v3 = vadd.f32 %v2414_v0, %v797_v18 }
 0x1b2   :  { %1373 = vmatmul.f32.gmra.mxu3 %v1165_v19  ;;  %v1176_v19 = vmax.f32 %v2438_v44, 0.0 }
 0x1b3   :  { %v1167_v27 = vmax.f32 %v1113_v33, 0.0  ;;  %1435 = vmatmul.f32.gmra.mxu0 %v1162_v32  ;;  %v1177_v33 = vmax.f32 %v862_v3, 0.0 }
 0x1b4   :  { %v917_v15 = vpop.f32.mrf.mxu2 }
 0x1b5   :  { %v918_v47 = vadd.f32 %v917_v15, %v2632_v43  ;;  %v982_v50 = vpop.f32.mrf.mxu3  ;;  %1503 = vmatmul.f32.gmra.mxu1 %v1167_v27  ;;  %v800_v27 = vadd.f32 %v2436_v56, %v2600_v12 }
 0x1b6   :  { %v1050_v48 = vpop.f32.mrf.mxu0 }
 0x1b7   :  { %v983_v9 = vadd.f32 %v982_v50, %v918_v47  ;;  %v1051_v5 = vadd.f32 %v1050_v48, %v2618_v37  ;;  %v1115_v39 = vpop.f32.mrf.mxu1  ;;  %v865_v47 = vadd.f32 %v2440_v31, %v800_v27 }
 0x1b9   :  { %v1166_v53 = vmax.f32 %v983_v9, 0.0  ;;  %v1116_v49 = vadd.f32 %v1115_v39, %v1051_v5  ;;  %1311 = vmatmul.f32.gmra.mxu2 %v1168_v41  ;;  %v1180_v9 = vmax.f32 %v2464_v58, 0.0 }
 0x1ba   :  { %1376 = vmatmul.f32.gmra.mxu3 %v1169_v51  ;;  %v1181_v51 = vmax.f32 %v865_v47, 0.0 }
 0x1bb   :  { %v1171_v1 = vmax.f32 %v1116_v49, 0.0  ;;  %1438 = vmatmul.f32.gmra.mxu0 %v1166_v53 }
 0x1bc   :  { %v920_v21 = vpop.f32.mrf.mxu2 }
 0x1bd   :  { %v921_v35 = vadd.f32 %v920_v21, %v2632_v43  ;;  %v985_v17 = vpop.f32.mrf.mxu3  ;;  %1506 = vmatmul.f32.gmra.mxu1 %v1171_v1  ;;  %v868_v1 = vadd.f32 %v2466_v61, %v803_v36 }
 0x1be   :  { %v1053_v54 = vpop.f32.mrf.mxu0 }
 0x1bf   :  { %v986_v11 = vadd.f32 %v985_v17, %v921_v35  ;;  %v1054_v23 = vadd.f32 %v1053_v54, %v2618_v37  ;;  %v1118_v6 = vpop.f32.mrf.mxu1  ;;  %v1184_v17 = vmax.f32 %v2490_v29, 0.0 }
 0x1c1   :  { %v1170_v24 = vmax.f32 %v986_v11, 0.0  ;;  %v1119_v45 = vadd.f32 %v1118_v6, %v1054_v23  ;;  %1314 = vmatmul.f32.gmra.mxu2 %v1172_v7  ;;  %v1185_v11 = vmax.f32 %v868_v1, 0.0  ;;  %v2762_v23 = vld [vmem:[#allocation8_spill] sm:$0xff] }
 0x1c2   :  { %1379 = vmatmul.f32.gmra.mxu3 %v1173_v46  ;;  %v806_v6 = vadd.f32 %v2762_v23, %v2600_v12 }
 0x1c3   :  { %v1175_v62 = vmax.f32 %v1119_v45, 0.0  ;;  %1441 = vmatmul.f32.gmra.mxu0 %v1170_v24  ;;  %v2763_v24 = vld [vmem:[#allocation9_spill] sm:$0xff] }
 0x1c4   :  { %v923_v14 = vpop.f32.mrf.mxu2  ;;  %v871_v45 = vadd.f32 %v2763_v24, %v806_v6 }
 0x1c5   :  { %v924_v28 = vadd.f32 %v923_v14, %v2632_v43  ;;  %v988_v30 = vpop.f32.mrf.mxu3  ;;  %1509 = vmatmul.f32.gmra.mxu1 %v1175_v62 }
 0x1c6   :  { %v1056_v20 = vpop.f32.mrf.mxu0 }
 0x1c7   :  { %v989_v40 = vadd.f32 %v988_v30, %v924_v28  ;;  %v1057_v32 = vadd.f32 %v1056_v20, %v2618_v37  ;;  %v1121_v26 = vpop.f32.mrf.mxu1  ;;  %v1188_v28 = vmax.f32 %v2516_v10, 0.0 }
 0x1c9   :  { %v1174_v22 = vmax.f32 %v989_v40, 0.0  ;;  %v1122_v15 = vadd.f32 %v1121_v26, %v1057_v32  ;;  %1317 = vmatmul.f32.gmra.mxu2 %v1176_v19  ;;  %v1189_v40 = vmax.f32 %v871_v45, 0.0  ;;  %v2764_v32 = vld [vmem:[#allocation10_spill] sm:$0xff] }
 0x1ca   :  { %1382 = vmatmul.f32.gmra.mxu3 %v1177_v33  ;;  %v809_v26 = vadd.f32 %v2764_v32, %v2600_v12 }
 0x1cb   :  { %v1179_v0 = vmax.f32 %v1122_v15, 0.0  ;;  %1444 = vmatmul.f32.gmra.mxu0 %v1174_v22  ;;  %v2765_v15 = vld [vmem:[#allocation11_spill] sm:$0xff] }
 0x1cc   :  { %v926_v50 = vpop.f32.mrf.mxu2 }
 0x1cd   :  { %v927_v48 = vadd.f32 %v926_v50, %v2632_v43  ;;  %v991_v44 = vpop.f32.mrf.mxu3  ;;  %1512 = vmatmul.f32.gmra.mxu1 %v1179_v0  ;;  %v874_v0 = vadd.f32 %v2765_v15, %v809_v26 }
 0x1ce   :  { %v1059_v41 = vpop.f32.mrf.mxu0 }
 0x1cf   :  { %v992_v5 = vadd.f32 %v991_v44, %v927_v48  ;;  %v1060_v39 = vadd.f32 %v1059_v41, %v2618_v37  ;;  %v1124_v56 = vpop.f32.mrf.mxu1  ;;  %v1192_v44 = vmax.f32 %v2543_v57, 0.0 }
 0x1d1   :  { %v1178_v53 = vmax.f32 %v992_v5, 0.0  ;;  %v1125_v49 = vadd.f32 %v1124_v56, %v1060_v39  ;;  %1320 = vmatmul.f32.gmra.mxu2 %v1180_v9  ;;  %v1193_v39 = vmax.f32 %v874_v0, 0.0  ;;  %v812_v56 = vadd.f32 %v2540_v42, %v2600_v12 }
 0x1d2   :  { %1385 = vmatmul.f32.gmra.mxu3 %v1181_v51 }
 0x1d3   :  { %v1183_v31 = vmax.f32 %v1125_v49, 0.0  ;;  %1447 = vmatmul.f32.gmra.mxu0 %v1178_v53  ;;  %v877_v49 = vadd.f32 %v2545_v60, %v812_v56 }
 0x1d4   :  { %v929_v8 = vpop.f32.mrf.mxu2 }
 0x1d5   :  { %v930_v21 = vadd.f32 %v929_v8, %v2632_v43  ;;  %v994_v58 = vpop.f32.mrf.mxu3  ;;  %1515 = vmatmul.f32.gmra.mxu1 %v1183_v31 }
 0x1d6   :  { %v1062_v35 = vpop.f32.mrf.mxu0 }
 0x1d7   :  { %v995_v54 = vadd.f32 %v994_v58, %v930_v21  ;;  %v1063_v7 = vadd.f32 %v1062_v35, %v2618_v37  ;;  %v1127_v2 = vpop.f32.mrf.mxu1  ;;  %v1196_v21 = vmax.f32 %v2572_v52, 0.0 }
 0x1d9   :  { %v1182_v46 = vmax.f32 %v995_v54, 0.0  ;;  %v1128_v18 = vadd.f32 %v1127_v2, %v1063_v7  ;;  %1323 = vmatmul.f32.gmra.mxu2 %v1184_v17  ;;  %v1197_v17 = vmax.f32 %v877_v49, 0.0  ;;  %v815_v54 = vadd.f32 %v2569_v25, %v2600_v12 }
 0x1da   :  { %1388 = vmatmul.f32.gmra.mxu3 %v1185_v11 }
 0x1db   :  { %v1187_v61 = vmax.f32 %v1128_v18, 0.0  ;;  %1450 = vmatmul.f32.gmra.mxu0 %v1182_v46  ;;  %v880_v11 = vadd.f32 %v2574_v34, %v815_v54  ;;  %v1200_v18 = vmax.f32 %v2589_v55, 0.0 }
 0x1dc   :  { %v932_v62 = vpop.f32.mrf.mxu2 }
 0x1dd   :  { %v933_v3 = vadd.f32 %v932_v62, %v2632_v43  ;;  %v997_v29 = vpop.f32.mrf.mxu3  ;;  %1518 = vmatmul.f32.gmra.mxu1 %v1187_v61  ;;  %v1201_v45 = vmax.f32 %v880_v11, 0.0  ;;  %v818_v62 = vadd.f32 %v2587_v59, %v2600_v12 }
 0x1de   :  { %v1065_v14 = vpop.f32.mrf.mxu0 }
 0x1df   :  { %v998_v30 = vadd.f32 %v997_v29, %v933_v3  ;;  %v1066_v20 = vadd.f32 %v1065_v14, %v2618_v37  ;;  %v1130_v19 = vpop.f32.mrf.mxu1  ;;  %v883_v14 = vadd.f32 %v2591_v13, %v818_v62 }
 0x1e1   :  { %v1186_v33 = vmax.f32 %v998_v30, 0.0  ;;  %v1131_v27 = vadd.f32 %v1130_v19, %v1066_v20  ;;  %1326 = vmatmul.f32.gmra.mxu2 %v1188_v28  ;;  %v1204_v19 = vmax.f32 %v2606_v16, 0.0  ;;  %v1205_v26 = vmax.f32 %v883_v14, 0.0 }
 0x1e2   :  { %1391 = vmatmul.f32.gmra.mxu3 %v1189_v40 }
 0x1e3   :  { %v1191_v22 = vmax.f32 %v1131_v27, 0.0  ;;  %1453 = vmatmul.f32.gmra.mxu0 %v1186_v33  ;;  %v821_v33 = vadd.f32 %v2604_v38, %v2600_v12 }
 0x1e4   :  { %v935_v47 = vpop.f32.mrf.mxu2 }
 0x1e5   :  { %v936_v50 = vadd.f32 %v935_v47, %v2632_v43  ;;  %v1000_v10 = vpop.f32.mrf.mxu3  ;;  %1521 = vmatmul.f32.gmra.mxu1 %v1191_v22  ;;  %v886_v15 = vadd.f32 %v2608_v4, %v821_v33 }
 0x1e6   :  { %v1068_v48 = vpop.f32.mrf.mxu0 }
 0x1e7   :  { %v1001_v41 = vadd.f32 %v1000_v10, %v936_v50  ;;  %v1069_v9 = vadd.f32 %v1068_v48, %v2618_v37  ;;  %v1133_v5 = vpop.f32.mrf.mxu1  ;;  %v1208_v10 = vmax.f32 %v2625_v63, 0.0  ;;  %v1209_v12 = vmax.f32 %v886_v15, 0.0  ;;  %v2727_v63 = vld [vmem:[%s2756_s8] ss:$0 sm:$0xff]  ;;  %s1707_s8 = smov [#allocation5]  }
 0x1e8   :  { %s1578_s30 = sshll.u32 %s1707_s8, 4  ;;  %s1579_s30 = int_to_ptr.vmem [resolvable:$true] %s1578_s30 }
 0x1e9   :  { %v1190_v51 = vmax.f32 %v1001_v41, 0.0  ;;  %v1134_v36 = vadd.f32 %v1133_v5, %v1069_v9  ;;  %1329 = vmatmul.f32.gmra.mxu2 %v1192_v44 }
 0x1ea   :  { %1394 = vmatmul.f32.gmra.mxu3 %v1193_v39 }
 0x1eb   :  { %v1195_v53 = vmax.f32 %v1134_v36, 0.0  ;;  %1456 = vmatmul.f32.gmra.mxu0 %v1190_v51 }
 0x1ec   :  { %v938_v31 = vpop.f32.mrf.mxu2 }
 0x1ed   :  { %v939_v1 = vadd.f32 %v938_v31, %v2632_v43  ;;  %v1003_v57 = vpop.f32.mrf.mxu3  ;;  %1524 = vmatmul.f32.gmra.mxu1 %v1195_v53 }
 0x1ee   :  { %v1071_v8 = vpop.f32.mrf.mxu0 }
 0x1ef   :  { %v1004_v58 = vadd.f32 %v1003_v57, %v939_v1  ;;  %v1072_v35 = vadd.f32 %v1071_v8, %v2618_v37  ;;  %v1136_v42 = vpop.f32.mrf.mxu1 }
 0x1f1   :  { %v1194_v7 = vmax.f32 %v1004_v58, 0.0  ;;  %v1137_v2 = vadd.f32 %v1136_v42, %v1072_v35  ;;  %1332 = vmatmul.f32.gmra.mxu2 %v1196_v21 }
 0x1f2   :  { %1397 = vmatmul.f32.gmra.mxu3 %v1197_v17 }
 0x1f3   :  { %v1199_v60 = vmax.f32 %v1137_v2, 0.0  ;;  %1459 = vmatmul.f32.gmra.mxu0 %v1194_v7 }
 0x1f4   :  { %v941_v23 = vpop.f32.mrf.mxu2 }
 0x1f5   :  { %v942_v6 = vadd.f32 %v941_v23, %v2632_v43  ;;  %v1006_v52 = vpop.f32.mrf.mxu3  ;;  %1527 = vmatmul.f32.gmra.mxu1 %v1199_v60 }
 0x1f6   :  { %v1074_v46 = vpop.f32.mrf.mxu0 }
 0x1f7   :  { %v1007_v61 = vadd.f32 %v1006_v52, %v942_v6  ;;  %v1075_v24 = vadd.f32 %v1074_v46, %v2618_v37  ;;  %v1139_v25 = vpop.f32.mrf.mxu1 }
 0x1f9   :  { %v1198_v3 = vmax.f32 %v1007_v61, 0.0  ;;  %v1140_v29 = vadd.f32 %v1139_v25, %v1075_v24  ;;  %1335 = vmatmul.f32.gmra.mxu2 %v1200_v18 }
 0x1fa   :  { %1400 = vmatmul.f32.gmra.mxu3 %v1201_v45 }
 0x1fb   :  { %v1203_v34 = vmax.f32 %v1140_v29, 0.0  ;;  %1462 = vmatmul.f32.gmra.mxu0 %v1198_v3 }
 0x1fc   :  { %v944_v28 = vpop.f32.mrf.mxu2 }
 0x1fd   :  { %v945_v30 = vadd.f32 %v944_v28, %v2632_v43  ;;  %v1009_v55 = vpop.f32.mrf.mxu3  ;;  %1530 = vmatmul.f32.gmra.mxu1 %v1203_v34 }
 0x1fe   :  { %v1077_v20 = vpop.f32.mrf.mxu0 }
 0x1ff   :  { %v1010_v40 = vadd.f32 %v1009_v55, %v945_v30  ;;  %v1078_v32 = vadd.f32 %v1077_v20, %v2618_v37  ;;  %v1142_v59 = vpop.f32.mrf.mxu1 }
 0x201   :  { %v1202_v27 = vmax.f32 %v1010_v40, 0.0  ;;  %v1143_v22 = vadd.f32 %v1142_v59, %v1078_v32  ;;  %1338 = vmatmul.f32.gmra.mxu2 %v1204_v19 }
 0x202   :  { %1403 = vmatmul.f32.gmra.mxu3 %v1205_v26 }
 0x203   :  { %v1207_v13 = vmax.f32 %v1143_v22, 0.0  ;;  %1465 = vmatmul.f32.gmra.mxu0 %v1202_v27 }
 0x204   :  { %v947_v0 = vpop.f32.mrf.mxu2 }
 0x205   :  { %v948_v47 = vadd.f32 %v947_v0, %v2632_v43  ;;  %v1012_v16 = vpop.f32.mrf.mxu3  ;;  %1533 = vmatmul.f32.gmra.mxu1 %v1207_v13 }
 0x206   :  { %v1080_v50 = vpop.f32.mrf.mxu0 }
 0x207   :  { %v1013_v48 = vadd.f32 %v1012_v16, %v948_v47  ;;  %v1081_v44 = vadd.f32 %v1080_v50, %v2618_v37  ;;  %v1145_v38 = vpop.f32.mrf.mxu1 }
 0x209   :  { %v1206_v41 = vmax.f32 %v1013_v48, 0.0  ;;  %v1146_v9 = vadd.f32 %v1145_v38, %v1081_v44  ;;  %1341 = vmatmul.f32.gmra.mxu2 %v1208_v10 }
 0x20a   :  { %1406 = vmatmul.f32.gmra.mxu3 %v1209_v12 }
 0x20b   :  { %v1211_v5 = vmax.f32 %v1146_v9, 0.0  ;;  %1468 = vmatmul.f32.gmra.mxu0 %v1206_v41 }
 0x20c   :  { %v950_v4 = vpop.f32.mrf.mxu2 }
 0x20d   :  { %v951_v39 = vadd.f32 %v950_v4, %v2632_v43  ;;  %v1015_v56 = vpop.f32.mrf.mxu3  ;;  %1536 = vmatmul.f32.gmra.mxu1 %v1211_v5 }
 0x20f   :  { %v1016_v51 = vadd.f32 %v1015_v56, %v951_v39 }
 0x211   :  { %v1210_v36 = vmax.f32 %v1016_v51, 0.0 }
 0x212   :  { %v1492_v37 = vpop.f32.mrf.mxu1 }
 0x213   :  { %1471 = vmatmul.f32.vlgmr.msra.gmra.mxu2 %v1210_v36 }
 0x214   :  { %v1297_v53 = vpop.f32.mrf.mxu2 }
 0x215   :  { %v1298_v49 = vadd.f32 %v2727_v63, %v1297_v53  ;;  %v1362_v31 = vpop.f32.mrf.mxu3 }
 0x217   :  { %v1363_v1 = vadd.f32 %v1362_v31, %v1298_v49 }
 0x218   :  { %v1427_v57 = vpop.f32.mrf.mxu0 }
 0x219   :  { %v1428_v8 = vadd.f32 %v1427_v57, %v1363_v1 }
 0x21a   :  { %v1495_v21 = vpop.f32.mrf.mxu1 }
 0x21b   :  { %v1493_v43 = vadd.f32 %v1492_v37, %v1428_v8 }
 0x21c   :  { %v1300_v58 = vpop.f32.mrf.mxu2 }
 0x21d   :  { %v1301_v35 = vadd.f32 %v2727_v63, %v1300_v58  ;;  %v1365_v42 = vpop.f32.mrf.mxu3  ;;  %1540 = vxpose.xlu1.b32.start [1/16] (narrow) %v1493_v43, 8 }
 0x21f   :  { %v1366_v17 = vadd.f32 %v1365_v42, %v1301_v35 }
 0x220   :  { %v1430_v54 = vpop.f32.mrf.mxu0 }
 0x221   :  { %v1431_v7 = vadd.f32 %v1430_v54, %v1366_v17 }
 0x222   :  { %v1498_v2 = vpop.f32.mrf.mxu1 }
 0x223   :  { %v1496_v60 = vadd.f32 %v1495_v21, %v1431_v7 }
 0x224   :  { %v1303_v11 = vpop.f32.mrf.mxu2 }
 0x225   :  { %v1304_v23 = vadd.f32 %v2727_v63, %v1303_v11  ;;  %v1368_v6 = vpop.f32.mrf.mxu3  ;;  %1541 = vxpose.xlu1.b32.cont [2/16] (narrow) %v1496_v60, 8 }
 0x227   :  { %v1369_v52 = vadd.f32 %v1368_v6, %v1304_v23 }
 0x228   :  { %v1433_v46 = vpop.f32.mrf.mxu0 }
 0x229   :  { %v1434_v18 = vadd.f32 %v1433_v46, %v1369_v52 }
 0x22a   :  { %v1501_v61 = vpop.f32.mrf.mxu1 }
 0x22b   :  { %v1499_v24 = vadd.f32 %v1498_v2, %v1434_v18 }
 0x22c   :  { %v1306_v25 = vpop.f32.mrf.mxu2 }
 0x22d   :  { %v1307_v45 = vadd.f32 %v2727_v63, %v1306_v25  ;;  %v1371_v62 = vpop.f32.mrf.mxu3  ;;  %1542 = vxpose.xlu1.b32.cont [3/16] (narrow) %v1499_v24, 8 }
 0x22f   :  { %v1372_v3 = vadd.f32 %v1371_v62, %v1307_v45 }
 0x230   :  { %v1436_v29 = vpop.f32.mrf.mxu0 }
 0x231   :  { %v1437_v34 = vadd.f32 %v1436_v29, %v1372_v3 }
 0x232   :  { %v1504_v14 = vpop.f32.mrf.mxu1 }
 0x233   :  { %v1502_v28 = vadd.f32 %v1501_v61, %v1437_v34 }
 0x234   :  { %v1309_v30 = vpop.f32.mrf.mxu2 }
 0x235   :  { %v1310_v55 = vadd.f32 %v2727_v63, %v1309_v30  ;;  %v1374_v20 = vpop.f32.mrf.mxu3  ;;  %1543 = vxpose.xlu1.b32.cont [4/16] (narrow) %v1502_v28, 8 }
 0x237   :  { %v1375_v19 = vadd.f32 %v1374_v20, %v1310_v55 }
 0x238   :  { %v1439_v40 = vpop.f32.mrf.mxu0 }
 0x239   :  { %v1440_v32 = vadd.f32 %v1439_v40, %v1375_v19 }
 0x23a   :  { %v1507_v59 = vpop.f32.mrf.mxu1 }
 0x23b   :  { %v1505_v26 = vadd.f32 %v1504_v14, %v1440_v32 }
 0x23c   :  { %v1312_v33 = vpop.f32.mrf.mxu2 }
 0x23d   :  { %v1313_v27 = vadd.f32 %v2727_v63, %v1312_v33  ;;  %v1377_v22 = vpop.f32.mrf.mxu3  ;;  %1544 = vxpose.xlu1.b32.cont [5/16] (narrow) %v1505_v26, 8 }
 0x23f   :  { %v1378_v13 = vadd.f32 %v1377_v22, %v1313_v27 }
 0x240   :  { %v1442_v15 = vpop.f32.mrf.mxu0 }
 0x241   :  { %v1443_v0 = vadd.f32 %v1442_v15, %v1378_v13 }
 0x242   :  { %v1510_v47 = vpop.f32.mrf.mxu1 }
 0x243   :  { %v1508_v16 = vadd.f32 %v1507_v59, %v1443_v0 }
 0x244   :  { %v1315_v50 = vpop.f32.mrf.mxu2 }
 0x245   :  { %v1316_v10 = vadd.f32 %v2727_v63, %v1315_v50  ;;  %v1380_v48 = vpop.f32.mrf.mxu3  ;;  %1545 = vxpose.xlu1.b32.cont [6/16] (narrow) %v1508_v16, 8 }
 0x247   :  { %v1381_v44 = vadd.f32 %v1380_v48, %v1316_v10 }
 0x248   :  { %v1445_v12 = vpop.f32.mrf.mxu0 }
 0x249   :  { %v1446_v38 = vadd.f32 %v1445_v12, %v1381_v44 }
 0x24a   :  { %v1513_v41 = vpop.f32.mrf.mxu1 }
 0x24b   :  { %v1511_v9 = vadd.f32 %v1510_v47, %v1446_v38 }
 0x24c   :  { %v1318_v5 = vpop.f32.mrf.mxu2 }
 0x24d   :  { %v1319_v4 = vadd.f32 %v2727_v63, %v1318_v5  ;;  %v1383_v39 = vpop.f32.mrf.mxu3  ;;  %1546 = vxpose.xlu1.b32.cont [7/16] (narrow) %v1511_v9, 8 }
 0x24f   :  { %v1384_v56 = vadd.f32 %v1383_v39, %v1319_v4 }
 0x250   :  { %v1448_v51 = vpop.f32.mrf.mxu0 }
 0x251   :  { %v1449_v36 = vadd.f32 %v1448_v51, %v1384_v56 }
 0x252   :  { %v1516_v37 = vpop.f32.mrf.mxu1 }
 0x253   :  { %v1514_v53 = vadd.f32 %v1513_v41, %v1449_v36 }
 0x254   :  { %v1321_v49 = vpop.f32.mrf.mxu2 }
 0x255   :  { %v1322_v31 = vadd.f32 %v2727_v63, %v1321_v49  ;;  %v1386_v1 = vpop.f32.mrf.mxu3  ;;  %1547 = vxpose.xlu1.b32.cont [8/16] (narrow) %v1514_v53, 8 }
 0x257   :  { %v1387_v57 = vadd.f32 %v1386_v1, %v1322_v31 }
 0x258   :  { %v1451_v8 = vpop.f32.mrf.mxu0 }
 0x259   :  { %v1452_v21 = vadd.f32 %v1451_v8, %v1387_v57 }
 0x25a   :  { %v1519_v43 = vpop.f32.mrf.mxu1 }
 0x25b   :  { %v1517_v58 = vadd.f32 %v1516_v37, %v1452_v21 }
 0x25c   :  { %v1324_v35 = vpop.f32.mrf.mxu2 }
 0x25d   :  { %v1325_v42 = vadd.f32 %v2727_v63, %v1324_v35  ;;  %v1389_v17 = vpop.f32.mrf.mxu3  ;;  %1548 = vxpose.xlu1.b32.cont [9/16] (narrow) %v1517_v58, 8 }
 0x25f   :  { %v1390_v54 = vadd.f32 %v1389_v17, %v1325_v42 }
 0x260   :  { %v1454_v7 = vpop.f32.mrf.mxu0 }
 0x261   :  { %v1455_v2 = vadd.f32 %v1454_v7, %v1390_v54 }
 0x262   :  { %v1522_v60 = vpop.f32.mrf.mxu1 }
 0x263   :  { %v1520_v11 = vadd.f32 %v1519_v43, %v1455_v2 }
 0x264   :  { %v1327_v23 = vpop.f32.mrf.mxu2 }
 0x265   :  { %v1328_v6 = vadd.f32 %v2727_v63, %v1327_v23  ;;  %v1392_v52 = vpop.f32.mrf.mxu3  ;;  %1549 = vxpose.xlu1.b32.cont [10/16] (narrow) %v1520_v11, 8 }
 0x267   :  { %v1393_v46 = vadd.f32 %v1392_v52, %v1328_v6 }
 0x268   :  { %v1457_v18 = vpop.f32.mrf.mxu0 }
 0x269   :  { %v1458_v61 = vadd.f32 %v1457_v18, %v1393_v46 }
 0x26a   :  { %v1525_v25 = vpop.f32.mrf.mxu1 }
 0x26b   :  { %v1523_v24 = vadd.f32 %v1522_v60, %v1458_v61 }
 0x26c   :  { %v1330_v45 = vpop.f32.mrf.mxu2 }
 0x26d   :  { %v1331_v62 = vadd.f32 %v2727_v63, %v1330_v45  ;;  %v1395_v3 = vpop.f32.mrf.mxu3  ;;  %1550 = vxpose.xlu1.b32.cont [11/16] (narrow) %v1523_v24, 8 }
 0x26f   :  { %v1396_v29 = vadd.f32 %v1395_v3, %v1331_v62 }
 0x270   :  { %v1460_v34 = vpop.f32.mrf.mxu0 }
 0x271   :  { %v1461_v14 = vadd.f32 %v1460_v34, %v1396_v29 }
 0x272   :  { %v1528_v19 = vpop.f32.mrf.mxu1 }
 0x273   :  { %v1526_v28 = vadd.f32 %v1525_v25, %v1461_v14 }
 0x274   :  { %v1333_v30 = vpop.f32.mrf.mxu2 }
 0x275   :  { %v1334_v55 = vadd.f32 %v2727_v63, %v1333_v30  ;;  %v1398_v20 = vpop.f32.mrf.mxu3  ;;  %1551 = vxpose.xlu1.b32.cont [12/16] (narrow) %v1526_v28, 8 }
 0x277   :  { %v1399_v40 = vadd.f32 %v1398_v20, %v1334_v55 }
 0x278   :  { %v1463_v32 = vpop.f32.mrf.mxu0 }
 0x279   :  { %v1464_v59 = vadd.f32 %v1463_v32, %v1399_v40 }
 0x27a   :  { %v1531_v15 = vpop.f32.mrf.mxu1 }
 0x27b   :  { %v1529_v26 = vadd.f32 %v1528_v19, %v1464_v59 }
 0x27c   :  { %v1336_v33 = vpop.f32.mrf.mxu2 }
 0x27d   :  { %v1337_v27 = vadd.f32 %v2727_v63, %v1336_v33  ;;  %v1401_v22 = vpop.f32.mrf.mxu3  ;;  %1552 = vxpose.xlu1.b32.cont [13/16] (narrow) %v1529_v26, 8 }
 0x27f   :  { %v1402_v13 = vadd.f32 %v1401_v22, %v1337_v27 }
 0x280   :  { %v1466_v0 = vpop.f32.mrf.mxu0 }
 0x281   :  { %v1467_v47 = vadd.f32 %v1466_v0, %v1402_v13 }
 0x282   :  { %v1534_v41 = vpop.f32.mrf.mxu1 }
 0x283   :  { %v1532_v16 = vadd.f32 %v1531_v15, %v1467_v47 }
 0x284   :  { %v1339_v50 = vpop.f32.mrf.mxu2 }
 0x285   :  { %v1340_v10 = vadd.f32 %v2727_v63, %v1339_v50  ;;  %1553 = vxpose.xlu1.b32.cont [14/16] (narrow) %v1532_v16, 8  ;;  %v1404_v48 = vpop.f32.mrf.mxu3 }
 0x287   :  { %v1405_v44 = vadd.f32 %v1404_v48, %v1340_v10 }
 0x288   :  { %v1469_v12 = vpop.f32.mrf.mxu0 }
 0x289   :  { %v1470_v38 = vadd.f32 %v1469_v12, %v1405_v44 }
 0x28a   :  { %v1537_v37 = vpop.f32.mrf.mxu1 }
 0x28b   :  { %v1535_v9 = vadd.f32 %v1534_v41, %v1470_v38 }
 0x28c   :  { %v1342_v5 = vpop.f32.mrf.mxu2 }
 0x28d   :  { %1554 = vxpose.xlu1.b32.cont [15/16] (narrow) %v1535_v9, 8  ;;  %v1343_v4 = vadd.f32 %v2727_v63, %v1342_v5  ;;  %v1407_v39 = vpop.f32.mrf.mxu3 }
 0x28f   :  { %v1408_v56 = vadd.f32 %v1407_v39, %v1343_v4 }
 0x296   :  { %v1472_v51 = vpop.f32.mrf.mxu2 }
 0x297   :  { %v1473_v36 = vadd.f32 %v1472_v51, %v1408_v56 }
 0x299   :  { %v1538_v53 = vadd.f32 %v1537_v37, %v1473_v36 }
 0x29b   :  { %1555 = vxpose.xlu1.b32.end [16/16] (narrow) %v1538_v53, 8 }
 0x2c7   :  { %v1556_v49 = vpop.trf.xlu1 }
 0x2c8   :  { %1572 = vst [vmem:[#allocation5] sm:$0xff] %v1556_v49 }
 0x2c9   :  { %1583 = dma.vmem_to_hbm [thread:$0]  %s1579_s30, 128, %s1581_s11, [#allocation4]  }
 0x2ca   :  { %1701 = dma.done.wait [#allocation4], 128  }
 0x2cb   :  { %1702 = vsyncadd [#allocation4], 4294967168 }
 0x2cc   :  { %1588 = vsyncpa [#allocation3], 1 }
 0x2cd   :  { %1589 = vsyncpa [#allocation4], 1 }

</bundles_post_ra>
